<compile_context>
chip_gen: v7x
topology: tpu7x:2x2x1
jax: 0.10.0
libtpu: 0.0.40
codegen_flags: <defaults>
</compile_context>

<pallas_src>
import functools

import jax
import jax.numpy as jnp
from jax.experimental import pallas as pl
from jax.experimental.pallas import tpu as pltpu

# ---------------- small synthetic BERT config (stand-in for bert-base-uncased) ----
# Lane-dense toy sizes (all feature dims multiples of 128) per the perf review.
VOCAB = 30
HIDDEN = 256
NUM_HEADS = 2
HEAD_DIM = HIDDEN // NUM_HEADS          # 128: per-head blocks are lane-aligned.
NUM_LAYERS = 2
INTERMEDIATE = 4 * HIDDEN               # 1024
MAX_POS = 32
TYPE_VOCAB = 2
LN_EPS = 1e-12

WEIGHT_DTYPE = jnp.bfloat16   # halves weight/embedding HBM traffic, doubles MXU rate
ACT_DTYPE = jnp.bfloat16      # inter-kernel activation slabs
# Accumulation / LayerNorm statistics / softmax / epilogues stay in f32 inside the kernels.

# TODO(synk): real bert-base has HEAD_DIM=64; the per-head BlockSpec column selection used
# here needs HEAD_DIM % 128 == 0 — for 64-wide heads, select 128-wide (2-head) blocks and
# split once in-register, or reorder the QKV weight columns head-major.


# ---------------------------- generation-aware tile caps ---------------------------
def _detect_vmem_bytes():
    try:
        info = pltpu.get_tpu_info()
        for attr in ("vmem_capacity_bytes", "vmem_bytes"):
            v = getattr(info, attr, None)
            if v:
                return int(v)
    except Exception:
        pass
    return 64 << 20  # conservative default (v7x-sized)


_VMEM_BYTES = _detect_vmem_bytes()
_BIG_VMEM = _VMEM_BYTES >= (100 << 20)           # v5e / v6e (128 MiB per core)
_TM_CAP = 1024 if _BIG_VMEM else 512             # rows (second-to-last dim)
_TN_CAP = 1024 if _BIG_VMEM else 512             # cols (lane dim)
_TK_CAP = 1024                                   # contraction dim: K=768 single block
_VMEM_LIMIT = max(32 << 20, min((_VMEM_BYTES * 3) // 4, 96 << 20))


def _compiler_params(dimension_semantics):
    return pltpu.CompilerParams(dimension_semantics=dimension_semantics,
                                vmem_limit_bytes=_VMEM_LIMIT)


def _pick_tile(dim, cap, aligns):
    """Largest divisor of `dim` <= cap that is a multiple of the best alignment in `aligns`.

    Falls back to the full dim (single block) when no aligned divisor exists.
    """
    if dim <= cap:
        return dim
    for align in aligns:
        t = (cap // align) * align
        while t >= align:
            if dim % t == 0:
                return t
            t -= align
    return dim


def _pick_row_tile(m, cap=None):
    """Row tile: bf16-sublane aligned (16), and >=2 row blocks when M allows (megacore)."""
    cap = _TM_CAP if cap is None else cap
    if m >= 32:
        cap = min(cap, max(16, (m // 2 // 16) * 16))
    return _pick_tile(m, cap, (16, 8))


def _gelu(y):
    # tanh-approx GELU (robust Mosaic lowering).
    # TODO(synk): HF bert-base-uncased uses erf-GELU; switch to lax.erf if exact parity matters.
    return 0.5 * y * (1.0 + jnp.tanh(0.7978845608028654 * (y + 0.044715 * y * y * y)))


# ---------------------------- tiled linear (+ bias + activation) -------------------
def _linear_kernel(x_ref, w_ref, b_ref, o_ref, acc_ref, *, act):
    k = pl.program_id(2)

    @pl.when(k == 0)
    def _():
        acc_ref[...] = jnp.zeros_like(acc_ref)

    acc_ref[...] += jnp.dot(x_ref[...], w_ref[...], preferred_element_type=jnp.float32)

    @pl.when(k == pl.num_programs(2) - 1)
    def _():
        y = acc_ref[...] + b_ref[...]
        if act == "gelu":
            y = _gelu(y)
        elif act == "tanh":
            y = jnp.tanh(y)
        o_ref[...] = y.astype(o_ref.dtype)


def pallas_linear(x, w, b, act="none", out_dtype=ACT_DTYPE):
    """out = act(x @ w + b); (M, N, K)-tiled, f32 accumulator, bf16 MXU operands."""
    x = x.astype(WEIGHT_DTYPE)
    M, K = x.shape
    N = w.shape[1]
    tm = _pick_row_tile(M)
    tn = _pick_tile(N, _TN_CAP, (256, 128))   # 256-multiples feed the 2x256 MXU fully
    tk = _pick_tile(K, _TK_CAP, (256, 128))
    grid = (M // tm, N // tn, K // tk)
    return pl.pallas_call(
        functools.partial(_linear_kernel, act=act),
        out_shape=jax.ShapeDtypeStruct((M, N), out_dtype),
        grid_spec=pltpu.PrefetchScalarGridSpec(
            num_scalar_prefetch=0,
            grid=grid,
            in_specs=[
                pl.BlockSpec((tm, tk), lambda i, j, k: (i, k)),
                pl.BlockSpec((tk, tn), lambda i, j, k: (k, j)),
                pl.BlockSpec((1, tn), lambda i, j, k: (0, j)),
            ],
            out_specs=pl.BlockSpec((tm, tn), lambda i, j, k: (i, j)),
            scratch_shapes=[pltpu.VMEM((tm, tn), jnp.float32)],
        ),
        compiler_params=_compiler_params(("parallel", "parallel", "arbitrary")),
    )(x, w, b.reshape(1, N).astype(jnp.float32))


# ---------------- fused linear + bias + residual-add + LayerNorm -------------------
def _linear_res_ln_kernel(x_ref, w_ref, b_ref, res_ref, g_ref, bln_ref,
                          o_ref, acc_ref, *, eps):
    k = pl.program_id(1)

    @pl.when(k == 0)
    def _():
        acc_ref[...] = jnp.zeros_like(acc_ref)

    acc_ref[...] += jnp.dot(x_ref[...], w_ref[...], preferred_element_type=jnp.float32)

    @pl.when(k == pl.num_programs(1) - 1)
    def _():
        y = acc_ref[...] + b_ref[...] + res_ref[...].astype(jnp.float32)
        mu = jnp.mean(y, axis=-1, keepdims=True)
        var = jnp.mean(jnp.square(y - mu), axis=-1, keepdims=True)
        y = (y - mu) * jax.lax.rsqrt(var + eps)
        o_ref[...] = (y * g_ref[...] + bln_ref[...]).astype(o_ref.dtype)


def pallas_linear_residual_ln(x, w, b, res, gamma, beta, eps=LN_EPS, out_dtype=ACT_DTYPE):
    """out = LayerNorm(x @ w + b + res) * gamma + beta.

    N (= hidden) is kept un-tiled so the LN row reduction stays inside one block;
    rows (M) and the contraction (K) are tiled and pipelined (K is a single block
    for K=hidden; it only tiles for the 4H->H FFN-down contraction at real sizes).
    """
    x = x.astype(WEIGHT_DTYPE)
    M, K = x.shape
    N = w.shape[1]
    tm = _pick_row_tile(M, 256)
    tk = _pick_tile(K, _TK_CAP, (256, 128))
    grid = (M // tm, K // tk)
    return pl.pallas_call(
        functools.partial(_linear_res_ln_kernel, eps=eps),
        out_shape=jax.ShapeDtypeStruct((M, N), out_dtype),
        grid_spec=pltpu.PrefetchScalarGridSpec(
            num_scalar_prefetch=0,
            grid=grid,
            in_specs=[
                pl.BlockSpec((tm, tk), lambda i, k: (i, k)),
                pl.BlockSpec((tk, N), lambda i, k: (k, 0)),
                pl.BlockSpec((1, N), lambda i, k: (0, 0)),
                pl.BlockSpec((tm, N), lambda i, k: (i, 0)),
                pl.BlockSpec((1, N), lambda i, k: (0, 0)),
                pl.BlockSpec((1, N), lambda i, k: (0, 0)),
            ],
            out_specs=pl.BlockSpec((tm, N), lambda i, k: (i, 0)),
            scratch_shapes=[pltpu.VMEM((tm, N), jnp.float32)],
        ),
        compiler_params=_compiler_params(("parallel", "arbitrary")),
    )(x, w, b.reshape(1, N).astype(jnp.float32), res,
      gamma.reshape(1, N).astype(jnp.float32), beta.reshape(1, N).astype(jnp.float32))


# ---------------- fused embedding-sum + LayerNorm (no intermediate slab) -----------
def _emb_ln_kernel(word_ref, pos_ref, type_ref, g_ref, b_ref, o_ref, *, eps):
    x = (word_ref[0].astype(jnp.float32)
         + pos_ref[...].astype(jnp.float32)
         + type_ref[0].astype(jnp.float32))
    mu = jnp.mean(x, axis=-1, keepdims=True)
    var = jnp.mean(jnp.square(x - mu), axis=-1, keepdims=True)
    y = (x - mu) * jax.lax.rsqrt(var + eps)
    o_ref[0] = (y * g_ref[...] + b_ref[...]).astype(o_ref.dtype)


def pallas_embed_ln(word_g, pos_e, type_g, gamma, beta, eps=LN_EPS, out_dtype=ACT_DTYPE):
    """LayerNorm(word_emb + pos_emb + type_emb); the add is fused into the kernel."""
    B, S, H = word_g.shape
    ts = _pick_tile(S, 512, (16, 8))
    grid = (B, S // ts)
    return pl.pallas_call(
        functools.partial(_emb_ln_kernel, eps=eps),
        out_shape=jax.ShapeDtypeStruct((B, S, H), out_dtype),
        grid_spec=pltpu.PrefetchScalarGridSpec(
            num_scalar_prefetch=0,
            grid=grid,
            in_specs=[
                pl.BlockSpec((1, ts, H), lambda b, i: (b, i, 0)),
                pl.BlockSpec((ts, H), lambda b, i: (i, 0)),
                pl.BlockSpec((1, ts, H), lambda b, i: (b, i, 0)),
                pl.BlockSpec((1, H), lambda b, i: (0, 0)),
                pl.BlockSpec((1, H), lambda b, i: (0, 0)),
            ],
            out_specs=pl.BlockSpec((1, ts, H), lambda b, i: (b, i, 0)),
        ),
        compiler_params=_compiler_params(("parallel", "parallel")),
    )(word_g, pos_e, type_g,
      gamma.reshape(1, H).astype(jnp.float32), beta.reshape(1, H).astype(jnp.float32))


# ------------- flash-style attention, grid (batch, head, q_block, kv_block) --------
def _flash_attn_kernel(q_ref, k_ref, v_ref, bias_ref, o_ref,
                       m_sc, l_sc, acc_sc, *, scale):
    ki = pl.program_id(3)

    @pl.when(ki == 0)
    def _():
        m_sc[...] = jnp.full_like(m_sc, -jnp.inf)
        l_sc[...] = jnp.zeros_like(l_sc)
        acc_sc[...] = jnp.zeros_like(acc_sc)

    q = q_ref[0]                 # (tq, head_dim)  bf16, selected by BlockSpec (no slicing)
    k = k_ref[0]                 # (tkv, head_dim) bf16
    v = v_ref[0]                 # (tkv, head_dim) bf16
    # contract over head_dim without materializing k.T (keeps the XLU slot free)
    s = jax.lax.dot_general(q, k, (((1,), (1,)), ((), ())),
                            preferred_element_type=jnp.float32) * scale
    s = s + bias_ref[0]          # (1, tkv) additive mask, broadcasts over query rows

    m_prev = m_sc[...]
    m_new = jnp.maximum(m_prev, jnp.max(s, axis=-1, keepdims=True))
    alpha = jnp.exp(m_prev - m_new)
    p = jnp.exp(s - m_new)
    l_sc[...] = alpha * l_sc[...] + jnp.sum(p, axis=-1, keepdims=True)
    acc_sc[...] = alpha * acc_sc[...] + jnp.dot(p.astype(v.dtype), v,
                                                preferred_element_type=jnp.float32)
    m_sc[...] = m_new

    @pl.when(ki == pl.num_programs(3) - 1)
    def _():
        # per-head context written straight into its 128-aligned output column block
        o_ref[0] = (acc_sc[...] * pl.reciprocal(l_sc[...], approx=True)).astype(o_ref.dtype)


def pallas_attention(qkv, bias, scale, num_heads, head_dim):
    """qkv: (B, S, 3H) packed [Q|K|V]; bias: (B, 1, S) additive mask -> (B, S, H).

    The per-head Q/K/V column blocks are selected by the BlockSpec index_maps
    (head_dim is a multiple of 128, so blocks are lane-aligned DMAs).
    """
    B, S, threeH = qkv.shape
    H = num_heads * head_dim
    tq = _pick_tile(S, 256, (16, 8))
    tkv = _pick_tile(S, 512, (128,))     # bias block last dim must be 128-multiple or full
    grid = (B, num_heads, S // tq, S // tkv)
    return pl.pallas_call(
        functools.partial(_flash_attn_kernel, scale=scale),
        out_shape=jax.ShapeDtypeStruct((B, S, H), ACT_DTYPE),
        grid_spec=pltpu.PrefetchScalarGridSpec(
            num_scalar_prefetch=0,
            grid=grid,
            in_specs=[
                # Q of head h: column block h
                pl.BlockSpec((1, tq, head_dim),
                             lambda b, h, qi, ki: (b, qi, h)),
                # K of head h: column block num_heads + h
                pl.BlockSpec((1, tkv, head_dim),
                             lambda b, h, qi, ki: (b, ki, num_heads + h)),
                # V of head h: column block 2*num_heads + h
                pl.BlockSpec((1, tkv, head_dim),
                             lambda b, h, qi, ki: (b, ki, 2 * num_heads + h)),
                pl.BlockSpec((1, 1, tkv),
                             lambda b, h, qi, ki: (b, 0, ki)),
            ],
            out_specs=pl.BlockSpec((1, tq, head_dim),
                                   lambda b, h, qi, ki: (b, qi, h)),
            scratch_shapes=[
                pltpu.VMEM((tq, 1), jnp.float32),          # running max m
                pltpu.VMEM((tq, 1), jnp.float32),          # running denom l
                pltpu.VMEM((tq, head_dim), jnp.float32),   # running context acc
            ],
        ),
        compiler_params=_compiler_params(
            ("parallel", "parallel", "parallel", "arbitrary")),
    )(qkv, qkv, qkv, bias)


# ---------------------------- fused pooler + dropout + output head -----------------
def _pooler_head_kernel(cls_ref, wp_ref, bp_ref, wo_ref, bo_ref, o_ref):
    pooled = jnp.tanh(
        jnp.dot(cls_ref[...], wp_ref[...], preferred_element_type=jnp.float32)
        + bp_ref[...])
    # self.bert_drop = nn.Dropout(0.3): identity at inference time.
    # TODO(synk): training-mode dropout would use pltpu.prng_seed / prng_random_bits.
    o_ref[...] = (jnp.dot(pooled.astype(wo_ref.dtype), wo_ref[...],
                          preferred_element_type=jnp.float32) + bo_ref[...])


def pallas_pooler_head(cls, wp, bp, wo, bo):
    B, H = cls.shape
    return pl.pallas_call(
        _pooler_head_kernel,
        out_shape=jax.ShapeDtypeStruct((B, 1), jnp.float32),
        in_specs=[
            pl.BlockSpec((B, H), lambda: (0, 0)),
            pl.BlockSpec((H, H), lambda: (0, 0)),
            pl.BlockSpec((1, H), lambda: (0, 0)),
            pl.BlockSpec((H, 1), lambda: (0, 0)),
            pl.BlockSpec((1, 1), lambda: (0, 0)),
        ],
        out_specs=pl.BlockSpec((B, 1), lambda: (0, 0)),
        compiler_params=pltpu.CompilerParams(vmem_limit_bytes=_VMEM_LIMIT),
    )(cls.astype(WEIGHT_DTYPE), wp, bp.reshape(1, H).astype(jnp.float32),
      wo, bo.reshape(1, 1).astype(jnp.float32))


# ---------------------------- parameters (deterministic, synthetic) ----------------
def init_params(key):
    def nrm(k, shape):
        return 0.02 * jax.random.normal(k, shape, jnp.float32)

    keys = iter(jax.random.split(key, 8 + NUM_LAYERS * 16))
    p = {
        "word_emb": nrm(next(keys), (VOCAB, HIDDEN)).astype(WEIGHT_DTYPE),
        "pos_emb": nrm(next(keys), (MAX_POS, HIDDEN)).astype(WEIGHT_DTYPE),
        "type_emb": nrm(next(keys), (TYPE_VOCAB, HIDDEN)).astype(WEIGHT_DTYPE),
        "emb_ln_g": jnp.ones((HIDDEN,), jnp.float32),
        "emb_ln_b": jnp.zeros((HIDDEN,), jnp.float32),
        "layers": [],
        "pooler_w": nrm(next(keys), (HIDDEN, HIDDEN)).astype(WEIGHT_DTYPE),
        "pooler_b": jnp.zeros((HIDDEN,), jnp.float32),
        "out_w": nrm(next(keys), (HIDDEN, 1)).astype(WEIGHT_DTYPE),
        "out_b": jnp.zeros((1,), jnp.float32),
    }
    for _ in range(NUM_LAYERS):
        wq = nrm(next(keys), (HIDDEN, HIDDEN))
        wk = nrm(next(keys), (HIDDEN, HIDDEN))
        wv = nrm(next(keys), (HIDDEN, HIDDEN))
        lp = {
            # fused QKV: one (H, 3H) matmul instead of three (H, H) matmuls
            "w_qkv": jnp.concatenate([wq, wk, wv], axis=1).astype(WEIGHT_DTYPE),
            "b_qkv": jnp.zeros((3 * HIDDEN,), jnp.float32),
            "wo": nrm(next(keys), (HIDDEN, HIDDEN)).astype(WEIGHT_DTYPE),
            "bo": jnp.zeros((HIDDEN,), jnp.float32),
            "ln1_g": jnp.ones((HIDDEN,), jnp.float32),
            "ln1_b": jnp.zeros((HIDDEN,), jnp.float32),
            "wi": nrm(next(keys), (HIDDEN, INTERMEDIATE)).astype(WEIGHT_DTYPE),
            "bi": jnp.zeros((INTERMEDIATE,), jnp.float32),
            "wo2": nrm(next(keys), (INTERMEDIATE, HIDDEN)).astype(WEIGHT_DTYPE),
            "bo2": jnp.zeros((HIDDEN,), jnp.float32),
            "ln2_g": jnp.ones((HIDDEN,), jnp.float32),
            "ln2_b": jnp.zeros((HIDDEN,), jnp.float32),
        }
        p["layers"].append(lp)
    return p


# ---------------------------- forward pass -----------------------------------------
def bert_base_uncased_forward(params, ids, mask, token_type_ids):
    B, S = ids.shape
    H = HIDDEN

    # Embedding gathers are XLA glue; the 3-way add + LayerNorm is one fused Pallas kernel.
    word_g = params["word_emb"][ids]                    # (B,S,H) bf16
    type_g = params["type_emb"][token_type_ids]         # (B,S,H) bf16
    pos_e = params["pos_emb"][:S]                       # (S,H)   bf16
    h = pallas_embed_ln(word_g, pos_e, type_g,
                        params["emb_ln_g"], params["emb_ln_b"]).reshape(B * S, H)

    # HF-style additive attention mask: 0 where attended, -10000 where masked.
    bias = ((1.0 - mask.astype(jnp.float32)) * -10000.0)[:, None, :]   # (B,1,S)
    scale = 1.0 / float(HEAD_DIM ** 0.5)

    for lp in params["layers"]:
        # fused QKV projection -> (B*S, 3H), reshaped (free) to (B, S, 3H)
        qkv = pallas_linear(h, lp["w_qkv"], lp["b_qkv"])
        # flash-style attention; per-head blocks selected via BlockSpec, per-head output
        # written directly into its column block of the (B,S,H) context slab.
        ctx = pallas_attention(qkv.reshape(B, S, 3 * H), bias, scale,
                               NUM_HEADS, HEAD_DIM).reshape(B * S, H)
        # attention output projection + residual + LayerNorm fused
        h = pallas_linear_residual_ln(ctx, lp["wo"], lp["bo"], h,
                                      lp["ln1_g"], lp["ln1_b"])
        # FFN up-projection + GELU
        ff = pallas_linear(h, lp["wi"], lp["bi"], act="gelu")
        # FFN down-projection + residual + LayerNorm fused
        h = pallas_linear_residual_ln(ff, lp["wo2"], lp["bo2"], h,
                                      lp["ln2_g"], lp["ln2_b"])

    # BERT pooler tanh(W h[:,0] + b) (-> o2), dropout (identity), Linear(H,1) — fused.
    cls = h.reshape(B, S, H)[:, 0, :]                                  # (B,H)
    output = pallas_pooler_head(cls, params["pooler_w"], params["pooler_b"],
                                params["out_w"], params["out_b"])      # (B,1) f32
    return output


# ---------------------------- driver ------------------------------------------------
if __name__ == "__main__":
    key = jax.random.PRNGKey(0)
    pkey, ikey = jax.random.split(key, 2)
    params = init_params(pkey)

    B, S = 2, 16
    ids = jax.random.randint(ikey, (B, S), 0, VOCAB, dtype=jnp.int32)
    mask = jnp.ones((B, S), dtype=jnp.int32).at[1, 12:].set(0)  # pad last 4 tokens of row 1
    token_type_ids = jnp.zeros((B, S), dtype=jnp.int32)

    out = jax.jit(bert_base_uncased_forward)(params, ids, mask, token_type_ids)
    out = jax.block_until_ready(out)
    assert out.shape == (B, 1) and out.dtype == jnp.float32
    print("KERNEL_OK")
</pallas_src>

<mosaic_0001>
module attributes {stable_mosaic.version = 11 : i64} {
  func.func @_linear_res_ln_kernel(%arg0: i32, %arg1: i32, %arg2: memref<16x256xbf16, #tpu.memory_space<vmem>>, %arg3: memref<256x256xbf16, #tpu.memory_space<vmem>>, %arg4: memref<1x256xf32, #tpu.memory_space<vmem>>, %arg5: memref<16x256xbf16, #tpu.memory_space<vmem>>, %arg6: memref<1x256xf32, #tpu.memory_space<vmem>>, %arg7: memref<1x256xf32, #tpu.memory_space<vmem>>, %arg8: memref<16x256xbf16, #tpu.memory_space<vmem>>, %arg9: memref<16x256xf32, #tpu.memory_space<vmem>>) attributes {dimension_semantics = [#tpu.dimension_semantics<parallel>, #tpu.dimension_semantics<arbitrary>], iteration_bounds = array<i64: 2, 1>, scalar_prefetch = 0 : i64, scratch_operands = 1 : i64, tpu.core_type = #tpu.core_type<tc>, window_params = [{transform_indices = @transform_0, window_bounds = array<i64: 16, 256>}, {transform_indices = @transform_1, window_bounds = array<i64: 256, 256>}, {pipeline_mode = #tpu.pipeline_mode<synchronous>, transform_indices = @transform_2, window_bounds = array<i64: 1, 256>}, {transform_indices = @transform_3, window_bounds = array<i64: 16, 256>}, {pipeline_mode = #tpu.pipeline_mode<synchronous>, transform_indices = @transform_4, window_bounds = array<i64: 1, 256>}, {pipeline_mode = #tpu.pipeline_mode<synchronous>, transform_indices = @transform_5, window_bounds = array<i64: 1, 256>}, {transform_indices = @transform_6, window_bounds = array<i64: 16, 256>}]} {
    %c0_i32 = arith.constant 0 : i32
    %0 = arith.cmpi eq, %arg1, %c0_i32 : i32
    %1 = arith.extui %0 : i1 to i32
    %c0_i32_0 = arith.constant 0 : i32
    %2 = arith.cmpi ne, %1, %c0_i32_0 : i32
    scf.if %2 {
      %cst_10 = arith.constant 0.000000e+00 : f32
      %12 = vector.broadcast %cst_10 : f32 to vector<16x256xf32>
      %c0_11 = arith.constant 0 : index
      %c0_12 = arith.constant 0 : index
      %13 = vector.load %arg9[%c0_11, %c0_12] : memref<16x256xf32, #tpu.memory_space<vmem>>, vector<16x256xf32>
      tpu.vector_store %arg9[%c0_11, %c0_12], %12 {strides = array<i32>} : memref<16x256xf32, #tpu.memory_space<vmem>>, vector<16x256xf32>,
    } else {
    }
    %c0 = arith.constant 0 : index
    %c0_1 = arith.constant 0 : index
    %3 = vector.load %arg9[%c0, %c0_1] : memref<16x256xf32, #tpu.memory_space<vmem>>, vector<16x256xf32>
    %c0_2 = arith.constant 0 : index
    %c0_3 = arith.constant 0 : index
    %4 = vector.load %arg2[%c0_2, %c0_3] : memref<16x256xbf16, #tpu.memory_space<vmem>>, vector<16x256xbf16>
    %c0_4 = arith.constant 0 : index
    %c0_5 = arith.constant 0 : index
    %5 = vector.load %arg3[%c0_4, %c0_5] : memref<256x256xbf16, #tpu.memory_space<vmem>>, vector<256x256xbf16>
    %cst = arith.constant dense<0.000000e+00> : vector<16x256xf32>
    %6 = tpu.matmul %4, %5, %cst {dimension_numbers = #tpu.dot_dimension_numbers<[1], [0], [0], [1], [0, 0, 1, 1], [], []>} : vector<16x256xbf16>, vector<256x256xbf16>, vector<16x256xf32> -> vector<16x256xf32>
    %7 = arith.addf %3, %6 : vector<16x256xf32>
    %c0_6 = arith.constant 0 : index
    %c0_7 = arith.constant 0 : index
    %8 = vector.load %arg9[%c0_6, %c0_7] : memref<16x256xf32, #tpu.memory_space<vmem>>, vector<16x256xf32>
    tpu.vector_store %arg9[%c0_6, %c0_7], %7 {strides = array<i32>} : memref<16x256xf32, #tpu.memory_space<vmem>>, vector<16x256xf32>,
    %c0_i32_8 = arith.constant 0 : i32
    %9 = arith.cmpi eq, %arg1, %c0_i32_8 : i32
    %10 = arith.extui %9 : i1 to i32
    %c0_i32_9 = arith.constant 0 : i32
    %11 = arith.cmpi ne, %10, %c0_i32_9 : i32
    scf.if %11 {
      %c0_10 = arith.constant 0 : index
      %c0_11 = arith.constant 0 : index
      %12 = vector.load %arg9[%c0_10, %c0_11] : memref<16x256xf32, #tpu.memory_space<vmem>>, vector<16x256xf32>
      %c0_12 = arith.constant 0 : index
      %c0_13 = arith.constant 0 : index
      %13 = vector.load %arg4[%c0_12, %c0_13] : memref<1x256xf32, #tpu.memory_space<vmem>>, vector<1x256xf32>
      %14 = vector.broadcast %13 : vector<1x256xf32> to vector<16x256xf32>
      %15 = arith.addf %12, %14 : vector<16x256xf32>
      %c0_14 = arith.constant 0 : index
      %c0_15 = arith.constant 0 : index
      %16 = vector.load %arg5[%c0_14, %c0_15] : memref<16x256xbf16, #tpu.memory_space<vmem>>, vector<16x256xbf16>
      %17 = arith.extf %16 : vector<16x256xbf16> to vector<16x256xf32>
      %18 = arith.addf %15, %17 : vector<16x256xf32>
      %cst_16 = arith.constant dense<0.000000e+00> : vector<16xf32>
      %19 = vector.multi_reduction <add>, %18, %cst_16 [1] : vector<16x256xf32> to vector<16xf32>
      %20 = vector.shape_cast %19 : vector<16xf32> to vector<16x1xf32>
      %cst_17 = arith.constant 2.560000e+02 : f32
      %21 = vector.broadcast %cst_17 : f32 to vector<16x1xf32>
      %22 = arith.divf %20, %21 : vector<16x1xf32>
      %23 = vector.broadcast %22 : vector<16x1xf32> to vector<16x256xf32>
      %24 = arith.subf %18, %23 : vector<16x256xf32>
      %25 = arith.mulf %24, %24 : vector<16x256xf32>
      %cst_18 = arith.constant dense<0.000000e+00> : vector<16xf32>
      %26 = vector.multi_reduction <add>, %25, %cst_18 [1] : vector<16x256xf32> to vector<16xf32>
      %27 = vector.shape_cast %26 : vector<16xf32> to vector<16x1xf32>
      %cst_19 = arith.constant 2.560000e+02 : f32
      %28 = vector.broadcast %cst_19 : f32 to vector<16x1xf32>
      %29 = arith.divf %27, %28 : vector<16x1xf32>
      %30 = vector.broadcast %22 : vector<16x1xf32> to vector<16x256xf32>
      %31 = arith.subf %18, %30 : vector<16x256xf32>
      %cst_20 = arith.constant 9.99999996E-13 : f32
      %32 = vector.broadcast %cst_20 : f32 to vector<16x1xf32>
      %33 = arith.addf %29, %32 : vector<16x1xf32>
      %34 = math.rsqrt %33 : vector<16x1xf32>
      %35 = vector.broadcast %34 : vector<16x1xf32> to vector<16x256xf32>
      %36 = arith.mulf %31, %35 : vector<16x256xf32>
      %c0_21 = arith.constant 0 : index
      %c0_22 = arith.constant 0 : index
      %37 = vector.load %arg6[%c0_21, %c0_22] : memref<1x256xf32, #tpu.memory_space<vmem>>, vector<1x256xf32>
      %38 = vector.broadcast %37 : vector<1x256xf32> to vector<16x256xf32>
      %39 = arith.mulf %36, %38 : vector<16x256xf32>
      %c0_23 = arith.constant 0 : index
      %c0_24 = arith.constant 0 : index
      %40 = vector.load %arg7[%c0_23, %c0_24] : memref<1x256xf32, #tpu.memory_space<vmem>>, vector<1x256xf32>
      %41 = vector.broadcast %40 : vector<1x256xf32> to vector<16x256xf32>
      %42 = arith.addf %39, %41 : vector<16x256xf32>
      %43 = arith.truncf %42 : vector<16x256xf32> to vector<16x256xbf16>
      %c0_25 = arith.constant 0 : index
      %c0_26 = arith.constant 0 : index
      %44 = vector.load %arg8[%c0_25, %c0_26] : memref<16x256xbf16, #tpu.memory_space<vmem>>, vector<16x256xbf16>
      tpu.vector_store %arg8[%c0_25, %c0_26], %43 {strides = array<i32>} : memref<16x256xbf16, #tpu.memory_space<vmem>>, vector<16x256xbf16>,
    } else {
    }
    return
  }
  func.func @transform_0(%arg0: i32, %arg1: i32) -> (i32, i32) {
    %c0_i32 = arith.constant 0 : i32
    return %arg0, %arg1 : i32, i32
  }
  func.func @transform_1(%arg0: i32, %arg1: i32) -> (i32, i32) {
    %c0_i32 = arith.constant 0 : i32
    %c0_i32_0 = arith.constant 0 : i32
    return %arg1, %c0_i32 : i32, i32
  }
  func.func @transform_2(%arg0: i32, %arg1: i32) -> (i32, i32) {
    %c0_i32 = arith.constant 0 : i32
    %c0_i32_0 = arith.constant 0 : i32
    %c0_i32_1 = arith.constant 0 : i32
    return %c0_i32, %c0_i32_0 : i32, i32
  }
  func.func @transform_3(%arg0: i32, %arg1: i32) -> (i32, i32) {
    %c0_i32 = arith.constant 0 : i32
    %c0_i32_0 = arith.constant 0 : i32
    return %arg0, %c0_i32 : i32, i32
  }
  func.func @transform_4(%arg0: i32, %arg1: i32) -> (i32, i32) {
    %c0_i32 = arith.constant 0 : i32
    %c0_i32_0 = arith.constant 0 : i32
    %c0_i32_1 = arith.constant 0 : i32
    return %c0_i32, %c0_i32_0 : i32, i32
  }
  func.func @transform_5(%arg0: i32, %arg1: i32) -> (i32, i32) {
    %c0_i32 = arith.constant 0 : i32
    %c0_i32_0 = arith.constant 0 : i32
    %c0_i32_1 = arith.constant 0 : i32
    return %c0_i32, %c0_i32_0 : i32, i32
  }
  func.func @transform_6(%arg0: i32, %arg1: i32) -> (i32, i32) {
    %c0_i32 = arith.constant 0 : i32
    %c0_i32_0 = arith.constant 0 : i32
    return %arg0, %c0_i32 : i32, i32
  }
}

module attributes {stable_mosaic.version = 11 : i64} {
  func.func @_emb_ln_kernel(%arg0: i32, %arg1: i32, %arg2: memref<1x16x256xbf16, #tpu.memory_space<vmem>>, %arg3: memref<16x256xbf16, #tpu.memory_space<vmem>>, %arg4: memref<1x16x256xbf16, #tpu.memory_space<vmem>>, %arg5: memref<1x256xf32, #tpu.memory_space<vmem>>, %arg6: memref<1x256xf32, #tpu.memory_space<vmem>>, %arg7: memref<1x16x256xbf16, #tpu.memory_space<vmem>>) attributes {dimension_semantics = [#tpu.dimension_semantics<parallel>, #tpu.dimension_semantics<parallel>], iteration_bounds = array<i64: 2, 1>, scalar_prefetch = 0 : i64, scratch_operands = 0 : i64, tpu.core_type = #tpu.core_type<tc>, window_params = [{transform_indices = @transform_0, window_bounds = array<i64: 1, 16, 256>}, {transform_indices = @transform_1, window_bounds = array<i64: 16, 256>}, {transform_indices = @transform_2, window_bounds = array<i64: 1, 16, 256>}, {pipeline_mode = #tpu.pipeline_mode<synchronous>, transform_indices = @transform_3, window_bounds = array<i64: 1, 256>}, {pipeline_mode = #tpu.pipeline_mode<synchronous>, transform_indices = @transform_4, window_bounds = array<i64: 1, 256>}, {transform_indices = @transform_5, window_bounds = array<i64: 1, 16, 256>}]} {
    %c0 = arith.constant 0 : index
    %c0_0 = arith.constant 0 : index
    %c0_1 = arith.constant 0 : index
    %0 = vector.load %arg2[%c0, %c0_0, %c0_1] : memref<1x16x256xbf16, #tpu.memory_space<vmem>>, vector<1x16x256xbf16>
    %1 = vector.shape_cast %0 : vector<1x16x256xbf16> to vector<16x256xbf16>
    %2 = arith.extf %1 : vector<16x256xbf16> to vector<16x256xf32>
    %c0_2 = arith.constant 0 : index
    %c0_3 = arith.constant 0 : index
    %3 = vector.load %arg3[%c0_2, %c0_3] : memref<16x256xbf16, #tpu.memory_space<vmem>>, vector<16x256xbf16>
    %4 = arith.extf %3 : vector<16x256xbf16> to vector<16x256xf32>
    %5 = arith.addf %2, %4 : vector<16x256xf32>
    %c0_4 = arith.constant 0 : index
    %c0_5 = arith.constant 0 : index
    %c0_6 = arith.constant 0 : index
    %6 = vector.load %arg4[%c0_4, %c0_5, %c0_6] : memref<1x16x256xbf16, #tpu.memory_space<vmem>>, vector<1x16x256xbf16>
    %7 = vector.shape_cast %6 : vector<1x16x256xbf16> to vector<16x256xbf16>
    %8 = arith.extf %7 : vector<16x256xbf16> to vector<16x256xf32>
    %9 = arith.addf %5, %8 : vector<16x256xf32>
    %cst = arith.constant dense<0.000000e+00> : vector<16xf32>
    %10 = vector.multi_reduction <add>, %9, %cst [1] : vector<16x256xf32> to vector<16xf32>
    %11 = vector.shape_cast %10 : vector<16xf32> to vector<16x1xf32>
    %cst_7 = arith.constant 2.560000e+02 : f32
    %12 = vector.broadcast %cst_7 : f32 to vector<16x1xf32>
    %13 = arith.divf %11, %12 : vector<16x1xf32>
    %14 = vector.broadcast %13 : vector<16x1xf32> to vector<16x256xf32>
    %15 = arith.subf %9, %14 : vector<16x256xf32>
    %16 = arith.mulf %15, %15 : vector<16x256xf32>
    %cst_8 = arith.constant dense<0.000000e+00> : vector<16xf32>
    %17 = vector.multi_reduction <add>, %16, %cst_8 [1] : vector<16x256xf32> to vector<16xf32>
    %18 = vector.shape_cast %17 : vector<16xf32> to vector<16x1xf32>
    %cst_9 = arith.constant 2.560000e+02 : f32
    %19 = vector.broadcast %cst_9 : f32 to vector<16x1xf32>
    %20 = arith.divf %18, %19 : vector<16x1xf32>
    %21 = vector.broadcast %13 : vector<16x1xf32> to vector<16x256xf32>
    %22 = arith.subf %9, %21 : vector<16x256xf32>
    %cst_10 = arith.constant 9.99999996E-13 : f32
    %23 = vector.broadcast %cst_10 : f32 to vector<16x1xf32>
    %24 = arith.addf %20, %23 : vector<16x1xf32>
    %25 = math.rsqrt %24 : vector<16x1xf32>
    %26 = vector.broadcast %25 : vector<16x1xf32> to vector<16x256xf32>
    %27 = arith.mulf %22, %26 : vector<16x256xf32>
    %c0_11 = arith.constant 0 : index
    %c0_12 = arith.constant 0 : index
    %28 = vector.load %arg5[%c0_11, %c0_12] : memref<1x256xf32, #tpu.memory_space<vmem>>, vector<1x256xf32>
    %29 = vector.broadcast %28 : vector<1x256xf32> to vector<16x256xf32>
    %30 = arith.mulf %27, %29 : vector<16x256xf32>
    %c0_13 = arith.constant 0 : index
    %c0_14 = arith.constant 0 : index
    %31 = vector.load %arg6[%c0_13, %c0_14] : memref<1x256xf32, #tpu.memory_space<vmem>>, vector<1x256xf32>
    %32 = vector.broadcast %31 : vector<1x256xf32> to vector<16x256xf32>
    %33 = arith.addf %30, %32 : vector<16x256xf32>
    %34 = arith.truncf %33 : vector<16x256xf32> to vector<16x256xbf16>
    %c0_15 = arith.constant 0 : index
    %c0_16 = arith.constant 0 : index
    %c0_17 = arith.constant 0 : index
    %35 = vector.load %arg7[%c0_15, %c0_16, %c0_17] : memref<1x16x256xbf16, #tpu.memory_space<vmem>>, vector<1x16x256xbf16>
    %36 = vector.shape_cast %35 : vector<1x16x256xbf16> to vector<16x256xbf16>
    %37 = vector.shape_cast %34 : vector<16x256xbf16> to vector<1x16x256xbf16>
    tpu.vector_store %arg7[%c0_15, %c0_16, %c0_17], %37 {strides = array<i32>} : memref<1x16x256xbf16, #tpu.memory_space<vmem>>, vector<1x16x256xbf16>,
    return
  }
  func.func @transform_0(%arg0: i32, %arg1: i32) -> (i32, i32, i32) {
    %c0_i32 = arith.constant 0 : i32
    %c0_i32_0 = arith.constant 0 : i32
    return %arg0, %arg1, %c0_i32 : i32, i32, i32
  }
  func.func @transform_1(%arg0: i32, %arg1: i32) -> (i32, i32) {
    %c0_i32 = arith.constant 0 : i32
    %c0_i32_0 = arith.constant 0 : i32
    return %arg1, %c0_i32 : i32, i32
  }
  func.func @transform_2(%arg0: i32, %arg1: i32) -> (i32, i32, i32) {
    %c0_i32 = arith.constant 0 : i32
    %c0_i32_0 = arith.constant 0 : i32
    return %arg0, %arg1, %c0_i32 : i32, i32, i32
  }
  func.func @transform_3(%arg0: i32, %arg1: i32) -> (i32, i32) {
    %c0_i32 = arith.constant 0 : i32
    %c0_i32_0 = arith.constant 0 : i32
    %c0_i32_1 = arith.constant 0 : i32
    return %c0_i32, %c0_i32_0 : i32, i32
  }
  func.func @transform_4(%arg0: i32, %arg1: i32) -> (i32, i32) {
    %c0_i32 = arith.constant 0 : i32
    %c0_i32_0 = arith.constant 0 : i32
    %c0_i32_1 = arith.constant 0 : i32
    return %c0_i32, %c0_i32_0 : i32, i32
  }
  func.func @transform_5(%arg0: i32, %arg1: i32) -> (i32, i32, i32) {
    %c0_i32 = arith.constant 0 : i32
    %c0_i32_0 = arith.constant 0 : i32
    return %arg0, %arg1, %c0_i32 : i32, i32, i32
  }
}

module attributes {stable_mosaic.version = 11 : i64} {
  func.func @_linear_kernel(%arg0: i32, %arg1: i32, %arg2: i32, %arg3: memref<16x256xbf16, #tpu.memory_space<vmem>>, %arg4: memref<256x256xbf16, #tpu.memory_space<vmem>>, %arg5: memref<1x256xf32, #tpu.memory_space<vmem>>, %arg6: memref<16x256xbf16, #tpu.memory_space<vmem>>, %arg7: memref<16x256xf32, #tpu.memory_space<vmem>>) attributes {dimension_semantics = [#tpu.dimension_semantics<parallel>, #tpu.dimension_semantics<parallel>, #tpu.dimension_semantics<arbitrary>], iteration_bounds = array<i64: 2, 3, 1>, scalar_prefetch = 0 : i64, scratch_operands = 1 : i64, tpu.core_type = #tpu.core_type<tc>, window_params = [{transform_indices = @transform_0, window_bounds = array<i64: 16, 256>}, {transform_indices = @transform_1, window_bounds = array<i64: 256, 256>}, {transform_indices = @transform_2, window_bounds = array<i64: 1, 256>}, {transform_indices = @transform_3, window_bounds = array<i64: 16, 256>}]} {
    %c0_i32 = arith.constant 0 : i32
    %0 = arith.cmpi eq, %arg2, %c0_i32 : i32
    %1 = arith.extui %0 : i1 to i32
    %c0_i32_0 = arith.constant 0 : i32
    %2 = arith.cmpi ne, %1, %c0_i32_0 : i32
    scf.if %2 {
      %cst_10 = arith.constant 0.000000e+00 : f32
      %12 = vector.broadcast %cst_10 : f32 to vector<16x256xf32>
      %c0_11 = arith.constant 0 : index
      %c0_12 = arith.constant 0 : index
      %13 = vector.load %arg7[%c0_11, %c0_12] : memref<16x256xf32, #tpu.memory_space<vmem>>, vector<16x256xf32>
      tpu.vector_store %arg7[%c0_11, %c0_12], %12 {strides = array<i32>} : memref<16x256xf32, #tpu.memory_space<vmem>>, vector<16x256xf32>,
    } else {
    }
    %c0 = arith.constant 0 : index
    %c0_1 = arith.constant 0 : index
    %3 = vector.load %arg7[%c0, %c0_1] : memref<16x256xf32, #tpu.memory_space<vmem>>, vector<16x256xf32>
    %c0_2 = arith.constant 0 : index
    %c0_3 = arith.constant 0 : index
    %4 = vector.load %arg3[%c0_2, %c0_3] : memref<16x256xbf16, #tpu.memory_space<vmem>>, vector<16x256xbf16>
    %c0_4 = arith.constant 0 : index
    %c0_5 = arith.constant 0 : index
    %5 = vector.load %arg4[%c0_4, %c0_5] : memref<256x256xbf16, #tpu.memory_space<vmem>>, vector<256x256xbf16>
    %cst = arith.constant dense<0.000000e+00> : vector<16x256xf32>
    %6 = tpu.matmul %4, %5, %cst {dimension_numbers = #tpu.dot_dimension_numbers<[1], [0], [0], [1], [0, 0, 1, 1], [], []>} : vector<16x256xbf16>, vector<256x256xbf16>, vector<16x256xf32> -> vector<16x256xf32>
    %7 = arith.addf %3, %6 : vector<16x256xf32>
    %c0_6 = arith.constant 0 : index
    %c0_7 = arith.constant 0 : index
    %8 = vector.load %arg7[%c0_6, %c0_7] : memref<16x256xf32, #tpu.memory_space<vmem>>, vector<16x256xf32>
    tpu.vector_store %arg7[%c0_6, %c0_7], %7 {strides = array<i32>} : memref<16x256xf32, #tpu.memory_space<vmem>>, vector<16x256xf32>,
    %c0_i32_8 = arith.constant 0 : i32
    %9 = arith.cmpi eq, %arg2, %c0_i32_8 : i32
    %10 = arith.extui %9 : i1 to i32
    %c0_i32_9 = arith.constant 0 : i32
    %11 = arith.cmpi ne, %10, %c0_i32_9 : i32
    scf.if %11 {
      %c0_10 = arith.constant 0 : index
      %c0_11 = arith.constant 0 : index
      %12 = vector.load %arg7[%c0_10, %c0_11] : memref<16x256xf32, #tpu.memory_space<vmem>>, vector<16x256xf32>
      %c0_12 = arith.constant 0 : index
      %c0_13 = arith.constant 0 : index
      %13 = vector.load %arg5[%c0_12, %c0_13] : memref<1x256xf32, #tpu.memory_space<vmem>>, vector<1x256xf32>
      %14 = vector.broadcast %13 : vector<1x256xf32> to vector<16x256xf32>
      %15 = arith.addf %12, %14 : vector<16x256xf32>
      %16 = arith.truncf %15 : vector<16x256xf32> to vector<16x256xbf16>
      %c0_14 = arith.constant 0 : index
      %c0_15 = arith.constant 0 : index
      %17 = vector.load %arg6[%c0_14, %c0_15] : memref<16x256xbf16, #tpu.memory_space<vmem>>, vector<16x256xbf16>
      tpu.vector_store %arg6[%c0_14, %c0_15], %16 {strides = array<i32>} : memref<16x256xbf16, #tpu.memory_space<vmem>>, vector<16x256xbf16>,
    } else {
    }
    return
  }
  func.func @transform_0(%arg0: i32, %arg1: i32, %arg2: i32) -> (i32, i32) {
    %c0_i32 = arith.constant 0 : i32
    return %arg0, %arg2 : i32, i32
  }
  func.func @transform_1(%arg0: i32, %arg1: i32, %arg2: i32) -> (i32, i32) {
    %c0_i32 = arith.constant 0 : i32
    return %arg2, %arg1 : i32, i32
  }
  func.func @transform_2(%arg0: i32, %arg1: i32, %arg2: i32) -> (i32, i32) {
    %c0_i32 = arith.constant 0 : i32
    %c0_i32_0 = arith.constant 0 : i32
    return %c0_i32, %arg1 : i32, i32
  }
  func.func @transform_3(%arg0: i32, %arg1: i32, %arg2: i32) -> (i32, i32) {
    %c0_i32 = arith.constant 0 : i32
    return %arg0, %arg1 : i32, i32
  }
}

module attributes {stable_mosaic.version = 11 : i64} {
  func.func @_flash_attn_kernel(%arg0: i32, %arg1: i32, %arg2: i32, %arg3: i32, %arg4: memref<1x16x128xbf16, #tpu.memory_space<vmem>>, %arg5: memref<1x16x128xbf16, #tpu.memory_space<vmem>>, %arg6: memref<1x16x128xbf16, #tpu.memory_space<vmem>>, %arg7: memref<1x1x16xf32, #tpu.memory_space<vmem>>, %arg8: memref<1x16x128xbf16, #tpu.memory_space<vmem>>, %arg9: memref<16x1xf32, #tpu.memory_space<vmem>>, %arg10: memref<16x1xf32, #tpu.memory_space<vmem>>, %arg11: memref<16x128xf32, #tpu.memory_space<vmem>>) attributes {dimension_semantics = [#tpu.dimension_semantics<parallel>, #tpu.dimension_semantics<parallel>, #tpu.dimension_semantics<parallel>, #tpu.dimension_semantics<arbitrary>], iteration_bounds = array<i64: 2, 2, 1, 1>, scalar_prefetch = 0 : i64, scratch_operands = 3 : i64, tpu.core_type = #tpu.core_type<tc>, window_params = [{transform_indices = @transform_0, window_bounds = array<i64: 1, 16, 128>}, {transform_indices = @transform_1, window_bounds = array<i64: 1, 16, 128>}, {transform_indices = @transform_2, window_bounds = array<i64: 1, 16, 128>}, {transform_indices = @transform_3, window_bounds = array<i64: 1, 1, 16>}, {transform_indices = @transform_4, window_bounds = array<i64: 1, 16, 128>}]} {
    %c0_i32 = arith.constant 0 : i32
    %0 = arith.cmpi eq, %arg3, %c0_i32 : i32
    %1 = arith.extui %0 : i1 to i32
    %c0_i32_0 = arith.constant 0 : i32
    %2 = arith.cmpi ne, %1, %c0_i32_0 : i32
    scf.if %2 {
      %cst_30 = arith.constant 0xFF800000 : f32
      %42 = vector.broadcast %cst_30 : f32 to vector<16x1xf32>
      %c0_31 = arith.constant 0 : index
      %c0_32 = arith.constant 0 : index
      %43 = vector.load %arg9[%c0_31, %c0_32] : memref<16x1xf32, #tpu.memory_space<vmem>>, vector<16x1xf32>
      tpu.vector_store %arg9[%c0_31, %c0_32], %42 {strides = array<i32>} : memref<16x1xf32, #tpu.memory_space<vmem>>, vector<16x1xf32>,
      %cst_33 = arith.constant 0.000000e+00 : f32
      %44 = vector.broadcast %cst_33 : f32 to vector<16x1xf32>
      %c0_34 = arith.constant 0 : index
      %c0_35 = arith.constant 0 : index
      %45 = vector.load %arg10[%c0_34, %c0_35] : memref<16x1xf32, #tpu.memory_space<vmem>>, vector<16x1xf32>
      tpu.vector_store %arg10[%c0_34, %c0_35], %44 {strides = array<i32>} : memref<16x1xf32, #tpu.memory_space<vmem>>, vector<16x1xf32>,
      %cst_36 = arith.constant 0.000000e+00 : f32
      %46 = vector.broadcast %cst_36 : f32 to vector<16x128xf32>
      %c0_37 = arith.constant 0 : index
      %c0_38 = arith.constant 0 : index
      %47 = vector.load %arg11[%c0_37, %c0_38] : memref<16x128xf32, #tpu.memory_space<vmem>>, vector<16x128xf32>
      tpu.vector_store %arg11[%c0_37, %c0_38], %46 {strides = array<i32>} : memref<16x128xf32, #tpu.memory_space<vmem>>, vector<16x128xf32>,
    } else {
    }
    %c0 = arith.constant 0 : index
    %c0_1 = arith.constant 0 : index
    %c0_2 = arith.constant 0 : index
    %3 = vector.load %arg4[%c0, %c0_1, %c0_2] : memref<1x16x128xbf16, #tpu.memory_space<vmem>>, vector<1x16x128xbf16>
    %4 = vector.shape_cast %3 : vector<1x16x128xbf16> to vector<16x128xbf16>
    %c0_3 = arith.constant 0 : index
    %c0_4 = arith.constant 0 : index
    %c0_5 = arith.constant 0 : index
    %5 = vector.load %arg5[%c0_3, %c0_4, %c0_5] : memref<1x16x128xbf16, #tpu.memory_space<vmem>>, vector<1x16x128xbf16>
    %6 = vector.shape_cast %5 : vector<1x16x128xbf16> to vector<16x128xbf16>
    %c0_6 = arith.constant 0 : index
    %c0_7 = arith.constant 0 : index
    %c0_8 = arith.constant 0 : index
    %7 = vector.load %arg6[%c0_6, %c0_7, %c0_8] : memref<1x16x128xbf16, #tpu.memory_space<vmem>>, vector<1x16x128xbf16>
    %8 = vector.shape_cast %7 : vector<1x16x128xbf16> to vector<16x128xbf16>
    %cst = arith.constant dense<0.000000e+00> : vector<16x16xf32>
    %9 = tpu.matmul %4, %6, %cst {dimension_numbers = #tpu.dot_dimension_numbers<[1], [1], [0], [0], [0, 0, 1, 0], [], []>} : vector<16x128xbf16>, vector<16x128xbf16>, vector<16x16xf32> -> vector<16x16xf32>
    %cst_9 = arith.constant 0.0883883461 : f32
    %10 = vector.broadcast %cst_9 : f32 to vector<16x16xf32>
    %11 = arith.mulf %9, %10 : vector<16x16xf32>
    %c0_10 = arith.constant 0 : index
    %c0_11 = arith.constant 0 : index
    %c0_12 = arith.constant 0 : index
    %12 = vector.load %arg7[%c0_10, %c0_11, %c0_12] : memref<1x1x16xf32, #tpu.memory_space<vmem>>, vector<1x1x16xf32>
    %13 = vector.shape_cast %12 : vector<1x1x16xf32> to vector<1x16xf32>
    %14 = vector.broadcast %13 : vector<1x16xf32> to vector<16x16xf32>
    %15 = arith.addf %11, %14 : vector<16x16xf32>
    %c0_13 = arith.constant 0 : index
    %c0_14 = arith.constant 0 : index
    %16 = vector.load %arg9[%c0_13, %c0_14] : memref<16x1xf32, #tpu.memory_space<vmem>>, vector<16x1xf32>
    %cst_15 = arith.constant dense<0xFF800000> : vector<16xf32>
    %17 = vector.multi_reduction <maximumf>, %15, %cst_15 [1] : vector<16x16xf32> to vector<16xf32>
    %18 = vector.shape_cast %17 : vector<16xf32> to vector<16x1xf32>
    %19 = arith.maximumf %16, %18 : vector<16x1xf32>
    %20 = arith.subf %16, %19 : vector<16x1xf32>
    %21 = math.exp %20 : vector<16x1xf32>
    %22 = vector.broadcast %19 : vector<16x1xf32> to vector<16x16xf32>
    %23 = arith.subf %15, %22 : vector<16x16xf32>
    %24 = math.exp %23 : vector<16x16xf32>
    %c0_16 = arith.constant 0 : index
    %c0_17 = arith.constant 0 : index
    %25 = vector.load %arg10[%c0_16, %c0_17] : memref<16x1xf32, #tpu.memory_space<vmem>>, vector<16x1xf32>
    %26 = arith.mulf %21, %25 : vector<16x1xf32>
    %cst_18 = arith.constant dense<0.000000e+00> : vector<16xf32>
    %27 = vector.multi_reduction <add>, %24, %cst_18 [1] : vector<16x16xf32> to vector<16xf32>
    %28 = vector.shape_cast %27 : vector<16xf32> to vector<16x1xf32>
    %29 = arith.addf %26, %28 : vector<16x1xf32>
    %c0_19 = arith.constant 0 : index
    %c0_20 = arith.constant 0 : index
    %30 = vector.load %arg10[%c0_19, %c0_20] : memref<16x1xf32, #tpu.memory_space<vmem>>, vector<16x1xf32>
    tpu.vector_store %arg10[%c0_19, %c0_20], %29 {strides = array<i32>} : memref<16x1xf32, #tpu.memory_space<vmem>>, vector<16x1xf32>,
    %c0_21 = arith.constant 0 : index
    %c0_22 = arith.constant 0 : index
    %31 = vector.load %arg11[%c0_21, %c0_22] : memref<16x128xf32, #tpu.memory_space<vmem>>, vector<16x128xf32>
    %32 = vector.broadcast %21 : vector<16x1xf32> to vector<16x128xf32>
    %33 = arith.mulf %32, %31 : vector<16x128xf32>
    %34 = arith.truncf %24 : vector<16x16xf32> to vector<16x16xbf16>
    %cst_23 = arith.constant dense<0.000000e+00> : vector<16x128xf32>
    %35 = tpu.matmul %34, %8, %cst_23 {dimension_numbers = #tpu.dot_dimension_numbers<[1], [0], [0], [1], [0, 0, 1, 1], [], []>} : vector<16x16xbf16>, vector<16x128xbf16>, vector<16x128xf32> -> vector<16x128xf32>
    %36 = arith.addf %33, %35 : vector<16x128xf32>
    %c0_24 = arith.constant 0 : index
    %c0_25 = arith.constant 0 : index
    %37 = vector.load %arg11[%c0_24, %c0_25] : memref<16x128xf32, #tpu.memory_space<vmem>>, vector<16x128xf32>
    tpu.vector_store %arg11[%c0_24, %c0_25], %36 {strides = array<i32>} : memref<16x128xf32, #tpu.memory_space<vmem>>, vector<16x128xf32>,
    %c0_26 = arith.constant 0 : index
    %c0_27 = arith.constant 0 : index
    %38 = vector.load %arg9[%c0_26, %c0_27] : memref<16x1xf32, #tpu.memory_space<vmem>>, vector<16x1xf32>
    tpu.vector_store %arg9[%c0_26, %c0_27], %19 {strides = array<i32>} : memref<16x1xf32, #tpu.memory_space<vmem>>, vector<16x1xf32>,
    %c0_i32_28 = arith.constant 0 : i32
    %39 = arith.cmpi eq, %arg3, %c0_i32_28 : i32
    %40 = arith.extui %39 : i1 to i32
    %c0_i32_29 = arith.constant 0 : i32
    %41 = arith.cmpi ne, %40, %c0_i32_29 : i32
    scf.if %41 {
      %c0_30 = arith.constant 0 : index
      %c0_31 = arith.constant 0 : index
      %42 = vector.load %arg11[%c0_30, %c0_31] : memref<16x128xf32, #tpu.memory_space<vmem>>, vector<16x128xf32>
      %c0_32 = arith.constant 0 : index
      %c0_33 = arith.constant 0 : index
      %43 = vector.load %arg10[%c0_32, %c0_33] : memref<16x1xf32, #tpu.memory_space<vmem>>, vector<16x1xf32>
      %44 = tpu.reciprocal %43 {approx = true} : vector<16x1xf32> -> vector<16x1xf32>
      %45 = vector.broadcast %44 : vector<16x1xf32> to vector<16x128xf32>
      %46 = arith.mulf %42, %45 : vector<16x128xf32>
      %47 = arith.truncf %46 : vector<16x128xf32> to vector<16x128xbf16>
      %c0_34 = arith.constant 0 : index
      %c0_35 = arith.constant 0 : index
      %c0_36 = arith.constant 0 : index
      %48 = vector.load %arg8[%c0_34, %c0_35, %c0_36] : memref<1x16x128xbf16, #tpu.memory_space<vmem>>, vector<1x16x128xbf16>
      %49 = vector.shape_cast %48 : vector<1x16x128xbf16> to vector<16x128xbf16>
      %50 = vector.shape_cast %47 : vector<16x128xbf16> to vector<1x16x128xbf16>
      tpu.vector_store %arg8[%c0_34, %c0_35, %c0_36], %50 {strides = array<i32>} : memref<1x16x128xbf16, #tpu.memory_space<vmem>>, vector<1x16x128xbf16>,
    } else {
    }
    return
  }
  func.func @transform_0(%arg0: i32, %arg1: i32, %arg2: i32, %arg3: i32) -> (i32, i32, i32) {
    %c0_i32 = arith.constant 0 : i32
    return %arg0, %arg2, %arg1 : i32, i32, i32
  }
  func.func @transform_1(%arg0: i32, %arg1: i32, %arg2: i32, %arg3: i32) -> (i32, i32, i32) {
    %c2_i32 = arith.constant 2 : i32
    %0 = arith.addi %c2_i32, %arg1 : i32
    %c0_i32 = arith.constant 0 : i32
    return %arg0, %arg3, %0 : i32, i32, i32
  }
  func.func @transform_2(%arg0: i32, %arg1: i32, %arg2: i32, %arg3: i32) -> (i32, i32, i32) {
    %c4_i32 = arith.constant 4 : i32
    %0 = arith.addi %c4_i32, %arg1 : i32
    %c0_i32 = arith.constant 0 : i32
    return %arg0, %arg3, %0 : i32, i32, i32
  }
  func.func @transform_3(%arg0: i32, %arg1: i32, %arg2: i32, %arg3: i32) -> (i32, i32, i32) {
    %c0_i32 = arith.constant 0 : i32
    %c0_i32_0 = arith.constant 0 : i32
    return %arg0, %c0_i32, %arg3 : i32, i32, i32
  }
  func.func @transform_4(%arg0: i32, %arg1: i32, %arg2: i32, %arg3: i32) -> (i32, i32, i32) {
    %c0_i32 = arith.constant 0 : i32
    return %arg0, %arg2, %arg1 : i32, i32, i32
  }
}

module attributes {stable_mosaic.version = 11 : i64} {
  func.func @_linear_kernel(%arg0: i32, %arg1: i32, %arg2: i32, %arg3: memref<16x256xbf16, #tpu.memory_space<vmem>>, %arg4: memref<256x512xbf16, #tpu.memory_space<vmem>>, %arg5: memref<1x512xf32, #tpu.memory_space<vmem>>, %arg6: memref<16x512xbf16, #tpu.memory_space<vmem>>, %arg7: memref<16x512xf32, #tpu.memory_space<vmem>>) attributes {dimension_semantics = [#tpu.dimension_semantics<parallel>, #tpu.dimension_semantics<parallel>, #tpu.dimension_semantics<arbitrary>], iteration_bounds = array<i64: 2, 2, 1>, scalar_prefetch = 0 : i64, scratch_operands = 1 : i64, tpu.core_type = #tpu.core_type<tc>, window_params = [{transform_indices = @transform_0, window_bounds = array<i64: 16, 256>}, {transform_indices = @transform_1, window_bounds = array<i64: 256, 512>}, {transform_indices = @transform_2, window_bounds = array<i64: 1, 512>}, {transform_indices = @transform_3, window_bounds = array<i64: 16, 512>}]} {
    %c0_i32 = arith.constant 0 : i32
    %0 = arith.cmpi eq, %arg2, %c0_i32 : i32
    %1 = arith.extui %0 : i1 to i32
    %c0_i32_0 = arith.constant 0 : i32
    %2 = arith.cmpi ne, %1, %c0_i32_0 : i32
    scf.if %2 {
      %cst_10 = arith.constant 0.000000e+00 : f32
      %12 = vector.broadcast %cst_10 : f32 to vector<16x512xf32>
      %c0_11 = arith.constant 0 : index
      %c0_12 = arith.constant 0 : index
      %13 = vector.load %arg7[%c0_11, %c0_12] : memref<16x512xf32, #tpu.memory_space<vmem>>, vector<16x512xf32>
      tpu.vector_store %arg7[%c0_11, %c0_12], %12 {strides = array<i32>} : memref<16x512xf32, #tpu.memory_space<vmem>>, vector<16x512xf32>,
    } else {
    }
    %c0 = arith.constant 0 : index
    %c0_1 = arith.constant 0 : index
    %3 = vector.load %arg7[%c0, %c0_1] : memref<16x512xf32, #tpu.memory_space<vmem>>, vector<16x512xf32>
    %c0_2 = arith.constant 0 : index
    %c0_3 = arith.constant 0 : index
    %4 = vector.load %arg3[%c0_2, %c0_3] : memref<16x256xbf16, #tpu.memory_space<vmem>>, vector<16x256xbf16>
    %c0_4 = arith.constant 0 : index
    %c0_5 = arith.constant 0 : index
    %5 = vector.load %arg4[%c0_4, %c0_5] : memref<256x512xbf16, #tpu.memory_space<vmem>>, vector<256x512xbf16>
    %cst = arith.constant dense<0.000000e+00> : vector<16x512xf32>
    %6 = tpu.matmul %4, %5, %cst {dimension_numbers = #tpu.dot_dimension_numbers<[1], [0], [0], [1], [0, 0, 1, 1], [], []>} : vector<16x256xbf16>, vector<256x512xbf16>, vector<16x512xf32> -> vector<16x512xf32>
    %7 = arith.addf %3, %6 : vector<16x512xf32>
    %c0_6 = arith.constant 0 : index
    %c0_7 = arith.constant 0 : index
    %8 = vector.load %arg7[%c0_6, %c0_7] : memref<16x512xf32, #tpu.memory_space<vmem>>, vector<16x512xf32>
    tpu.vector_store %arg7[%c0_6, %c0_7], %7 {strides = array<i32>} : memref<16x512xf32, #tpu.memory_space<vmem>>, vector<16x512xf32>,
    %c0_i32_8 = arith.constant 0 : i32
    %9 = arith.cmpi eq, %arg2, %c0_i32_8 : i32
    %10 = arith.extui %9 : i1 to i32
    %c0_i32_9 = arith.constant 0 : i32
    %11 = arith.cmpi ne, %10, %c0_i32_9 : i32
    scf.if %11 {
      %c0_10 = arith.constant 0 : index
      %c0_11 = arith.constant 0 : index
      %12 = vector.load %arg7[%c0_10, %c0_11] : memref<16x512xf32, #tpu.memory_space<vmem>>, vector<16x512xf32>
      %c0_12 = arith.constant 0 : index
      %c0_13 = arith.constant 0 : index
      %13 = vector.load %arg5[%c0_12, %c0_13] : memref<1x512xf32, #tpu.memory_space<vmem>>, vector<1x512xf32>
      %14 = vector.broadcast %13 : vector<1x512xf32> to vector<16x512xf32>
      %15 = arith.addf %12, %14 : vector<16x512xf32>
      %cst_14 = arith.constant 5.000000e-01 : f32
      %16 = vector.broadcast %cst_14 : f32 to vector<16x512xf32>
      %17 = arith.mulf %16, %15 : vector<16x512xf32>
      %cst_15 = arith.constant 4.471500e-02 : f32
      %18 = vector.broadcast %cst_15 : f32 to vector<16x512xf32>
      %19 = arith.mulf %18, %15 : vector<16x512xf32>
      %20 = arith.mulf %19, %15 : vector<16x512xf32>
      %21 = arith.mulf %20, %15 : vector<16x512xf32>
      %22 = arith.addf %15, %21 : vector<16x512xf32>
      %cst_16 = arith.constant 0.797884583 : f32
      %23 = vector.broadcast %cst_16 : f32 to vector<16x512xf32>
      %24 = arith.mulf %23, %22 : vector<16x512xf32>
      %25 = math.tanh %24 : vector<16x512xf32>
      %cst_17 = arith.constant 1.000000e+00 : f32
      %26 = vector.broadcast %cst_17 : f32 to vector<16x512xf32>
      %27 = arith.addf %26, %25 : vector<16x512xf32>
      %28 = arith.mulf %17, %27 : vector<16x512xf32>
      %29 = arith.truncf %28 : vector<16x512xf32> to vector<16x512xbf16>
      %c0_18 = arith.constant 0 : index
      %c0_19 = arith.constant 0 : index
      %30 = vector.load %arg6[%c0_18, %c0_19] : memref<16x512xbf16, #tpu.memory_space<vmem>>, vector<16x512xbf16>
      tpu.vector_store %arg6[%c0_18, %c0_19], %29 {strides = array<i32>} : memref<16x512xbf16, #tpu.memory_space<vmem>>, vector<16x512xbf16>,
    } else {
    }
    return
  }
  func.func @transform_0(%arg0: i32, %arg1: i32, %arg2: i32) -> (i32, i32) {
    %c0_i32 = arith.constant 0 : i32
    return %arg0, %arg2 : i32, i32
  }
  func.func @transform_1(%arg0: i32, %arg1: i32, %arg2: i32) -> (i32, i32) {
    %c0_i32 = arith.constant 0 : i32
    return %arg2, %arg1 : i32, i32
  }
  func.func @transform_2(%arg0: i32, %arg1: i32, %arg2: i32) -> (i32, i32) {
    %c0_i32 = arith.constant 0 : i32
    %c0_i32_0 = arith.constant 0 : i32
    return %c0_i32, %arg1 : i32, i32
  }
  func.func @transform_3(%arg0: i32, %arg1: i32, %arg2: i32) -> (i32, i32) {
    %c0_i32 = arith.constant 0 : i32
    return %arg0, %arg1 : i32, i32
  }
}

module attributes {stable_mosaic.version = 11 : i64} {
  func.func @_linear_kernel(%arg0: i32, %arg1: i32, %arg2: i32, %arg3: memref<16x256xbf16, #tpu.memory_space<vmem>>, %arg4: memref<256x256xbf16, #tpu.memory_space<vmem>>, %arg5: memref<1x256xf32, #tpu.memory_space<vmem>>, %arg6: memref<16x256xbf16, #tpu.memory_space<vmem>>, %arg7: memref<16x256xf32, #tpu.memory_space<vmem>>) attributes {dimension_semantics = [#tpu.dimension_semantics<parallel>, #tpu.dimension_semantics<parallel>, #tpu.dimension_semantics<arbitrary>], iteration_bounds = array<i64: 2, 3, 1>, scalar_prefetch = 0 : i64, scratch_operands = 1 : i64, tpu.core_type = #tpu.core_type<tc>, window_params = [{transform_indices = @transform_0, window_bounds = array<i64: 16, 256>}, {transform_indices = @transform_1, window_bounds = array<i64: 256, 256>}, {transform_indices = @transform_2, window_bounds = array<i64: 1, 256>}, {transform_indices = @transform_3, window_bounds = array<i64: 16, 256>}]} {
    %c0_i32 = arith.constant 0 : i32
    %0 = arith.cmpi eq, %arg2, %c0_i32 : i32
    %1 = arith.extui %0 : i1 to i32
    %c0_i32_0 = arith.constant 0 : i32
    %2 = arith.cmpi ne, %1, %c0_i32_0 : i32
    scf.if %2 {
      %cst_10 = arith.constant 0.000000e+00 : f32
      %12 = vector.broadcast %cst_10 : f32 to vector<16x256xf32>
      %c0_11 = arith.constant 0 : index
      %c0_12 = arith.constant 0 : index
      %13 = vector.load %arg7[%c0_11, %c0_12] : memref<16x256xf32, #tpu.memory_space<vmem>>, vector<16x256xf32>
      tpu.vector_store %arg7[%c0_11, %c0_12], %12 {strides = array<i32>} : memref<16x256xf32, #tpu.memory_space<vmem>>, vector<16x256xf32>,
    } else {
    }
    %c0 = arith.constant 0 : index
    %c0_1 = arith.constant 0 : index
    %3 = vector.load %arg7[%c0, %c0_1] : memref<16x256xf32, #tpu.memory_space<vmem>>, vector<16x256xf32>
    %c0_2 = arith.constant 0 : index
    %c0_3 = arith.constant 0 : index
    %4 = vector.load %arg3[%c0_2, %c0_3] : memref<16x256xbf16, #tpu.memory_space<vmem>>, vector<16x256xbf16>
    %c0_4 = arith.constant 0 : index
    %c0_5 = arith.constant 0 : index
    %5 = vector.load %arg4[%c0_4, %c0_5] : memref<256x256xbf16, #tpu.memory_space<vmem>>, vector<256x256xbf16>
    %cst = arith.constant dense<0.000000e+00> : vector<16x256xf32>
    %6 = tpu.matmul %4, %5, %cst {dimension_numbers = #tpu.dot_dimension_numbers<[1], [0], [0], [1], [0, 0, 1, 1], [], []>} : vector<16x256xbf16>, vector<256x256xbf16>, vector<16x256xf32> -> vector<16x256xf32>
    %7 = arith.addf %3, %6 : vector<16x256xf32>
    %c0_6 = arith.constant 0 : index
    %c0_7 = arith.constant 0 : index
    %8 = vector.load %arg7[%c0_6, %c0_7] : memref<16x256xf32, #tpu.memory_space<vmem>>, vector<16x256xf32>
    tpu.vector_store %arg7[%c0_6, %c0_7], %7 {strides = array<i32>} : memref<16x256xf32, #tpu.memory_space<vmem>>, vector<16x256xf32>,
    %c0_i32_8 = arith.constant 0 : i32
    %9 = arith.cmpi eq, %arg2, %c0_i32_8 : i32
    %10 = arith.extui %9 : i1 to i32
    %c0_i32_9 = arith.constant 0 : i32
    %11 = arith.cmpi ne, %10, %c0_i32_9 : i32
    scf.if %11 {
      %c0_10 = arith.constant 0 : index
      %c0_11 = arith.constant 0 : index
      %12 = vector.load %arg7[%c0_10, %c0_11] : memref<16x256xf32, #tpu.memory_space<vmem>>, vector<16x256xf32>
      %c0_12 = arith.constant 0 : index
      %c0_13 = arith.constant 0 : index
      %13 = vector.load %arg5[%c0_12, %c0_13] : memref<1x256xf32, #tpu.memory_space<vmem>>, vector<1x256xf32>
      %14 = vector.broadcast %13 : vector<1x256xf32> to vector<16x256xf32>
      %15 = arith.addf %12, %14 : vector<16x256xf32>
      %16 = arith.truncf %15 : vector<16x256xf32> to vector<16x256xbf16>
      %c0_14 = arith.constant 0 : index
      %c0_15 = arith.constant 0 : index
      %17 = vector.load %arg6[%c0_14, %c0_15] : memref<16x256xbf16, #tpu.memory_space<vmem>>, vector<16x256xbf16>
      tpu.vector_store %arg6[%c0_14, %c0_15], %16 {strides = array<i32>} : memref<16x256xbf16, #tpu.memory_space<vmem>>, vector<16x256xbf16>,
    } else {
    }
    return
  }
  func.func @transform_0(%arg0: i32, %arg1: i32, %arg2: i32) -> (i32, i32) {
    %c0_i32 = arith.constant 0 : i32
    return %arg0, %arg2 : i32, i32
  }
  func.func @transform_1(%arg0: i32, %arg1: i32, %arg2: i32) -> (i32, i32) {
    %c0_i32 = arith.constant 0 : i32
    return %arg2, %arg1 : i32, i32
  }
  func.func @transform_2(%arg0: i32, %arg1: i32, %arg2: i32) -> (i32, i32) {
    %c0_i32 = arith.constant 0 : i32
    %c0_i32_0 = arith.constant 0 : i32
    return %c0_i32, %arg1 : i32, i32
  }
  func.func @transform_3(%arg0: i32, %arg1: i32, %arg2: i32) -> (i32, i32) {
    %c0_i32 = arith.constant 0 : i32
    return %arg0, %arg1 : i32, i32
  }
}

module attributes {stable_mosaic.version = 11 : i64} {
  func.func @_linear_res_ln_kernel(%arg0: i32, %arg1: i32, %arg2: memref<16x1024xbf16, #tpu.memory_space<vmem>>, %arg3: memref<1024x256xbf16, #tpu.memory_space<vmem>>, %arg4: memref<1x256xf32, #tpu.memory_space<vmem>>, %arg5: memref<16x256xbf16, #tpu.memory_space<vmem>>, %arg6: memref<1x256xf32, #tpu.memory_space<vmem>>, %arg7: memref<1x256xf32, #tpu.memory_space<vmem>>, %arg8: memref<16x256xbf16, #tpu.memory_space<vmem>>, %arg9: memref<16x256xf32, #tpu.memory_space<vmem>>) attributes {dimension_semantics = [#tpu.dimension_semantics<parallel>, #tpu.dimension_semantics<arbitrary>], iteration_bounds = array<i64: 2, 1>, scalar_prefetch = 0 : i64, scratch_operands = 1 : i64, tpu.core_type = #tpu.core_type<tc>, window_params = [{transform_indices = @transform_0, window_bounds = array<i64: 16, 1024>}, {transform_indices = @transform_1, window_bounds = array<i64: 1024, 256>}, {pipeline_mode = #tpu.pipeline_mode<synchronous>, transform_indices = @transform_2, window_bounds = array<i64: 1, 256>}, {transform_indices = @transform_3, window_bounds = array<i64: 16, 256>}, {pipeline_mode = #tpu.pipeline_mode<synchronous>, transform_indices = @transform_4, window_bounds = array<i64: 1, 256>}, {pipeline_mode = #tpu.pipeline_mode<synchronous>, transform_indices = @transform_5, window_bounds = array<i64: 1, 256>}, {transform_indices = @transform_6, window_bounds = array<i64: 16, 256>}]} {
    %c0_i32 = arith.constant 0 : i32
    %0 = arith.cmpi eq, %arg1, %c0_i32 : i32
    %1 = arith.extui %0 : i1 to i32
    %c0_i32_0 = arith.constant 0 : i32
    %2 = arith.cmpi ne, %1, %c0_i32_0 : i32
    scf.if %2 {
      %cst_10 = arith.constant 0.000000e+00 : f32
      %12 = vector.broadcast %cst_10 : f32 to vector<16x256xf32>
      %c0_11 = arith.constant 0 : index
      %c0_12 = arith.constant 0 : index
      %13 = vector.load %arg9[%c0_11, %c0_12] : memref<16x256xf32, #tpu.memory_space<vmem>>, vector<16x256xf32>
      tpu.vector_store %arg9[%c0_11, %c0_12], %12 {strides = array<i32>} : memref<16x256xf32, #tpu.memory_space<vmem>>, vector<16x256xf32>,
    } else {
    }
    %c0 = arith.constant 0 : index
    %c0_1 = arith.constant 0 : index
    %3 = vector.load %arg9[%c0, %c0_1] : memref<16x256xf32, #tpu.memory_space<vmem>>, vector<16x256xf32>
    %c0_2 = arith.constant 0 : index
    %c0_3 = arith.constant 0 : index
    %4 = vector.load %arg2[%c0_2, %c0_3] : memref<16x1024xbf16, #tpu.memory_space<vmem>>, vector<16x1024xbf16>
    %c0_4 = arith.constant 0 : index
    %c0_5 = arith.constant 0 : index
    %5 = vector.load %arg3[%c0_4, %c0_5] : memref<1024x256xbf16, #tpu.memory_space<vmem>>, vector<1024x256xbf16>
    %cst = arith.constant dense<0.000000e+00> : vector<16x256xf32>
    %6 = tpu.matmul %4, %5, %cst {dimension_numbers = #tpu.dot_dimension_numbers<[1], [0], [0], [1], [0, 0, 1, 1], [], []>} : vector<16x1024xbf16>, vector<1024x256xbf16>, vector<16x256xf32> -> vector<16x256xf32>
    %7 = arith.addf %3, %6 : vector<16x256xf32>
    %c0_6 = arith.constant 0 : index
    %c0_7 = arith.constant 0 : index
    %8 = vector.load %arg9[%c0_6, %c0_7] : memref<16x256xf32, #tpu.memory_space<vmem>>, vector<16x256xf32>
    tpu.vector_store %arg9[%c0_6, %c0_7], %7 {strides = array<i32>} : memref<16x256xf32, #tpu.memory_space<vmem>>, vector<16x256xf32>,
    %c0_i32_8 = arith.constant 0 : i32
    %9 = arith.cmpi eq, %arg1, %c0_i32_8 : i32
    %10 = arith.extui %9 : i1 to i32
    %c0_i32_9 = arith.constant 0 : i32
    %11 = arith.cmpi ne, %10, %c0_i32_9 : i32
    scf.if %11 {
      %c0_10 = arith.constant 0 : index
      %c0_11 = arith.constant 0 : index
      %12 = vector.load %arg9[%c0_10, %c0_11] : memref<16x256xf32, #tpu.memory_space<vmem>>, vector<16x256xf32>
      %c0_12 = arith.constant 0 : index
      %c0_13 = arith.constant 0 : index
      %13 = vector.load %arg4[%c0_12, %c0_13] : memref<1x256xf32, #tpu.memory_space<vmem>>, vector<1x256xf32>
      %14 = vector.broadcast %13 : vector<1x256xf32> to vector<16x256xf32>
      %15 = arith.addf %12, %14 : vector<16x256xf32>
      %c0_14 = arith.constant 0 : index
      %c0_15 = arith.constant 0 : index
      %16 = vector.load %arg5[%c0_14, %c0_15] : memref<16x256xbf16, #tpu.memory_space<vmem>>, vector<16x256xbf16>
      %17 = arith.extf %16 : vector<16x256xbf16> to vector<16x256xf32>
      %18 = arith.addf %15, %17 : vector<16x256xf32>
      %cst_16 = arith.constant dense<0.000000e+00> : vector<16xf32>
      %19 = vector.multi_reduction <add>, %18, %cst_16 [1] : vector<16x256xf32> to vector<16xf32>
      %20 = vector.shape_cast %19 : vector<16xf32> to vector<16x1xf32>
      %cst_17 = arith.constant 2.560000e+02 : f32
      %21 = vector.broadcast %cst_17 : f32 to vector<16x1xf32>
      %22 = arith.divf %20, %21 : vector<16x1xf32>
      %23 = vector.broadcast %22 : vector<16x1xf32> to vector<16x256xf32>
      %24 = arith.subf %18, %23 : vector<16x256xf32>
      %25 = arith.mulf %24, %24 : vector<16x256xf32>
      %cst_18 = arith.constant dense<0.000000e+00> : vector<16xf32>
      %26 = vector.multi_reduction <add>, %25, %cst_18 [1] : vector<16x256xf32> to vector<16xf32>
      %27 = vector.shape_cast %26 : vector<16xf32> to vector<16x1xf32>
      %cst_19 = arith.constant 2.560000e+02 : f32
      %28 = vector.broadcast %cst_19 : f32 to vector<16x1xf32>
      %29 = arith.divf %27, %28 : vector<16x1xf32>
      %30 = vector.broadcast %22 : vector<16x1xf32> to vector<16x256xf32>
      %31 = arith.subf %18, %30 : vector<16x256xf32>
      %cst_20 = arith.constant 9.99999996E-13 : f32
      %32 = vector.broadcast %cst_20 : f32 to vector<16x1xf32>
      %33 = arith.addf %29, %32 : vector<16x1xf32>
      %34 = math.rsqrt %33 : vector<16x1xf32>
      %35 = vector.broadcast %34 : vector<16x1xf32> to vector<16x256xf32>
      %36 = arith.mulf %31, %35 : vector<16x256xf32>
      %c0_21 = arith.constant 0 : index
      %c0_22 = arith.constant 0 : index
      %37 = vector.load %arg6[%c0_21, %c0_22] : memref<1x256xf32, #tpu.memory_space<vmem>>, vector<1x256xf32>
      %38 = vector.broadcast %37 : vector<1x256xf32> to vector<16x256xf32>
      %39 = arith.mulf %36, %38 : vector<16x256xf32>
      %c0_23 = arith.constant 0 : index
      %c0_24 = arith.constant 0 : index
      %40 = vector.load %arg7[%c0_23, %c0_24] : memref<1x256xf32, #tpu.memory_space<vmem>>, vector<1x256xf32>
      %41 = vector.broadcast %40 : vector<1x256xf32> to vector<16x256xf32>
      %42 = arith.addf %39, %41 : vector<16x256xf32>
      %43 = arith.truncf %42 : vector<16x256xf32> to vector<16x256xbf16>
      %c0_25 = arith.constant 0 : index
      %c0_26 = arith.constant 0 : index
      %44 = vector.load %arg8[%c0_25, %c0_26] : memref<16x256xbf16, #tpu.memory_space<vmem>>, vector<16x256xbf16>
      tpu.vector_store %arg8[%c0_25, %c0_26], %43 {strides = array<i32>} : memref<16x256xbf16, #tpu.memory_space<vmem>>, vector<16x256xbf16>,
    } else {
    }
    return
  }
  func.func @transform_0(%arg0: i32, %arg1: i32) -> (i32, i32) {
    %c0_i32 = arith.constant 0 : i32
    return %arg0, %arg1 : i32, i32
  }
  func.func @transform_1(%arg0: i32, %arg1: i32) -> (i32, i32) {
    %c0_i32 = arith.constant 0 : i32
    %c0_i32_0 = arith.constant 0 : i32
    return %arg1, %c0_i32 : i32, i32
  }
  func.func @transform_2(%arg0: i32, %arg1: i32) -> (i32, i32) {
    %c0_i32 = arith.constant 0 : i32
    %c0_i32_0 = arith.constant 0 : i32
    %c0_i32_1 = arith.constant 0 : i32
    return %c0_i32, %c0_i32_0 : i32, i32
  }
  func.func @transform_3(%arg0: i32, %arg1: i32) -> (i32, i32) {
    %c0_i32 = arith.constant 0 : i32
    %c0_i32_0 = arith.constant 0 : i32
    return %arg0, %c0_i32 : i32, i32
  }
  func.func @transform_4(%arg0: i32, %arg1: i32) -> (i32, i32) {
    %c0_i32 = arith.constant 0 : i32
    %c0_i32_0 = arith.constant 0 : i32
    %c0_i32_1 = arith.constant 0 : i32
    return %c0_i32, %c0_i32_0 : i32, i32
  }
  func.func @transform_5(%arg0: i32, %arg1: i32) -> (i32, i32) {
    %c0_i32 = arith.constant 0 : i32
    %c0_i32_0 = arith.constant 0 : i32
    %c0_i32_1 = arith.constant 0 : i32
    return %c0_i32, %c0_i32_0 : i32, i32
  }
  func.func @transform_6(%arg0: i32, %arg1: i32) -> (i32, i32) {
    %c0_i32 = arith.constant 0 : i32
    %c0_i32_0 = arith.constant 0 : i32
    return %arg0, %c0_i32 : i32, i32
  }
}

module attributes {stable_mosaic.version = 11 : i64} {
  func.func @_pooler_head_kernel(%arg0: memref<2x256xbf16, #tpu.memory_space<vmem>>, %arg1: memref<256x256xbf16, #tpu.memory_space<vmem>>, %arg2: memref<1x256xf32, #tpu.memory_space<vmem>>, %arg3: memref<256x1xbf16, #tpu.memory_space<vmem>>, %arg4: memref<1x1xf32, #tpu.memory_space<vmem>>, %arg5: memref<2x1xf32, #tpu.memory_space<vmem>>) attributes {dimension_semantics = [], scalar_prefetch = 0 : i64, scratch_operands = 0 : i64, tpu.core_type = #tpu.core_type<tc>} {
    %c0 = arith.constant 0 : index
    %c0_0 = arith.constant 0 : index
    %0 = vector.load %arg0[%c0, %c0_0] : memref<2x256xbf16, #tpu.memory_space<vmem>>, vector<2x256xbf16>
    %c0_1 = arith.constant 0 : index
    %c0_2 = arith.constant 0 : index
    %1 = vector.load %arg1[%c0_1, %c0_2] : memref<256x256xbf16, #tpu.memory_space<vmem>>, vector<256x256xbf16>
    %cst = arith.constant dense<0.000000e+00> : vector<2x256xf32>
    %2 = tpu.matmul %0, %1, %cst {dimension_numbers = #tpu.dot_dimension_numbers<[1], [0], [0], [1], [0, 0, 1, 1], [], []>} : vector<2x256xbf16>, vector<256x256xbf16>, vector<2x256xf32> -> vector<2x256xf32>
    %c0_3 = arith.constant 0 : index
    %c0_4 = arith.constant 0 : index
    %3 = vector.load %arg2[%c0_3, %c0_4] : memref<1x256xf32, #tpu.memory_space<vmem>>, vector<1x256xf32>
    %4 = vector.broadcast %3 : vector<1x256xf32> to vector<2x256xf32>
    %5 = arith.addf %2, %4 : vector<2x256xf32>
    %6 = math.tanh %5 : vector<2x256xf32>
    %7 = arith.truncf %6 : vector<2x256xf32> to vector<2x256xbf16>
    %c0_5 = arith.constant 0 : index
    %c0_6 = arith.constant 0 : index
    %8 = vector.load %arg3[%c0_5, %c0_6] : memref<256x1xbf16, #tpu.memory_space<vmem>>, vector<256x1xbf16>
    %cst_7 = arith.constant dense<0.000000e+00> : vector<2x1xf32>
    %9 = tpu.matmul %7, %8, %cst_7 {dimension_numbers = #tpu.dot_dimension_numbers<[1], [0], [0], [1], [0, 0, 1, 1], [], []>} : vector<2x256xbf16>, vector<256x1xbf16>, vector<2x1xf32> -> vector<2x1xf32>
    %c0_8 = arith.constant 0 : index
    %c0_9 = arith.constant 0 : index
    %10 = vector.load %arg4[%c0_8, %c0_9] : memref<1x1xf32, #tpu.memory_space<vmem>>, vector<1x1xf32>
    %11 = vector.broadcast %10 : vector<1x1xf32> to vector<2x1xf32>
    %12 = arith.addf %9, %11 : vector<2x1xf32>
    %c0_10 = arith.constant 0 : index
    %c0_11 = arith.constant 0 : index
    %13 = vector.load %arg5[%c0_10, %c0_11] : memref<2x1xf32, #tpu.memory_space<vmem>>, vector<2x1xf32>
    tpu.vector_store %arg5[%c0_10, %c0_11], %12 {strides = array<i32>} : memref<2x1xf32, #tpu.memory_space<vmem>>, vector<2x1xf32>,
    return
  }
}

</mosaic_0001>

<bundles_post_ra>
// kernel: bert_base_uncased_forward.12
= control target key start
LH: loop header
LB: loop body
LE: loop exit
PB: predicated region body
PF: predicated region fallthrough
CT: control target
= control target key end

     0   :  { %s673_s18 = smov 0   ;;  %s675_s19 = smov 0   ;;  %s726_s0 = inlined_call_operand.vmem [shape: bf16[2,16,256], index: 0, kind: input, shape index: {}]   ;;  %s727_s1 = inlined_call_operand.vmem [shape: bf16[16,256], index: 1, kind: input, shape index: {}]   ;;  %s728_s2 = inlined_call_operand.vmem [shape: bf16[2,16,256], index: 2, kind: input, shape index: {}]   ;;  %s729_s3 = inlined_call_operand.vmem [shape: f32[1,256], index: 3, kind: input, shape index: {}]   ;;  %s730_s4 = inlined_call_operand.vmem [shape: f32[1,256], index: 4, kind: input, shape index: {}]   ;;  %s731_s5 = inlined_call_operand.vmem [shape: bf16[2,16,256], index: 5, kind: output, shape index: {}]  }
   0x1   :  { %s677_s20 = smov 0  }
   0x2 LB: > { %s27_s21 = sadd.s32 1, %s637_s19  ;;  %p575_p0 = scmp.ge.s32.totalorder %s641_s20, 1  ;;  %s641_s20 = sphi %s677_s20, %s15_s20   ;;  %s637_s19 = sphi %s675_s19, %s733_s19   ;;  %s633_s18 = sphi %s673_s18, %s732_s18  }
   0x3   : > { %p29_p1 = scmp.ge.s32.totalorder %s27_s21, 2  ;;  %p239_p2 = scmp.lt.s32.totalorder %s641_s20, 3 }
   0x5   : > { %s735_s21 = smov (%p29_p1, %s27_s21), 0  ;;  %p240_p3 = pnand %p575_p0, %p239_p2 }
   0x6   : > { %p294_p4 = scmp.lt.s32.totalorder (!%p240_p3), %s633_s18, 1  ;;  %v339_v0 = vld [vmem:[%s727_s1] sm:$0xff] (!%p240_p3)  ;;  %v340_v1 = vld [vmem:[%s727_s1 + $0x8] sm:$0xff] (!%p240_p3)  ;;  %v394_v44 = vlaneseq (!%p240_p3) }
   0x7   : > { %243 = sbr.rel (%p240_p3) target bundleno = 346 (0x15a), region = 40  ;;  %v341_v2 = vunpack.c.l.bf16 (!%p240_p3), %v339_v0  ;;  %v342_v3 = vunpack.c.h.bf16 (!%p240_p3), %v339_v0  ;;  %v343_v7 = vunpack.c.l.bf16 (!%p240_p3), %v340_v1  ;;  %v344_v8 = vunpack.c.h.bf16 (!%p240_p3), %v340_v1  ;;  %v392_v52 = vld [vmem:[%s729_s3] sm:$0x3] (!%p240_p3) }
   0x8   : > { %v395_v48 = vshrl.u32 (!%p240_p3), %v394_v44, 7  ;;  %v408_v53 = vld [vmem:[%s730_s4] sm:$0x3] (!%p240_p3) }
   0xa   : > { %v396_v50 = vsub.s32 (!%p240_p3), 0, %v395_v48  ;;  %v400_v51 = vsub.s32 (!%p240_p3), 1, %v395_v48 }
   0xc   : > { %v397_v54 = vrot.slane (!%p240_p3), %v392_v52, %v396_v50  ;;  %v401_v55 = vrot.slane (!%p240_p3), %v392_v52, %v400_v51  ;;  %v413_v57 = vrot.slane (!%p240_p3), %v408_v53, %v396_v50  ;;  %v417_v58 = vrot.slane (!%p240_p3), %v408_v53, %v400_v51 }
   0xe   : > { %s737_s18 = smov (!%p294_p4, %s633_s18), 1 }
   0xf   : > { %s697_s26 = sshll.u32 %s737_s18, 4 }
  0x10   : > { %s302_s29 = scalar_lea.vmem %s726_s0, %s697_s26  ;;  %s320_s7 = scalar_lea.vmem %s728_s2, %s697_s26 }
  0x11   : > { %v333_v4 = vld [vmem:[%s302_s29] sm:$0xff]  ;;  %v334_v6 = vld [vmem:[%s302_s29 + $0x8] sm:$0xff]  ;;  %s331_s14 = scalar_lea.vmem %s731_s5, %s697_s26 }
  0x12   : > { %v349_v5 = vld [vmem:[%s320_s7] sm:$0xff]  ;;  %v335_v9 = vunpack.c.l.bf16 %v333_v4  ;;  %v336_v10 = vunpack.c.h.bf16 %v333_v4  ;;  %v350_v13 = vld [vmem:[%s320_s7 + $0x8] sm:$0xff]  ;;  %v337_v14 = vunpack.c.l.bf16 %v334_v6  ;;  %v338_v15 = vunpack.c.h.bf16 %v334_v6 }
  0x13   : > { %v351_v11 = vunpack.c.l.bf16 %v349_v5  ;;  %v352_v12 = vunpack.c.h.bf16 %v349_v5  ;;  %v353_v16 = vunpack.c.l.bf16 %v350_v13  ;;  %v354_v17 = vunpack.c.h.bf16 %v350_v13 }
  0x14   : > { %v345_v18 = vadd.f32 %v341_v2, %v335_v9  ;;  %v346_v19 = vadd.f32 %v342_v3, %v336_v10  ;;  %v347_v20 = vadd.f32 %v343_v7, %v337_v14  ;;  %v348_v21 = vadd.f32 %v344_v8, %v338_v15 }
  0x16   : > { %v355_v22 = vadd.f32 %v351_v11, %v345_v18  ;;  %v356_v23 = vadd.f32 %v352_v12, %v346_v19  ;;  %v357_v24 = vadd.f32 %v353_v16, %v347_v20  ;;  %v358_v25 = vadd.f32 %v354_v17, %v348_v21 }
  0x18   : > { %v359_v26 = vadd.f32 %v356_v23, %v355_v22  ;;  %v362_v27 = vadd.f32 %v358_v25, %v357_v24 }
  0x1a   : > { %360 = vadd.xlane.f32.xlu0 %v359_v26 }
  0x1e   : > { %363 = vadd.xlane.f32.xlu0 %v362_v27 }
  0xa7   : > { %v361_v28 = vpop.xlane.xlu0 %360 }
  0xa8   : > { %v366_v29 = vmul.f32 0.00390625, %v361_v28 }
  0xaa   : > { %v368_v30 = vsub.f32 %v355_v22, %v366_v29  ;;  %v369_v31 = vsub.f32 %v356_v23, %v366_v29 }
  0xab   : > { %v364_v32 = vpop.xlane.xlu0 %363 }
  0xac   : > { %v367_v33 = vmul.f32 0.00390625, %v364_v32  ;;  %v372_v34 = vmul.f32 %v368_v30, %v368_v30  ;;  %v373_v35 = vmul.f32 %v369_v31, %v369_v31 }
  0xae   : > { %v370_v36 = vsub.f32 %v357_v24, %v367_v33  ;;  %v371_v37 = vsub.f32 %v358_v25, %v367_v33  ;;  %v376_v38 = vadd.f32 %v373_v35, %v372_v34 }
  0xb0   : > { %377 = vadd.xlane.f32.xlu1 %v376_v38  ;;  %v374_v39 = vmul.f32 %v370_v36, %v370_v36  ;;  %v375_v40 = vmul.f32 %v371_v37, %v371_v37 }
  0xb2   : > { %v379_v41 = vadd.f32 %v375_v40, %v374_v39 }
  0xb4   : > { %380 = vadd.xlane.f32.xlu1 %v379_v41 }
 0x13d   : > { %v378_v42 = vpop.xlane.xlu1 %377 }
 0x13e   : > { %v382_v43 = vmul.f32 0.00390625, %v378_v42 }
 0x140   : > { %v384_v45 = vadd.f32 1e-12, %v382_v43 }
 0x141   : > { %v381_v46 = vpop.xlane.xlu1 %380 }
 0x142   : > { %615 = vrsqrt.f32 %v384_v45  ;;  %v383_v47 = vmul.f32 0.00390625, %v381_v46 }
 0x144   : > { %v385_v49 = vadd.f32 1e-12, %v383_v47 }
 0x146   : > { %617 = vrsqrt.f32 %v385_v49 }
 0x14c   : > { %v616_v56 = vpop.eup %615 }
 0x14d   : > { %v388_v59 = vmul.f32 %v616_v56, %v368_v30  ;;  %v389_v60 = vmul.f32 %v616_v56, %v369_v31 }
 0x14f   : > { %v404_v61 = vmul.f32 %v397_v54, %v388_v59  ;;  %v405_v62 = vmul.f32 %v401_v55, %v389_v60 }
 0x150   : > { %v618_v63 = vpop.eup %617 }
 0x151   : > { %v420_v0 = vadd.f32 %v413_v57, %v404_v61  ;;  %v421_v1 = vadd.f32 %v417_v58, %v405_v62  ;;  %v390_v2 = vmul.f32 %v618_v63, %v370_v36  ;;  %v391_v3 = vmul.f32 %v618_v63, %v371_v37 }
 0x153   : > { %v589_v4 = vpack.c.bf16 %v421_v1, %v420_v0  ;;  %v406_v5 = vmul.f32 %v397_v54, %v390_v2  ;;  %v407_v6 = vmul.f32 %v401_v55, %v391_v3 }
 0x155   : > { %436 = vst [vmem:[%s331_s14] sm:$0xff] %v589_v4  ;;  %v422_v7 = vadd.f32 %v413_v57, %v406_v5  ;;  %v423_v8 = vadd.f32 %v417_v58, %v407_v6 }
 0x157   : > { %v590_v9 = vpack.c.bf16 %v423_v8, %v422_v7 }
 0x159   : > { %437 = vst [vmem:[%s331_s14 + $0x8] sm:$0xff] %v590_v9 }
 0x15a PF: > { %s15_s20 = sadd.s32 1, %s641_s20   ;;  %s732_s18 = smov %s637_s19 }
 0x15b   : > { %p12_p5 = scmp.ge.s32.totalorder %s15_s20, 4   ;;  %s733_s19 = smov %s735_s21 }
 0x15d   :  { %14 = sbr.rel (!%p12_p5) target bundleno = 2 (0x2), region = 76 }

// kernel: bert_base_uncased_forward.13
= control target key start
LH: loop header
LB: loop body
LE: loop exit
PB: predicated region body
PF: predicated region fallthrough
CT: control target
= control target key end

     0   :  { %8 = vsyncpa [#allocation4], 0  ;;  %s1298_s0 = inlined_call_operand.vmem [shape: bf16[32,256], index: 0, kind: input, shape index: {}]   ;;  %s1299_s1 = inlined_call_operand.hbm [shape: bf16[256,768], index: 1, kind: input, shape index: {}]   ;;  %s1300_s2 = inlined_call_operand.vmem [shape: f32[1,768], index: 2, kind: input, shape index: {}]   ;;  %s1301_s3 = inlined_call_operand.vmem [shape: bf16[32,768], index: 3, kind: output, shape index: {}]  }
   0x1   :  { %10 = vsyncpa [#allocation4 + $0x1], 0  ;;  %s1078_s12 = smov 0   ;;  %s1080_s13 = smov 0  }
   0x2   :  { %s1082_s14 = smov 0   ;;  %s1084_s15 = smov 0  }
   0x3   :  { %s1086_s16 = smov 0   ;;  %s1088_s17 = smov 0  }
   0x4   :  { %s1090_s18 = smov 0   ;;  %s1092_s19 = smov 0  }
   0x5   :  { %s1094_s20 = smov 0   ;;  %s1096_s21 = smov 0  }
   0x6 LB: > { %s737_s22 = sadd.s32 4294967295, %s1052_s21   ;;  %s31_s23 = sadd.s32 1, %s1044_s19  ;;  %s1052_s21 = sphi %s1096_s21, %s16_s21   ;;  %s1048_s20 = sphi %s1094_s20, %s1315_s20   ;;  %s1044_s19 = sphi %s1092_s19, %s1314_s19   ;;  %s1040_s18 = sphi %s1090_s18, %s1313_s18   ;;  %s1036_s17 = sphi %s1088_s17, %s1312_s17   ;;  %s1032_s16 = sphi %s1086_s16, %s1311_s16   ;;  %s1028_s15 = sphi %s1084_s15, %s1310_s15   ;;  %s1024_s14 = sphi %s1082_s14, %s1309_s14   ;;  %s1020_s13 = sphi %s1080_s13, %s1308_s13   ;;  %s1016_s12 = sphi %s1078_s12, %s1307_s12  }
   0x7   : > { %p33_p0 = scmp.ge.s32.totalorder %s31_s23, 3  ;;  %s35_s24 = sadd.s32 1, %s1048_s20 }
   0x8   : > { %s72_s25 = sadd.s32 1, %s1032_s16  ;;  %p79_p1 = scmp.ne.s32.totalorder %s1032_s16, %s1028_s15 }
   0x9   : > { %s1317_s23 = smov (%p33_p0, %s31_s23), 0  ;;  %s1319_s24 = smov (!%p33_p0, %s35_s24), %s1048_s20 }
   0xa   : > { %s68_s26 = ssub.s32 %s1044_s19, %s1317_s23  ;;  %p80_p2 = scmp.eq.s32.totalorder %s1052_s21, 0 }
   0xb   : > { %p37_p3 = scmp.ge.s32.totalorder %s1319_s24, 2  ;;  %p70_p4 = scmp.eq.s32.totalorder %s68_s26, 0 }
   0xc   : > { %p1138_p5 = por %p80_p2, %p79_p1  ;;  %p85_p6 = scmp.ne.s32.totalorder %s1028_s15, %s1024_s14 }
   0xd   : > { %s1321_s24 = smov (%p37_p3, %s1319_s24), 0  ;;  %p86_p7 = scmp.eq.s32.totalorder %s737_s22, 0 }
   0xe   : > { %s1146_s28 = scalar_select %p70_p4, %s1032_s16, %s72_s25  }
   0xf   : > { %s121_s29 = ssub.s32 %s1048_s20, %s1321_s24  ;;  %s126_s4 = sadd.s32 1, %s1020_s13 }
  0x10   : > { %s123_s30 = sor.u32 %s121_s29, %s68_s26  ;;  %p1151_p8 = por %p86_p7, %p85_p6 }
  0x11   : > { %p124_p9 = scmp.eq.s32.totalorder %s123_s30, 0  ;;  %p136_p10 = scmp.ne.s32.totalorder %s1020_s13, %s1016_s12 }
  0x12   : > { %p137_p11 = scmp.eq.s32.totalorder %s737_s22, 5  ;;  %p805_p13 = scmp.lt.s32.totalorder %s1052_s21, 6 }
  0x13   : > { %s1158_s6 = scalar_select %p124_p9, %s1020_s13, %s126_s4  }
  0x14   : > { %p1160_p12 = por %p137_p11, %p136_p10  ;;  %s178_s8 = sand.u32 1, %s1032_s16  }
  0x15   : > { %s741_s9 = sshll.u32 %s178_s8, 8  ;;  %s794_s10 = sshll.u32 %s1044_s19, 7 }
  0x16   : > { %s1304_s7 = scalar_select %p1160_p12, 1, 0 }
  0x17   : > { %s1170_s25 = scalar_lea.hbm %s1299_s1, %s794_s10  ;;  %s182_s22 = scalar_lea.vmem [#allocation3], %s741_s9 }
  0x18   : > { %s192_s26 = sshll.u32 %s182_s22, 4  ;;  %p1176_p0 = pnand %p805_p13, %p1138_p5  ;;  %s1172_s26 = int_to_ptr.vmem [resolvable:$true] %s192_s26 }
  0x19   : > { %s1180_s30 = scalar_lea.sflag [#allocation4], %s178_s8  ;;  %s940_s4 = scalar_lea.hbm %s1170_s25, 4096 }
  0x1a   : > { %p941_p1 = scmp.ne.s32.totalorder %s1170_s25, %s940_s4  ;;  %p942_p2 = pneg %p1176_p0 }
  0x1b   : > { %s945_s27 = scalar_lea.hbm %s1299_s1, 12288  ;;  %p946_p5 = scmp.lt.u32.totalorder %s1170_s25, %s1299_s1 }
  0x1c   : > { %p943_p3 = pnand %p942_p2, %p941_p1  ;;  %p947_p6 = scmp.lt.u32.totalorder %s945_s27, %s940_s4 }
  0x1d   : > { %p949_p9 = scmp.lt.u32.totalorder %s940_s4, %s1170_s25 }
  0x1e   : > { %p944_p4 = pneg %p943_p3  ;;  %p948_p7 = por %p947_p6, %p946_p5 }
  0x20   : > { %p950_p10 = por %p949_p9, %p948_p7 }
  0x22   : > { %p951_p11 = pnand %p950_p10, %p944_p4 }
  0x24   : > { %954 = shalt.err (!%p951_p11)
}
  0x25   : > { %s955_s8 = scalar_lea.vmem %s1172_s26, 4096  ;;  %s1054_s22 = smov [#allocation3]  }
  0x26   : > { %p956_p13 = scmp.ne.s32.totalorder %s1172_s26, %s955_s8  ;;  %s960_s9 = sshll.u32 %s1054_s22, 4  ;;  %s961_s9 = int_to_ptr.vmem [resolvable:$false] %s960_s9 }
  0x27   : > { %s962_s10 = scalar_lea.vmem %s961_s9, 8192  ;;  %p963_p12 = scmp.lt.s32.totalorder %s1172_s26, %s961_s9 }
  0x28   : > { %p958_p1 = pnand %p956_p13, %p942_p2  ;;  %p964_p5 = scmp.lt.s32.totalorder %s962_s10, %s955_s8 }
  0x2a   : > { %p959_p3 = pneg %p958_p1  ;;  %p965_p6 = por %p964_p5, %p963_p12 }
  0x2c   : > { %p966_p7 = pnand %p965_p6, %p959_p3 }
  0x2e   : > { %969 = shalt.err (!%p966_p7)
}
  0x2f   : > { %s1055_s4 = smov 384   ;;  %s1056_s27 = smov 128  }
  0x30   : > { %s1057_s11 = smov 8   ;;  %p744_p2 = scmp.ge.s32.totalorder %s1052_s21, 1 }
  0x31   : > { %804 = dma.hbm_to_vmem [thread:$0]  (!%p1176_p0), %s1170_s25, 4096, %s1172_s26, %s1180_s30, %s1055_s4, %s1056_s27, %s1057_s11  }
  0x32   : > { %p208_p4 = scmp.lt.s32.totalorder %s1052_s21, 7 }
  0x34   : > { %p209_p9 = pnand %p744_p2, %p208_p4 }
  0x35   : > { %s214_s14 = sand.u32 (!%p209_p9), 1, %s1028_s15  }
  0x36   : > { %212 = sbr.rel (%p209_p9) target bundleno = 355 (0x163), region = 32  ;;  %s745_s8 = sshll.u32 (!%p209_p9), %s214_s14, 8 }
  0x37   : > { %s215_s22 = scalar_lea.sflag (!%p209_p9), [#allocation4], %s214_s14  ;;  %s1211_s9 = scalar_lea.vmem (!%p209_p9), [#allocation3], %s745_s8 }
  0x3d   : > { %1011 = dma.done.wait (%p1151_p8), %s215_s22, 4096  }
  0x3e   : > { %1013 = vsyncadd (%p1151_p8), %s215_s22, 4294963200  ;;  %v889_v0 = vld [vmem:[%s1211_s9 + $0x4] ss:$8 sps:$4 sm:$0xff]   ;;  %v891_v1 = vld [vmem:[%s1211_s9] ss:$8 sps:$4 sm:$0xff]   ;;  %s747_s5 = sshll.u32 %s1040_s18, 1  ;;  %v551_v34 = vlaneseq }
  0x3f   : > { %491 = vmatprep.subr.bf16.mxu0 %v889_v0  ;;  %v892_v2 = vld [vmem:[%s1211_s9 + $0x14] ss:$8 sps:$4 sm:$0xff]   ;;  %v894_v3 = vld [vmem:[%s1211_s9 + $0x10] ss:$8 sps:$4 sm:$0xff]   ;;  %v895_v4 = vld [vmem:[%s1211_s9 + $0x24] ss:$8 sps:$4 sm:$0xff]  }
  0x40   : > { %492 = vmatpush1.bf16.msra.mxu0 %v891_v1  ;;  %v897_v5 = vld [vmem:[%s1211_s9 + $0x20] ss:$8 sps:$4 sm:$0xff]   ;;  %v898_v6 = vld [vmem:[%s1211_s9 + $0x34] ss:$8 sps:$4 sm:$0xff]   ;;  %p256_p8 = scmp.lt.s32.totalorder %s747_s5, 3  ;;  %s750_s10 = sshll.u32 %s1036_s17, 1 }
  0x41   : > { %493 = vmatprep.subr.bf16.mxu0 %v892_v2  ;;  %v900_v7 = vld [vmem:[%s1211_s9 + $0x30] ss:$8 sps:$4 sm:$0xff]   ;;  %v901_v8 = vld [vmem:[%s1211_s9 + $0x44] ss:$8 sps:$4 sm:$0xff]   ;;  %v903_v9 = vld [vmem:[%s1211_s9 + $0x40] ss:$8 sps:$4 sm:$0xff]  }
  0x42   : > { %s1323_s5 = smov (!%p256_p8, %s747_s5), 3  ;;  %v904_v10 = vld [vmem:[%s1211_s9 + $0x54] ss:$8 sps:$4 sm:$0xff]   ;;  %v906_v11 = vld [vmem:[%s1211_s9 + $0x50] ss:$8 sps:$4 sm:$0xff]   ;;  %p269_p12 = scmp.lt.s32.totalorder %s750_s10, 5 }
  0x43   : > { %s795_s25 = sshll.u32 %s1323_s5, 3  ;;  %v907_v12 = vld [vmem:[%s1211_s9 + $0x64] ss:$8 sps:$4 sm:$0xff]   ;;  %v909_v14 = vld [vmem:[%s1211_s9 + $0x60] ss:$8 sps:$4 sm:$0xff]   ;;  %v552_v35 = vshrl.u32 %v551_v34, 7 }
  0x44   : > { %494 = vmatpush1.bf16.msra.mxu0 %v894_v3  ;;  %s1233_s30 = scalar_lea.vmem %s1298_s0, %s795_s25  ;;  %v910_v15 = vld [vmem:[%s1211_s9 + $0x74] ss:$8 sps:$4 sm:$0xff]   ;;  %v912_v16 = vld [vmem:[%s1211_s9 + $0x70] ss:$8 sps:$4 sm:$0xff]   ;;  %v913_v17 = vld [vmem:[%s1211_s9 + $0x84] ss:$8 sps:$4 sm:$0xff]  }
  0x45   : > { %495 = vmatprep.subr.bf16.mxu0 %v895_v4  ;;  %v939_v13 = vld [vmem:[%s1233_s30 + $0x4] ss:$8 sps:$4 sm:$0xff]   ;;  %v915_v18 = vld [vmem:[%s1211_s9 + $0x80] ss:$8 sps:$4 sm:$0xff]   ;;  %v916_v19 = vld [vmem:[%s1211_s9 + $0x94] ss:$8 sps:$4 sm:$0xff]  }
  0x46   : > { %523 = vmatprep.mubr.bf16.mxu0 %v939_v13  ;;  %v918_v20 = vld [vmem:[%s1211_s9 + $0x90] ss:$8 sps:$4 sm:$0xff]   ;;  %v919_v21 = vld [vmem:[%s1211_s9 + $0xa4] ss:$8 sps:$4 sm:$0xff]   ;;  %v921_v22 = vld [vmem:[%s1211_s9 + $0xa0] ss:$8 sps:$4 sm:$0xff]  }
  0x47   : > { %v922_v23 = vld [vmem:[%s1211_s9 + $0xb4] ss:$8 sps:$4 sm:$0xff]   ;;  %v924_v24 = vld [vmem:[%s1211_s9 + $0xb0] ss:$8 sps:$4 sm:$0xff]   ;;  %v925_v25 = vld [vmem:[%s1211_s9 + $0xc4] ss:$8 sps:$4 sm:$0xff]  }
  0x48   : > { %496 = vmatpush1.bf16.msra.mxu0 %v897_v5  ;;  %v927_v26 = vld [vmem:[%s1211_s9 + $0xc0] ss:$8 sps:$4 sm:$0xff]   ;;  %v928_v27 = vld [vmem:[%s1211_s9 + $0xd4] ss:$8 sps:$4 sm:$0xff]   ;;  %v930_v28 = vld [vmem:[%s1211_s9 + $0xd0] ss:$8 sps:$4 sm:$0xff]  }
  0x49   : > { %497 = vmatprep.subr.bf16.mxu0 %v898_v6  ;;  %v931_v29 = vld [vmem:[%s1211_s9 + $0xe4] ss:$8 sps:$4 sm:$0xff]   ;;  %v933_v30 = vld [vmem:[%s1211_s9 + $0xe0] ss:$8 sps:$4 sm:$0xff]   ;;  %v934_v31 = vld [vmem:[%s1211_s9 + $0xf4] ss:$8 sps:$4 sm:$0xff]  }
  0x4a   : > { %v936_v32 = vld [vmem:[%s1211_s9 + $0xf0] ss:$8 sps:$4 sm:$0xff]   ;;  %v937_v33 = vld [vmem:[%s1233_s30] ss:$8 sps:$4 sm:$0xff]   ;;  %s270_s4 = scalar_select %p269_p12, %s750_s10, 5  ;;  %v553_v36 = vsub.s32 0, %v552_v35 }
  0x4b   : > { %v557_v38 = vsub.s32 1, %v552_v35  ;;  %s251_s8 = sand.u32 1, %s1016_s12   ;;  %p1306_p0 = scmp.ne.s32.totalorder %s1304_s7, 0 }
  0x4c   : > { %498 = vmatpush1.bf16.msra.mxu0 %v900_v7  ;;  %s271_s14 = scalar_lea.vmem %s1300_s2, %s270_s4  ;;  %s746_s22 = sshll.u32 %s251_s8, 4 }
  0x4d   : > { %499 = vmatprep.subr.bf16.mxu0 %v901_v8  ;;  %v549_v37 = vld [vmem:[%s271_s14] sm:$0x3]  ;;  %s253_s17 = scalar_lea.vmem [#allocation5], %s746_s22  ;;  %s798_s12 = smul.u32 (%p1306_p0), 12, %s1040_s18 }
  0x4e   : > { %v554_v39 = vrot.slane %v549_v37, %v553_v36  ;;  %v558_v40 = vrot.slane %v549_v37, %v557_v38 }
  0x4f   : > { %s589_s9 = sadd.s32 (%p1306_p0), %s798_s12, %s750_s10 }
  0x50   : > { %500 = vmatpush1.bf16.msra.mxu0 %v903_v9  ;;  %s791_s5 = sshll.u32 (%p1306_p0), %s589_s9, 2 }
  0x51   : > { %501 = vmatprep.subr.bf16.mxu0 %v904_v10  ;;  %s591_s29 = scalar_lea.vmem (%p1306_p0), %s1301_s3, %s791_s5 }
  0x54   : > { %502 = vmatpush1.bf16.msra.mxu0 %v906_v11 }
  0x55   : > { %503 = vmatprep.subr.bf16.mxu0 %v907_v12 }
  0x58   : > { %504 = vmatpush1.bf16.msra.mxu0 %v909_v14 }
  0x59   : > { %505 = vmatprep.subr.bf16.mxu0 %v910_v15 }
  0x5c   : > { %506 = vmatpush1.bf16.msra.mxu0 %v912_v16 }
  0x5d   : > { %507 = vmatprep.subr.bf16.mxu0 %v913_v17 }
  0x60   : > { %508 = vmatpush1.bf16.msra.mxu0 %v915_v18 }
  0x61   : > { %509 = vmatprep.subr.bf16.mxu0 %v916_v19 }
  0x64   : > { %510 = vmatpush1.bf16.msra.mxu0 %v918_v20 }
  0x65   : > { %511 = vmatprep.subr.bf16.mxu0 %v919_v21 }
  0x68   : > { %512 = vmatpush1.bf16.msra.mxu0 %v921_v22 }
  0x69   : > { %513 = vmatprep.subr.bf16.mxu0 %v922_v23 }
  0x6c   : > { %514 = vmatpush1.bf16.msra.mxu0 %v924_v24 }
  0x6d   : > { %515 = vmatprep.subr.bf16.mxu0 %v925_v25 }
  0x70   : > { %516 = vmatpush1.bf16.msra.mxu0 %v927_v26 }
  0x71   : > { %517 = vmatprep.subr.bf16.mxu0 %v928_v27 }
  0x74   : > { %518 = vmatpush1.bf16.msra.mxu0 %v930_v28 }
  0x75   : > { %519 = vmatprep.subr.bf16.mxu0 %v931_v29 }
  0x78   : > { %520 = vmatpush1.bf16.msra.mxu0 %v933_v30 }
  0x79   : > { %521 = vmatprep.subr.bf16.mxu0 %v934_v31 }
  0x7c   : > { %522 = vmatpush1.bf16.msra.mxu0 %v936_v32 }
  0x7f   : > { %524 = vmatmul.mubr.bf16.vlgmr.msra.gmra.mrb[0].mxu0 %v937_v33 }
 0x152   : > { %v525_v41 = vpop.f32.mrb[0].mxu0 }
 0x153   : > { %v561_v42 = vadd.f32 %v554_v39, %v525_v41  ;;  %v527_v43 = vpop.f32.mrb[1].mxu0 }
 0x154   : > { %v562_v44 = vadd.f32 %v558_v40, %v527_v43  ;;  %v529_v45 = vpop.f32.mrb[2].mxu0  ;;  %585 = sbr.rel (!%p1306_p0) target bundleno = 355 (0x163), region = 48 }
 0x155   : > { %v563_v46 = vadd.f32 %v554_v39, %v529_v45  ;;  %v531_v47 = vpop.f32.mrb[3].mxu0 }
 0x156   : > { %v796_v48 = vpack.c.bf16 %v562_v44, %v561_v42  ;;  %v564_v49 = vadd.f32 %v558_v40, %v531_v47 }
 0x158   : > { %577 = vst [vmem:[%s253_s17] sm:$0xff] %v796_v48  ;;  %v797_v50 = vpack.c.bf16 %v564_v49, %v563_v46 }
 0x15a   : > { %578 = vst [vmem:[%s253_s17 + $0x8] sm:$0xff] %v797_v50 }
 0x15f   : > { %v621_v51 = vld [vmem:[%s253_s17] sm:$0xff] }
 0x160   : > { %622 = vst [vmem:[%s591_s29] sm:$0xff] %v621_v51 }
 0x161   : > { %v623_v52 = vld [vmem:[%s253_s17 + $0x8] sm:$0xff] }
 0x162   : > { %624 = vst [vmem:[%s591_s29 + $0x18] sm:$0xff] %v623_v52 }
 0x163 PF: > { %s16_s21 = sadd.s32 1, %s1052_s21   ;;  %s1307_s12 = smov %s1020_s13 }
 0x164   : > { %p13_p10 = scmp.ge.s32.totalorder %s16_s21, 8   ;;  %s1308_s13 = smov %s1158_s6 }
 0x165   : > { %s1309_s14 = smov %s1028_s15  ;;  %s1310_s15 = smov %s1032_s16 }
 0x166   : > { %s1311_s16 = smov %s1146_s28  ;;  %s1312_s17 = smov %s1044_s19 }
 0x167   : > { %s1313_s18 = smov %s1048_s20  ;;  %s1314_s19 = smov %s1317_s23 }
 0x168   : > { %s1315_s20 = smov %s1321_s24  ;;  %15 = sbr.rel (!%p13_p10) target bundleno = 6 (0x6), region = 124 }
 0x16f   :  { %640 = vsyncpa [#allocation4], 1 }
 0x170   :  { %642 = vsyncpa [#allocation4 + $0x1], 1 }

// kernel: bert_base_uncased_forward.15
= control target key start
LH: loop header
LB: loop body
LE: loop exit
PB: predicated region body
PF: predicated region fallthrough
CT: control target
= control target key end

     0   :  { %s1013_s21 = smov 0   ;;  %s1015_s22 = smov 0   ;;  %s1163_s0 = inlined_call_operand.vmem [shape: bf16[32,256], index: 0, kind: input, shape index: {}]   ;;  %s1164_s1 = inlined_call_operand.vmem [shape: bf16[256,256], index: 1, kind: input, shape index: {}]   ;;  %s1165_s2 = inlined_call_operand.vmem [shape: f32[1,256], index: 2, kind: input, shape index: {}]   ;;  %s1166_s3 = inlined_call_operand.vmem [shape: bf16[32,256], index: 3, kind: input, shape index: {}]   ;;  %s1167_s4 = inlined_call_operand.vmem [shape: f32[1,256], index: 4, kind: input, shape index: {}]   ;;  %s1168_s5 = inlined_call_operand.vmem [shape: f32[1,256], index: 5, kind: input, shape index: {}]   ;;  %s1169_s6 = inlined_call_operand.vmem [shape: bf16[32,256], index: 6, kind: output, shape index: {}]  }
   0x1   :  { %s1017_s23 = smov 0  }
   0x2 LB: > { %s28_s24 = sadd.s32 1, %s972_s22  ;;  %p822_p0 = scmp.ge.s32.totalorder %s976_s23, 1  ;;  %s976_s23 = sphi %s1017_s23, %s16_s23   ;;  %s972_s22 = sphi %s1015_s22, %s1171_s22   ;;  %s968_s21 = sphi %s1013_s21, %s1170_s21  }
   0x3   : > { %p30_p1 = scmp.ge.s32.totalorder %s28_s24, 2  ;;  %p257_p2 = scmp.lt.s32.totalorder %s976_s23, 3 }
   0x5   : > { %s1173_s24 = smov (%p30_p1, %s28_s24), 0  ;;  %p258_p3 = pnand %p822_p0, %p257_p2 }
   0x6   : > { %v899_v0 = vld [vmem:[%s1164_s1 + $0x4] ss:$8 sps:$4 sm:$0xff] (!%p258_p3)   ;;  %v901_v1 = vld [vmem:[%s1164_s1] ss:$8 sps:$4 sm:$0xff] (!%p258_p3)   ;;  %v902_v2 = vld [vmem:[%s1164_s1 + $0x14] ss:$8 sps:$4 sm:$0xff] (!%p258_p3)   ;;  %v614_v34 = vlaneseq (!%p258_p3) }
   0x7   : > { %261 = sbr.rel (%p258_p3) target bundleno = 610 (0x262), region = 44  ;;  %554 = vmatprep.subr.bf16.mxu0 (!%p258_p3), %v899_v0  ;;  %v904_v3 = vld [vmem:[%s1164_s1 + $0x10] ss:$8 sps:$4 sm:$0xff] (!%p258_p3)   ;;  %v905_v4 = vld [vmem:[%s1164_s1 + $0x24] ss:$8 sps:$4 sm:$0xff] (!%p258_p3)   ;;  %s823_s11 = sshll.u32 (!%p258_p3), %s968_s21, 1 }
   0x8   : > { %555 = vmatpush1.bf16.msra.mxu0 (!%p258_p3), %v901_v1  ;;  %v907_v5 = vld [vmem:[%s1164_s1 + $0x20] ss:$8 sps:$4 sm:$0xff] (!%p258_p3)   ;;  %v908_v6 = vld [vmem:[%s1164_s1 + $0x34] ss:$8 sps:$4 sm:$0xff] (!%p258_p3)   ;;  %p307_p4 = scmp.lt.s32.totalorder (!%p258_p3), %s823_s11, 3  ;;  %v615_v35 = vshrl.u32 (!%p258_p3), %v614_v34, 7 }
   0x9   : > { %556 = vmatprep.subr.bf16.mxu0 (!%p258_p3), %v902_v2  ;;  %v910_v7 = vld [vmem:[%s1164_s1 + $0x30] ss:$8 sps:$4 sm:$0xff] (!%p258_p3)   ;;  %v911_v8 = vld [vmem:[%s1164_s1 + $0x44] ss:$8 sps:$4 sm:$0xff] (!%p258_p3)   ;;  %v913_v9 = vld [vmem:[%s1164_s1 + $0x40] ss:$8 sps:$4 sm:$0xff] (!%p258_p3)  }
   0xa   : > { %v914_v10 = vld [vmem:[%s1164_s1 + $0x54] ss:$8 sps:$4 sm:$0xff] (!%p258_p3)   ;;  %v916_v11 = vld [vmem:[%s1164_s1 + $0x50] ss:$8 sps:$4 sm:$0xff] (!%p258_p3)   ;;  %v917_v12 = vld [vmem:[%s1164_s1 + $0x64] ss:$8 sps:$4 sm:$0xff] (!%p258_p3)  }
   0xb   : > { %v919_v14 = vld [vmem:[%s1164_s1 + $0x60] ss:$8 sps:$4 sm:$0xff] (!%p258_p3)   ;;  %v920_v15 = vld [vmem:[%s1164_s1 + $0x74] ss:$8 sps:$4 sm:$0xff] (!%p258_p3)   ;;  %v922_v16 = vld [vmem:[%s1164_s1 + $0x70] ss:$8 sps:$4 sm:$0xff] (!%p258_p3)  }
   0xc   : > { %557 = vmatpush1.bf16.msra.mxu0 (!%p258_p3), %v904_v3  ;;  %v923_v17 = vld [vmem:[%s1164_s1 + $0x84] ss:$8 sps:$4 sm:$0xff] (!%p258_p3)   ;;  %v925_v18 = vld [vmem:[%s1164_s1 + $0x80] ss:$8 sps:$4 sm:$0xff] (!%p258_p3)   ;;  %v926_v19 = vld [vmem:[%s1164_s1 + $0x94] ss:$8 sps:$4 sm:$0xff] (!%p258_p3)  }
   0xd   : > { %558 = vmatprep.subr.bf16.mxu0 (!%p258_p3), %v905_v4  ;;  %v928_v20 = vld [vmem:[%s1164_s1 + $0x90] ss:$8 sps:$4 sm:$0xff] (!%p258_p3)   ;;  %v929_v21 = vld [vmem:[%s1164_s1 + $0xa4] ss:$8 sps:$4 sm:$0xff] (!%p258_p3)   ;;  %v931_v22 = vld [vmem:[%s1164_s1 + $0xa0] ss:$8 sps:$4 sm:$0xff] (!%p258_p3)  }
   0xe   : > { %s1175_s11 = smov (!%p307_p4, %s823_s11), 3  ;;  %v932_v23 = vld [vmem:[%s1164_s1 + $0xb4] ss:$8 sps:$4 sm:$0xff]   ;;  %v934_v24 = vld [vmem:[%s1164_s1 + $0xb0] ss:$8 sps:$4 sm:$0xff]   ;;  %v616_v36 = vsub.s32 0, %v615_v35 }
   0xf   : > { %s1064_s27 = sshll.u32 %s1175_s11, 3  ;;  %v935_v25 = vld [vmem:[%s1164_s1 + $0xc4] ss:$8 sps:$4 sm:$0xff]   ;;  %v937_v26 = vld [vmem:[%s1164_s1 + $0xc0] ss:$8 sps:$4 sm:$0xff]   ;;  %v620_v38 = vsub.s32 1, %v615_v35 }
  0x10   : > { %559 = vmatpush1.bf16.msra.mxu0 %v907_v5  ;;  %s1073_s8 = scalar_lea.vmem %s1163_s0, %s1064_s27  ;;  %v938_v27 = vld [vmem:[%s1164_s1 + $0xd4] ss:$8 sps:$4 sm:$0xff]   ;;  %v940_v28 = vld [vmem:[%s1164_s1 + $0xd0] ss:$8 sps:$4 sm:$0xff]   ;;  %v941_v29 = vld [vmem:[%s1164_s1 + $0xe4] ss:$8 sps:$4 sm:$0xff]   ;;  %s329_s13 = scalar_lea.vmem %s1166_s3, %s1064_s27 }
  0x11   : > { %560 = vmatprep.subr.bf16.mxu0 %v908_v6  ;;  %v949_v13 = vld [vmem:[%s1073_s8 + $0x4] ss:$8 sps:$4 sm:$0xff]   ;;  %v943_v30 = vld [vmem:[%s1164_s1 + $0xe0] ss:$8 sps:$4 sm:$0xff]   ;;  %v944_v31 = vld [vmem:[%s1164_s1 + $0xf4] ss:$8 sps:$4 sm:$0xff]   ;;  %s336_s21 = scalar_lea.vmem %s1169_s6, %s1064_s27 }
  0x12   : > { %586 = vmatprep.mubr.bf16.mxu0 %v949_v13  ;;  %v946_v32 = vld [vmem:[%s1164_s1 + $0xf0] ss:$8 sps:$4 sm:$0xff]   ;;  %v947_v33 = vld [vmem:[%s1073_s8] ss:$8 sps:$4 sm:$0xff]  }
  0x13   : > { %v612_v37 = vld [vmem:[%s1165_s2] sm:$0x3]  ;;  %v629_v42 = vld [vmem:[%s329_s13 + $0x8] sm:$0xff] }
  0x14   : > { %561 = vmatpush1.bf16.msra.mxu0 %v910_v7  ;;  %v628_v39 = vld [vmem:[%s329_s13] sm:$0xff]  ;;  %v617_v40 = vrot.slane %v612_v37, %v616_v36  ;;  %v621_v41 = vrot.slane %v612_v37, %v620_v38  ;;  %v632_v50 = vunpack.c.l.bf16 %v629_v42  ;;  %v633_v51 = vunpack.c.h.bf16 %v629_v42 }
  0x15   : > { %562 = vmatprep.subr.bf16.mxu0 %v911_v8  ;;  %v630_v43 = vunpack.c.l.bf16 %v628_v39  ;;  %v631_v45 = vunpack.c.h.bf16 %v628_v39 }
  0x18   : > { %563 = vmatpush1.bf16.msra.mxu0 %v913_v9 }
  0x19   : > { %564 = vmatprep.subr.bf16.mxu0 %v914_v10 }
  0x1c   : > { %565 = vmatpush1.bf16.msra.mxu0 %v916_v11 }
  0x1d   : > { %566 = vmatprep.subr.bf16.mxu0 %v917_v12 }
  0x20   : > { %567 = vmatpush1.bf16.msra.mxu0 %v919_v14 }
  0x21   : > { %568 = vmatprep.subr.bf16.mxu0 %v920_v15 }
  0x24   : > { %569 = vmatpush1.bf16.msra.mxu0 %v922_v16 }
  0x25   : > { %570 = vmatprep.subr.bf16.mxu0 %v923_v17  ;;  %v671_v17 = vld [vmem:[%s1167_s4] sm:$0x3] }
  0x28   : > { %571 = vmatpush1.bf16.msra.mxu0 %v925_v18  ;;  %v687_v18 = vld [vmem:[%s1168_s5] sm:$0x3] }
  0x29   : > { %572 = vmatprep.subr.bf16.mxu0 %v926_v19  ;;  %v676_v19 = vrot.slane %v671_v17, %v616_v36 }
  0x2c   : > { %573 = vmatpush1.bf16.msra.mxu0 %v928_v20  ;;  %v680_v20 = vrot.slane %v671_v17, %v620_v38 }
  0x2d   : > { %574 = vmatprep.subr.bf16.mxu0 %v929_v21 }
  0x30   : > { %575 = vmatpush1.bf16.msra.mxu0 %v931_v22  ;;  %v692_v22 = vrot.slane %v687_v18, %v616_v36 }
  0x31   : > { %576 = vmatprep.subr.bf16.mxu0 %v932_v23  ;;  %v696_v23 = vrot.slane %v687_v18, %v620_v38 }
  0x34   : > { %577 = vmatpush1.bf16.msra.mxu0 %v934_v24 }
  0x35   : > { %578 = vmatprep.subr.bf16.mxu0 %v935_v25 }
  0x38   : > { %579 = vmatpush1.bf16.msra.mxu0 %v937_v26 }
  0x39   : > { %580 = vmatprep.subr.bf16.mxu0 %v938_v27 }
  0x3c   : > { %581 = vmatpush1.bf16.msra.mxu0 %v940_v28 }
  0x3d   : > { %582 = vmatprep.subr.bf16.mxu0 %v941_v29 }
  0x40   : > { %583 = vmatpush1.bf16.msra.mxu0 %v943_v30 }
  0x41   : > { %584 = vmatprep.subr.bf16.mxu0 %v944_v31 }
  0x44   : > { %585 = vmatpush1.bf16.msra.mxu0 %v946_v32 }
  0x47   : > { %587 = vmatmul.mubr.bf16.vlgmr.msra.gmra.mrb[0].mxu0 %v947_v33 }
 0x11a   : > { %v588_v44 = vpop.f32.mrb[0].mxu0 }
 0x11b   : > { %v624_v46 = vadd.f32 %v617_v40, %v588_v44  ;;  %v590_v47 = vpop.f32.mrb[1].mxu0 }
 0x11c   : > { %v625_v48 = vadd.f32 %v621_v41, %v590_v47  ;;  %v592_v49 = vpop.f32.mrb[2].mxu0 }
 0x11d   : > { %v626_v52 = vadd.f32 %v617_v40, %v592_v49  ;;  %v594_v53 = vpop.f32.mrb[3].mxu0  ;;  %v634_v54 = vadd.f32 %v630_v43, %v624_v46 }
 0x11e   : > { %v627_v55 = vadd.f32 %v621_v41, %v594_v53  ;;  %v635_v56 = vadd.f32 %v631_v45, %v625_v48 }
 0x11f   : > { %v636_v57 = vadd.f32 %v632_v50, %v626_v52 }
 0x120   : > { %v637_v58 = vadd.f32 %v633_v51, %v627_v55  ;;  %v638_v59 = vadd.f32 %v635_v56, %v634_v54 }
 0x122   : > { %639 = vadd.xlane.f32.xlu0 %v638_v59  ;;  %v641_v60 = vadd.f32 %v637_v58, %v636_v57 }
 0x126   : > { %642 = vadd.xlane.f32.xlu0 %v641_v60 }
 0x1af   : > { %v640_v61 = vpop.xlane.xlu0 %639 }
 0x1b0   : > { %v645_v62 = vmul.f32 0.00390625, %v640_v61 }
 0x1b2   : > { %v647_v63 = vsub.f32 %v634_v54, %v645_v62  ;;  %v648_v0 = vsub.f32 %v635_v56, %v645_v62 }
 0x1b3   : > { %v643_v1 = vpop.xlane.xlu0 %642 }
 0x1b4   : > { %v646_v2 = vmul.f32 0.00390625, %v643_v1  ;;  %v651_v3 = vmul.f32 %v647_v63, %v647_v63  ;;  %v652_v4 = vmul.f32 %v648_v0, %v648_v0 }
 0x1b6   : > { %v649_v5 = vsub.f32 %v636_v57, %v646_v2  ;;  %v650_v6 = vsub.f32 %v637_v58, %v646_v2  ;;  %v655_v7 = vadd.f32 %v652_v4, %v651_v3 }
 0x1b8   : > { %656 = vadd.xlane.f32.xlu1 %v655_v7  ;;  %v653_v8 = vmul.f32 %v649_v5, %v649_v5  ;;  %v654_v9 = vmul.f32 %v650_v6, %v650_v6 }
 0x1ba   : > { %v658_v10 = vadd.f32 %v654_v9, %v653_v8 }
 0x1bc   : > { %659 = vadd.xlane.f32.xlu1 %v658_v10 }
 0x245   : > { %v657_v11 = vpop.xlane.xlu1 %656 }
 0x246   : > { %v661_v12 = vmul.f32 0.00390625, %v657_v11 }
 0x248   : > { %v663_v13 = vadd.f32 1e-12, %v661_v12 }
 0x249   : > { %v660_v14 = vpop.xlane.xlu1 %659 }
 0x24a   : > { %950 = vrsqrt.f32 %v663_v13  ;;  %v662_v15 = vmul.f32 0.00390625, %v660_v14 }
 0x24c   : > { %v664_v16 = vadd.f32 1e-12, %v662_v15 }
 0x24e   : > { %952 = vrsqrt.f32 %v664_v16 }
 0x254   : > { %v951_v21 = vpop.eup %950 }
 0x255   : > { %v667_v24 = vmul.f32 %v951_v21, %v647_v63  ;;  %v668_v25 = vmul.f32 %v951_v21, %v648_v0 }
 0x257   : > { %v683_v26 = vmul.f32 %v676_v19, %v667_v24  ;;  %v684_v27 = vmul.f32 %v680_v20, %v668_v25 }
 0x258   : > { %v953_v28 = vpop.eup %952 }
 0x259   : > { %v699_v29 = vadd.f32 %v692_v22, %v683_v26  ;;  %v700_v30 = vadd.f32 %v696_v23, %v684_v27  ;;  %v669_v31 = vmul.f32 %v953_v28, %v649_v5  ;;  %v670_v32 = vmul.f32 %v953_v28, %v650_v6 }
 0x25b   : > { %v873_v33 = vpack.c.bf16 %v700_v30, %v699_v29  ;;  %v685_v34 = vmul.f32 %v676_v19, %v669_v31  ;;  %v686_v35 = vmul.f32 %v680_v20, %v670_v32 }
 0x25d   : > { %715 = vst [vmem:[%s336_s21] sm:$0xff] %v873_v33  ;;  %v701_v37 = vadd.f32 %v692_v22, %v685_v34  ;;  %v702_v36 = vadd.f32 %v696_v23, %v686_v35 }
 0x25f   : > { %v874_v38 = vpack.c.bf16 %v702_v36, %v701_v37 }
 0x261   : > { %716 = vst [vmem:[%s336_s21 + $0x8] sm:$0xff] %v874_v38 }
 0x262 PF: > { %s16_s23 = sadd.s32 1, %s976_s23   ;;  %s1170_s21 = smov %s972_s22 }
 0x263   : > { %p13_p5 = scmp.ge.s32.totalorder %s16_s23, 4   ;;  %s1171_s22 = smov %s1173_s24 }
 0x265   :  { %15 = sbr.rel (!%p13_p5) target bundleno = 2 (0x2), region = 88 }

// kernel: bert_base_uncased_forward.14
= control target key start
LH: loop header
LB: loop body
LE: loop exit
PB: predicated region body
PF: predicated region fallthrough
CT: control target
= control target key end

     0   :  { %s1383_s0 = inlined_call_operand.vmem [shape: bf16[2,16,768], index: 0, kind: input, shape index: {}, may-alias: {0,1,2}]   ;;  %s1384_s1 = inlined_call_operand.vmem [shape: bf16[2,16,768], index: 1, kind: input, shape index: {}, may-alias: {0,1,2}]   ;;  %s1385_s2 = inlined_call_operand.vmem [shape: bf16[2,16,768], index: 2, kind: input, shape index: {}, may-alias: {0,1,2}]   ;;  %s1386_s3 = inlined_call_operand.vmem [shape: f32[2,1,16], index: 3, kind: input, shape index: {}]   ;;  %s1387_s4 = inlined_call_operand.vmem [shape: bf16[2,16,256], index: 4, kind: output, shape index: {}]  }
   0x1   :  { %1390 = sst [smem:[#allocation13_spill]] %s1387_s4 }
   0x2   :  { %s1171_s15 = smov 0   ;;  %s1173_s16 = smov 0  }
   0x3   :  { %s1175_s17 = smov 0   ;;  %s1177_s18 = smov 0  }
   0x4   :  { %s1179_s19 = smov 0   ;;  %s1181_s20 = smov 0  }
   0x5   :  { %s1183_s21 = smov 0   ;;  %s1185_s22 = smov 0  }
   0x6   :  { %s1187_s23 = smov 0   ;;  %s1189_s24 = smov 0  }
   0x7   :  { %s1191_s25 = smov 0  }
   0x8 LB: > { %1391 = sst [smem:[#allocation9_spill]] %s1124_s21  ;;  %s36_s27 = sadd.s32 1, %s1132_s23  ;;  %s1140_s25 = sphi %s1191_s25, %s14_s25   ;;  %s1136_s24 = sphi %s1189_s24, %s1414_s24   ;;  %s1132_s23 = sphi %s1187_s23, %s1413_s23   ;;  %s1128_s22 = sphi %s1185_s22, %s1412_s22   ;;  %s1124_s21 = sphi %s1183_s21, %s1411_s21   ;;  %s1120_s20 = sphi %s1181_s20, %s1410_s20   ;;  %s1116_s19 = sphi %s1179_s19, %s1409_s19   ;;  %s1112_s18 = sphi %s1177_s18, %s1408_s18   ;;  %s1108_s17 = sphi %s1175_s17, %s1407_s17   ;;  %s1104_s16 = sphi %s1173_s16, %s1406_s16   ;;  %s1100_s15 = sphi %s1171_s15, %s1405_s15  }
   0x9   : > { %p38_p0 = scmp.ge.s32.totalorder %s36_s27, 2  ;;  %s40_s28 = sadd.s32 1, %s1136_s24 }
   0xa   : > { %s51_s29 = sadd.s32 1, %s1120_s20  ;;  %p58_p1 = scmp.ne.s32.totalorder %s1120_s20, %s1116_s19 }
   0xb   : > { %s1416_s27 = smov (%p38_p0, %s36_s27), 0  ;;  %s1418_s28 = smov (!%p38_p0, %s40_s28), %s1136_s24 }
   0xc   : > { %1392 = sst [smem:[#allocation10_spill]] %s1416_s27  ;;  %s47_s30 = ssub.s32 %s1132_s23, %s1416_s27 }
   0xd   : > { %p59_p2 = scmp.eq.s32.totalorder %s1140_s25, 0  ;;  %p42_p3 = scmp.ge.s32.totalorder %s1418_s28, 2 }
   0xe   : > { %s74_s5 = sadd.s32 2, %s1132_s23  ;;  %s75_s7 = sadd.s32 2, %s1416_s27 }
   0xf   : > { %p1244_p4 = por %p59_p2, %p58_p1  ;;  %s1420_s28 = smov (%p42_p3, %s1418_s28), 0 }
  0x10   : > { %1394 = sst [smem:[#allocation11_spill]] %s1420_s28  ;;  %s79_s8 = ssub.s32 %s74_s5, %s75_s7 }
  0x11   : > { %s83_s9 = sadd.s32 1, %s1112_s18  ;;  %s44_s10 = ssub.s32 %s1136_s24, %s1420_s28 }
  0x12   : > { %p90_p5 = scmp.ne.s32.totalorder %s1112_s18, %s1108_s17  ;;  %s48_s11 = sor.u32 %s47_s30, %s44_s10 }
  0x13   : > { %s80_s12 = sor.u32 %s79_s8, %s44_s10  ;;  %p49_p6 = scmp.eq.s32.totalorder %s48_s11, 0 }
  0x14   : > { %p81_p7 = scmp.eq.s32.totalorder %s80_s12, 0  ;;  %p1258_p8 = por %p90_p5, %p59_p2 }
  0x15   : > { %s106_s14 = sadd.s32 4, %s1132_s23  ;;  %s107_s7 = sadd.s32 4, %s1416_s27 }
  0x16   : > { %s1264_s26 = scalar_select %p49_p6, %s1120_s20, %s51_s29  }
  0x17   : > { %s1267_s5 = scalar_select %p81_p7, %s1112_s18, %s83_s9  }
  0x18   : > { %1396 = sst [smem:[#allocation12_spill]] %s1264_s26  ;;  %s115_s28 = sadd.s32 1, %s1104_s16 }
  0x19   : > { %s111_s4 = ssub.s32 %s106_s14, %s107_s7  ;;  %p122_p9 = scmp.ne.s32.totalorder %s1104_s16, %s1100_s15 }
  0x1a   : > { %s112_s30 = sor.u32 %s111_s4, %s44_s10  ;;  %s1397_s21 = sadd.s32 4294967295, %s1140_s25  }
  0x1b   : > { %p184_p10 = scmp.eq.s32.totalorder %s1397_s21, 3  ;;  %p113_p11 = scmp.eq.s32.totalorder %s112_s30, 0 }
  0x1c   : > { %p1277_p12 = por %p122_p9, %p59_p2  ;;  %p893_p0 = scmp.ge.s32.totalorder %s1140_s25, 4 }
  0x1d   : > { %p1284_p13 = por %p184_p10, %p58_p1 }
  0x1e   : > { %s1289_s29 = scalar_select %p113_p11, %s1104_s16, %s115_s28  }
  0x1f   : > { %206 = sbr.rel (%p893_p0) target bundleno = 62 (0x3e), region = 16 }
  0x26   : > { %209 = sbr.rel (!%p1244_p4) target bundleno = 46 (0x2e), region = 20  ;;  %s211_s4 = sand.u32 (%p1244_p4), 1, %s1120_s20  }
  0x27   : > { %s944_s21 = smul.u32 (%p1244_p4), 12, %s1136_s24  ;;  %s894_s9 = sshll.u32 (%p1244_p4), %s211_s4, 3 }
  0x28   : > { %s213_s28 = scalar_lea.vmem (%p1244_p4), [#allocation5], %s894_s9 }
  0x29   : > { %s218_s10 = sadd.s32 (%p1244_p4), %s1132_s23, %s944_s21 }
  0x2a   : > { %s895_s12 = sshll.u32 (%p1244_p4), %s218_s10, 2 }
  0x2b   : > { %s220_s30 = scalar_lea.vmem (%p1244_p4), %s1383_s0, %s895_s12 }
  0x2c   : > { %v236_v0 = vld [vmem:[%s220_s30] sm:$0xf] (%p1244_p4)  ;;  %v238_v1 = vld [vmem:[%s220_s30 + $0x18] sm:$0xf] (%p1244_p4) }
  0x2d   : > { %237 = vst [vmem:[%s213_s28] sm:$0xf] %v236_v0  ;;  %239 = vst [vmem:[%s213_s28 + $0x4] sm:$0xf] %v238_v1 }
  0x2e PF: > { %266 = sbr.rel (!%p1258_p8) target bundleno = 54 (0x36), region = 61  ;;  %s268_s6 = sand.u32 (%p1258_p8), 1, %s1112_s18  }
  0x2f   : > { %s774_s4 = smul.u32 (%p1258_p8), 12, %s1136_s24  ;;  %s896_s21 = sshll.u32 (%p1258_p8), %s268_s6, 3 }
  0x30   : > { %s270_s9 = scalar_lea.vmem (%p1258_p8), [#allocation6], %s896_s21 }
  0x31   : > { %s775_s10 = sadd.s32 (%p1258_p8), %s1132_s23, %s774_s4 }
  0x32   : > { %s897_s27 = sshll.u32 (%p1258_p8), %s775_s10, 2 }
  0x33   : > { %s777_s12 = scalar_lea.vmem (%p1258_p8), %s1384_s1, %s897_s27 }
  0x34   : > { %v898_v2 = vld [vmem:[%s777_s12 + $0x8] sm:$0xf] (%p1258_p8)  ;;  %v899_v3 = vld [vmem:[%s777_s12 + $0x20] sm:$0xf] (%p1258_p8) }
  0x35   : > { %295 = vst [vmem:[%s270_s9] sm:$0xf] %v898_v2  ;;  %297 = vst [vmem:[%s270_s9 + $0x4] sm:$0xf] %v899_v3 }
  0x36 PF: > { %324 = sbr.rel (!%p1277_p12) target bundleno = 62 (0x3e), region = 102  ;;  %s326_s13 = sand.u32 (%p1277_p12), 1, %s1104_s16  }
  0x37   : > { %s783_s7 = smul.u32 (%p1277_p12), 12, %s1136_s24  ;;  %s900_s30 = sshll.u32 (%p1277_p12), %s326_s13, 3 }
  0x38   : > { %s328_s21 = scalar_lea.vmem (%p1277_p12), [#allocation7], %s900_s30 }
  0x39   : > { %s784_s28 = sadd.s32 (%p1277_p12), %s1132_s23, %s783_s7 }
  0x3a   : > { %s901_s6 = sshll.u32 (%p1277_p12), %s784_s28, 2 }
  0x3b   : > { %s786_s27 = scalar_lea.vmem (%p1277_p12), %s1385_s2, %s901_s6 }
  0x3c   : > { %v902_v4 = vld [vmem:[%s786_s27 + $0x10] sm:$0xf] (%p1277_p12)  ;;  %v903_v5 = vld [vmem:[%s786_s27 + $0x28] sm:$0xf] (%p1277_p12) }
  0x3d   : > { %353 = vst [vmem:[%s328_s21] sm:$0xf] %v902_v4  ;;  %355 = vst [vmem:[%s328_s21 + $0x4] sm:$0xf] %v903_v5 }
  0x3e PF: > { %p904_p1 = scmp.ge.s32.totalorder %s1140_s25, 1  ;;  %p390_p2 = scmp.lt.s32.totalorder %s1140_s25, 5 }
  0x40   : > { %p391_p3 = pnand %p904_p1, %p390_p2 }
  0x41   : > { %s404_s8 = sand.u32 (!%p391_p3), 1, %s1108_s17   ;;  %s397_s10 = sand.u32 (!%p391_p3), 1, %s1116_s19   ;;  %v1142_v6 = vmov (!%p391_p3), 0.0   ;;  %vm1143_vm0 = vmmov (!%p391_p3), 0   ;;  %vm466_vm1 = vcmask (!%p391_p3), 7168   ;;  %v1144_v9 = vmov (!%p391_p3), -inf  }
  0x42   : > { %394 = sbr.rel (%p391_p3) target bundleno = 889 (0x379), region = 147  ;;  %932 = vmatprep.subr.bf16.mxu0 (!%p391_p3), %v1142_v6  ;;  %s906_s14 = sshll.u32 (!%p391_p3), %s404_s8, 3  ;;  %934 = vmatprep.mubr.msk.bf16.mxu0 (!%p391_p3), %vm1143_vm0, %v1142_v6  ;;  %467 = vst.msk [vmem:[#allocation2] sm:$0xff] (!%p391_p3), %vm466_vm1, %v1144_v9  ;;  %468 = vst.msk [vmem:[#allocation2 + $0x8] sm:$0xff] (!%p391_p3), %vm466_vm1, %v1144_v9  ;;  %vm545_vm2 = vcmask (!%p391_p3), 130048   ;;  %v1145_v21 = vmov (!%p391_p3), 0  }
  0x43   : > { %s1320_s12 = sshll.u32 (!%p391_p3), %s397_s10, 3  ;;  %938 = vmatprep.subr.bf16.mxu1 (!%p391_p3), %v1142_v6  ;;  %940 = vmatprep.mubr.msk.bf16.mxu1 (!%p391_p3), %vm1143_vm0, %v1142_v6  ;;  %s406_s9 = scalar_lea.vmem (!%p391_p3), [#allocation6], %s906_s14  ;;  %469 = vst.msk [vmem:[#allocation3] sm:$0xff] (!%p391_p3), %vm466_vm1, %v1142_v6  ;;  %470 = vst.msk [vmem:[#allocation3 + $0x8] sm:$0xff] (!%p391_p3), %vm466_vm1, %v1142_v6 }
  0x44   : > { %v1039_v7 = vld [vmem:[%s406_s9] sm:$0xff] (!%p391_p3)   ;;  %s399_s13 = scalar_lea.vmem (!%p391_p3), [#allocation5], %s1320_s12  ;;  %p454_p4 = scmp.lt.s32.totalorder (!%p391_p3), %s1128_s22, 1  ;;  %1037 = vset.pattern.permute.xlu1 (!%p391_p3), %v1145_v21  ;;  %1038 = vset.pattern.permute.xlu0 (!%p391_p3), %v1145_v21 }
  0x45   : > { %933 = vmatpush3.bf16.xpose.msra.mxu0 (!%p391_p3), %v1039_v7  ;;  %v1040_v8 = vld [vmem:[%s399_s13] sm:$0xff] (!%p391_p3)   ;;  %s411_s28 = sand.u32 (!%p391_p3), 1, %s1100_s15   ;;  %s448_s15 = scalar_lea.vmem (!%p391_p3), [#allocation8], %s1320_s12 }
  0x46   : > { %s907_s6 = sshll.u32 (!%p391_p3), %s411_s28, 3 }
  0x47   : > { %s413_s4 = scalar_lea.vmem (!%p391_p3), [#allocation7], %s907_s6 }
  0x48   : > { %v1041_v30 = vld [vmem:[%s413_s4] sm:$0xff] (!%p391_p3)  }
  0x49   : > { %s455_s17 = scalar_select %p454_p4, %s1128_s22, 1  ;;  %v543_v22 = vld [vmem:[#allocation2] sm:$0xff]  ;;  %v544_v25 = vld [vmem:[#allocation2 + $0x8] sm:$0xff]  ;;  %939 = vmatpush3.bf16.msra.mxu1 %v1041_v30 }
  0x4a   : > { %v576_v46 = vld [vmem:[#allocation3] sm:$0xff]  ;;  %v577_v49 = vld [vmem:[#allocation3 + $0x8] sm:$0xff]  ;;  %s1400_s26 = sld [smem:[#allocation9_spill]] (%p1284_p13)  ;;  %s917_s27 = sshll.u32 (%p1284_p13), %s1128_s22, 2 }
  0x4b   : > { %s459_s30 = scalar_lea.vmem %s1386_s3, %s455_s17  ;;  %s1401_s9 = sld [smem:[#allocation13_spill]] (%p1284_p13) }
  0x4c   : > { %935 = vmatmul.mubr.bf16.vlgmr.msra.gmra.mrb[0].mxu0 %v1040_v8  ;;  %v911_v11 = vld [vmem:[%s459_s30] ss:$0 sm:$0xff] }
  0x50   : > { %s704_s21 = sadd.s32 (%p1284_p13), %s1400_s26, %s917_s27 }
  0x51   : > { %s918_s8 = sshll.u32 (%p1284_p13), %s704_s21, 2 }
  0x52   : > { %s706_s13 = scalar_lea.vmem (%p1284_p13), %s1401_s9, %s918_s8 }
 0x11f   : > { %v525_v10 = vpop.f32.mrb[0].mxu0 }
 0x120   : > { %v532_v12 = vmul.f32 0.088388346, %v525_v10  ;;  %v936_v13 = vpop.f32.mrb[1].mxu0 }
 0x121   : > { %v528_v14 = vpop.f32.mrb[2].mxu0 }
 0x122   : > { %v533_v15 = vmul.f32 0.088388346, %v528_v14  ;;  %v937_v16 = vpop.f32.mrb[3].mxu0  ;;  %v541_v17 = vadd.f32 %v911_v11, %v532_v12 }
 0x124   : > { %v546_v18 = vsel %vm545_vm2, %v541_v17, -inf  ;;  %v542_v19 = vadd.f32 %v911_v11, %v533_v15 }
 0x125   : > { %547 = vmax.xlane.f32.xlu0 %v546_v18 }
 0x126   : > { %v549_v20 = vsel %vm545_vm2, %v542_v19, -inf }
 0x129   : > { %550 = vmax.xlane.f32.xlu0 %v549_v20 }
 0x1b2   : > { %v548_v23 = vpop.xlane.xlu0 %547 }
 0x1b3   : > { %v552_v24 = vmax.f32 %v543_v22, %v548_v23 }
 0x1b5   : > { %v554_v26 = vsub.f32 %v543_v22, %v552_v24  ;;  %660 = vst.msk [vmem:[#allocation2] sm:$0xff] %vm466_vm1, %v552_v24  ;;  %562 = vperm.xlu1 %1037, %v552_v24  }
 0x1b6   : > { %v551_v27 = vpop.xlane.xlu0 %550 }
 0x1b7   : > { %v553_v28 = vmax.f32 %v544_v25, %v551_v27  ;;  %v556_v43 = vmul.f32 1.442695, %v554_v26 }
 0x1b9   : > { %v555_v29 = vsub.f32 %v544_v25, %v553_v28  ;;  %661 = vst.msk [vmem:[#allocation2 + $0x8] sm:$0xff] %vm466_vm1, %v553_v28  ;;  %567 = vperm.xlu1 %1037, %v553_v28  }
 0x1bb   : > { %v558_v42 = vmul.f32 1.442695, %v555_v29 }
 0x234   : > { %v563_v31 = vpop.permute.xlu1 %562 }
 0x235   : > { %v570_v32 = vsub.f32 %v541_v17, %v563_v31 }
 0x237   : > { %v572_v33 = vmul.f32 1.442695, %v570_v32 }
 0x238   : > { %v568_v34 = vpop.permute.xlu1 %567 }
 0x239   : > { %1042 = vpow2.f32 %v572_v33  ;;  %v571_v35 = vsub.f32 %v542_v19, %v568_v34 }
 0x23b   : > { %v574_v36 = vmul.f32 1.442695, %v571_v35 }
 0x23d   : > { %1044 = vpow2.f32 %v574_v36 }
 0x23e   : > { %1046 = vpow2.f32 %v558_v42 }
 0x23f   : > { %1048 = vpow2.f32 %v556_v43 }
 0x243   : > { %v1043_v37 = vpop.eup %1042 }
 0x244   : > { %v580_v38 = vsel %vm545_vm2, %v1043_v37, 0.0 }
 0x245   : > { %581 = vadd.xlane.f32.xlu0 %v580_v38 }
 0x247   : > { %v1045_v39 = vpop.eup %1044 }
 0x248   : > { %v583_v40 = vsel %vm545_vm2, %v1045_v39, 0.0  ;;  %v605_v41 = vpack.c.bf16 %v1045_v39, %v1043_v37  ;;  %v1047_v44 = vpop.eup %1046 }
 0x249   : > { %584 = vadd.xlane.f32.xlu1 %v583_v40  ;;  %v1049_v45 = vpop.eup %1048  ;;  %v579_v51 = vmul.f32 %v1047_v44, %v577_v49 }
 0x24a   : > { %941 = vmatmul.mubr.msk.bf16.vlgmr.msra.gmra.mrb[0].mxu1 %vm545_vm2, %v605_v41  ;;  %v578_v47 = vmul.f32 %v1049_v45, %v576_v46 }
 0x25a   : > { %600 = vperm.xlu1 %1037, %v1047_v44  }
 0x25b   : > { %595 = vperm.xlu0 %1038, %v1049_v45  }
 0x2d2   : > { %v582_v48 = vpop.xlane.xlu0 %581 }
 0x2d3   : > { %v586_v50 = vadd.f32 %v582_v48, %v578_v47 }
 0x2d5   : > { %589 = vst.msk [vmem:[#allocation3] sm:$0xff] %vm466_vm1, %v586_v50 }
 0x2d6   : > { %v585_v52 = vpop.xlane.xlu1 %584 }
 0x2d7   : > { %v587_v53 = vadd.f32 %v585_v52, %v579_v51 }
 0x2d9   : > { %590 = vst.msk [vmem:[#allocation3 + $0x8] sm:$0xff] %vm466_vm1, %v587_v53 }
 0x2da   : > { %v596_v62 = vpop.permute.xlu0 %595  ;;  %v601_v63 = vpop.permute.xlu1 %600 }
 0x2db   : > { %v604_v1 = vmul.f32 0.0, %v601_v63  ;;  %v603_v2 = vmul.f32 0.0, %v596_v62 }
 0x2dc   : > { %v667_v54 = vld [vmem:[#allocation3] sm:$0xff] }
 0x2dd   : > { %1050 = vrcp.f32 %v667_v54 }
 0x2e0   : > { %v668_v55 = vld [vmem:[#allocation3 + $0x8] sm:$0xff] }
 0x2e1   : > { %1052 = vrcp.f32 %v668_v55 }
 0x2e7   : > { %v1051_v56 = vpop.eup %1050 }
 0x2e8   : > { %673 = vperm.xlu0 %1038, %v1051_v56  }
 0x2eb   : > { %v1053_v57 = vpop.eup %1052 }
 0x2ec   : > { %678 = vperm.xlu0 %1038, %v1053_v57  }
 0x31d   : > { %v649_v58 = vpop.f32.mrb[0].mxu1 }
 0x31e   : > { %v942_v59 = vpop.f32.mrb[1].mxu1  ;;  %v656_v3 = vadd.f32 %v649_v58, %v603_v2 }
 0x31f   : > { %v652_v60 = vpop.f32.mrb[2].mxu1 }
 0x320   : > { %v943_v61 = vpop.f32.mrb[3].mxu1  ;;  %v657_v4 = vadd.f32 %v652_v60, %v604_v1 }
 0x367   : > { %v674_v0 = vpop.permute.xlu0 %673 }
 0x368   : > { %v681_v6 = vmul.f32 %v674_v0, %v656_v3 }
 0x36a   : > { %699 = sbr.rel (!%p1284_p13) target bundleno = 889 (0x379), region = 171 }
 0x36b   : > { %v679_v5 = vpop.permute.xlu0 %678 }
 0x36c   : > { %v682_v7 = vmul.f32 %v679_v5, %v657_v4 }
 0x36e   : > { %v926_v8 = vpack.c.bf16 %v682_v7, %v681_v6 }
 0x370   : > { %927 = vst [vmem:[%s448_s15] sm:$0xff] %v926_v8  }
 0x377   : > { %v722_v9 = vld [vmem:[%s448_s15] sm:$0xf]  ;;  %v724_v10 = vld [vmem:[%s448_s15 + $0x4] sm:$0xf] }
 0x378   : > { %723 = vst [vmem:[%s706_s13] sm:$0xf] %v722_v9  ;;  %725 = vst [vmem:[%s706_s13 + $0x8] sm:$0xf] %v724_v10 }
 0x379 PF: > { %s14_s25 = sadd.s32 1, %s1140_s25   ;;  %s1402_s22 = sld [smem:[#allocation12_spill]] }
 0x37a   : > { %p11_p5 = scmp.ge.s32.totalorder %s14_s25, 6   ;;  %s1403_s11 = sld [smem:[#allocation10_spill]] }
 0x37b   : > { %s1404_s12 = sld [smem:[#allocation11_spill]]  ;;  %s1405_s15 = smov %s1104_s16 }
 0x37c   : > { %s1406_s16 = smov %s1289_s29  ;;  %s1407_s17 = smov %s1112_s18 }
 0x37d   : > { %s1408_s18 = smov %s1267_s5  ;;  %s1409_s19 = smov %s1120_s20 }
 0x37e   : > { %s1411_s21 = smov %s1132_s23  ;;  %13 = sbr.rel (!%p11_p5) target bundleno = 8 (0x8), region = 262 }
 0x37f   : > { %s1410_s20 = smov %s1402_s22  ;;  %s1412_s22 = smov %s1136_s24 }
 0x380   : > { %s1413_s23 = smov %s1403_s11 }
 0x381   : > { %s1414_s24 = smov %s1404_s12 }

// kernel: bert_base_uncased_forward.18
= control target key start
LH: loop header
LB: loop body
LE: loop exit
PB: predicated region body
PF: predicated region fallthrough
CT: control target
= control target key end

     0   :  { %s1148_s12 = smov 0   ;;  %s1150_s13 = smov 0   ;;  %s1379_s0 = inlined_call_operand.vmem [shape: bf16[32,256], index: 0, kind: input, shape index: {}]   ;;  %s1380_s1 = inlined_call_operand.vmem [shape: bf16[256,768], index: 1, kind: input, shape index: {}]   ;;  %s1381_s2 = inlined_call_operand.vmem [shape: f32[1,768], index: 2, kind: input, shape index: {}]   ;;  %s1382_s3 = inlined_call_operand.vmem [shape: bf16[32,768], index: 3, kind: output, shape index: {}]  }
   0x1   :  { %s1152_s14 = smov 0   ;;  %s1154_s15 = smov 0  }
   0x2   :  { %s1156_s16 = smov 0   ;;  %s1158_s17 = smov 0  }
   0x3   :  { %s1160_s18 = smov 0   ;;  %s1162_s19 = smov 0  }
   0x4   :  { %s1164_s20 = smov 0  }
   0x5 LB: > { %s871_s21 = sadd.s32 4294967295, %s1126_s20   ;;  %s28_s22 = sadd.s32 1, %s1118_s18  ;;  %s1126_s20 = sphi %s1164_s20, %s13_s20   ;;  %s1122_s19 = sphi %s1162_s19, %s1391_s19   ;;  %s1118_s18 = sphi %s1160_s18, %s1390_s18   ;;  %s1114_s17 = sphi %s1158_s17, %s1389_s17   ;;  %s1110_s16 = sphi %s1156_s16, %s1388_s16   ;;  %s1106_s15 = sphi %s1154_s15, %s1387_s15   ;;  %s1102_s14 = sphi %s1152_s14, %s1386_s14   ;;  %s1098_s13 = sphi %s1150_s13, %s1385_s13   ;;  %s1094_s12 = sphi %s1148_s12, %s1384_s12  }
   0x6   : > { %p30_p0 = scmp.ge.s32.totalorder %s28_s22, 3  ;;  %s32_s23 = sadd.s32 1, %s1122_s19 }
   0x7   : > { %s69_s24 = sadd.s32 1, %s1106_s15  ;;  %p76_p1 = scmp.ne.s32.totalorder %s1106_s15, %s1102_s14 }
   0x8   : > { %s1393_s22 = smov (%p30_p0, %s28_s22), 0  ;;  %s1395_s23 = smov (!%p30_p0, %s32_s23), %s1122_s19 }
   0x9   : > { %s65_s25 = ssub.s32 %s1118_s18, %s1393_s22  ;;  %p77_p2 = scmp.eq.s32.totalorder %s1126_s20, 0 }
   0xa   : > { %p34_p3 = scmp.ge.s32.totalorder %s1395_s23, 2  ;;  %p67_p4 = scmp.eq.s32.totalorder %s65_s25, 0 }
   0xb   : > { %p78_p5 = por %p77_p2, %p76_p1  ;;  %s123_s26 = sadd.s32 1, %s1098_s13 }
   0xc   : > { %s1397_s23 = smov (%p34_p3, %s1395_s23), 0  ;;  %p133_p6 = scmp.ne.s32.totalorder %s1098_s13, %s1094_s12 }
   0xd   : > { %s1209_s27 = scalar_select %p67_p4, %s1106_s15, %s69_s24  }
   0xe   : > { %s118_s28 = ssub.s32 %s1122_s19, %s1397_s23  ;;  %p134_p7 = scmp.eq.s32.totalorder %s871_s21, 5 }
   0xf   : > { %s120_s29 = sor.u32 %s118_s28, %s65_s25  ;;  %p874_p10 = scmp.ge.s32.totalorder %s1126_s20, 6 }
  0x10   : > { %p121_p8 = scmp.eq.s32.totalorder %s120_s29, 0  ;;  %p1215_p9 = por %p134_p7, %p133_p6 }
  0x11   : > { %156 = sbr.rel (%p874_p10) target bundleno = 44 (0x2c), region = 16 }
  0x12   : > { %s1220_s4 = scalar_select %p121_p8, %s1098_s13, %s123_s26  }
  0x18   : > { %174 = sbr.rel (!%p78_p5) target bundleno = 44 (0x2c), region = 24  ;;  %s176_s5 = sand.u32 (%p78_p5), 1, %s1106_s15  }
  0x19   : > { %s928_s6 = sshll.u32 (%p78_p5), %s1118_s18, 3  ;;  %s875_s7 = sshll.u32 (%p78_p5), %s176_s5, 8 }
  0x1a   : > { %s1228_s10 = scalar_lea.vmem (%p78_p5), %s1380_s1, %s928_s6  ;;  %s1233_s11 = scalar_lea.vmem (%p78_p5), [#allocation3], %s875_s7 }
  0x1b   : > { %v274_v0 = vld [vmem:[%s1228_s10] sm:$0xff] (%p78_p5)  ;;  %v276_v1 = vld [vmem:[%s1228_s10 + $0x18] sm:$0xff] (%p78_p5)  ;;  %v278_v2 = vld [vmem:[%s1228_s10 + $0x30] sm:$0xff] (%p78_p5) }
  0x1c   : > { %275 = vst [vmem:[%s1233_s11] sm:$0xff] (%p78_p5), %v274_v0  ;;  %277 = vst [vmem:[%s1233_s11 + $0x8] sm:$0xff] (%p78_p5), %v276_v1  ;;  %v280_v3 = vld [vmem:[%s1228_s10 + $0x48] sm:$0xff] (%p78_p5)  ;;  %v282_v4 = vld [vmem:[%s1228_s10 + $0x60] sm:$0xff] (%p78_p5) }
  0x1d   : > { %279 = vst [vmem:[%s1233_s11 + $0x10] sm:$0xff] (%p78_p5), %v278_v2  ;;  %v284_v5 = vld [vmem:[%s1228_s10 + $0x78] sm:$0xff] (%p78_p5)  ;;  %281 = vst [vmem:[%s1233_s11 + $0x18] sm:$0xff] (%p78_p5), %v280_v3  ;;  %v286_v6 = vld [vmem:[%s1228_s10 + $0x90] sm:$0xff] (%p78_p5) }
  0x1e   : > { %283 = vst [vmem:[%s1233_s11 + $0x20] sm:$0xff] (%p78_p5), %v282_v4  ;;  %285 = vst [vmem:[%s1233_s11 + $0x28] sm:$0xff] (%p78_p5), %v284_v5  ;;  %v288_v7 = vld [vmem:[%s1228_s10 + $0xa8] sm:$0xff] (%p78_p5)  ;;  %v290_v8 = vld [vmem:[%s1228_s10 + $0xc0] sm:$0xff] (%p78_p5) }
  0x1f   : > { %287 = vst [vmem:[%s1233_s11 + $0x30] sm:$0xff] %v286_v6  ;;  %289 = vst [vmem:[%s1233_s11 + $0x38] sm:$0xff] %v288_v7  ;;  %v292_v9 = vld [vmem:[%s1228_s10 + $0xd8] sm:$0xff]  ;;  %v294_v10 = vld [vmem:[%s1228_s10 + $0xf0] sm:$0xff] }
  0x20   : > { %291 = vst [vmem:[%s1233_s11 + $0x40] sm:$0xff] %v290_v8  ;;  %v296_v11 = vld [vmem:[%s1228_s10 + $0x108] sm:$0xff]  ;;  %293 = vst [vmem:[%s1233_s11 + $0x48] sm:$0xff] %v292_v9  ;;  %v298_v12 = vld [vmem:[%s1228_s10 + $0x120] sm:$0xff] }
  0x21   : > { %295 = vst [vmem:[%s1233_s11 + $0x50] sm:$0xff] %v294_v10  ;;  %297 = vst [vmem:[%s1233_s11 + $0x58] sm:$0xff] %v296_v11  ;;  %v300_v13 = vld [vmem:[%s1228_s10 + $0x138] sm:$0xff]  ;;  %v302_v14 = vld [vmem:[%s1228_s10 + $0x150] sm:$0xff] }
  0x22   : > { %299 = vst [vmem:[%s1233_s11 + $0x60] sm:$0xff] %v298_v12  ;;  %301 = vst [vmem:[%s1233_s11 + $0x68] sm:$0xff] %v300_v13  ;;  %v304_v15 = vld [vmem:[%s1228_s10 + $0x168] sm:$0xff]  ;;  %v306_v16 = vld [vmem:[%s1228_s10 + $0x180] sm:$0xff] }
  0x23   : > { %303 = vst [vmem:[%s1233_s11 + $0x70] sm:$0xff] %v302_v14  ;;  %v308_v17 = vld [vmem:[%s1228_s10 + $0x198] sm:$0xff]  ;;  %305 = vst [vmem:[%s1233_s11 + $0x78] sm:$0xff] %v304_v15  ;;  %v310_v18 = vld [vmem:[%s1228_s10 + $0x1b0] sm:$0xff] }
  0x24   : > { %307 = vst [vmem:[%s1233_s11 + $0x80] sm:$0xff] %v306_v16  ;;  %309 = vst [vmem:[%s1233_s11 + $0x88] sm:$0xff] %v308_v17  ;;  %v312_v19 = vld [vmem:[%s1228_s10 + $0x1c8] sm:$0xff]  ;;  %v314_v20 = vld [vmem:[%s1228_s10 + $0x1e0] sm:$0xff] }
  0x25   : > { %311 = vst [vmem:[%s1233_s11 + $0x90] sm:$0xff] %v310_v18  ;;  %313 = vst [vmem:[%s1233_s11 + $0x98] sm:$0xff] %v312_v19  ;;  %v316_v21 = vld [vmem:[%s1228_s10 + $0x1f8] sm:$0xff]  ;;  %v318_v22 = vld [vmem:[%s1228_s10 + $0x210] sm:$0xff] }
  0x26   : > { %315 = vst [vmem:[%s1233_s11 + $0xa0] sm:$0xff] %v314_v20  ;;  %v320_v23 = vld [vmem:[%s1228_s10 + $0x228] sm:$0xff]  ;;  %317 = vst [vmem:[%s1233_s11 + $0xa8] sm:$0xff] %v316_v21  ;;  %v322_v24 = vld [vmem:[%s1228_s10 + $0x240] sm:$0xff] }
  0x27   : > { %319 = vst [vmem:[%s1233_s11 + $0xb0] sm:$0xff] %v318_v22  ;;  %321 = vst [vmem:[%s1233_s11 + $0xb8] sm:$0xff] %v320_v23  ;;  %v324_v25 = vld [vmem:[%s1228_s10 + $0x258] sm:$0xff]  ;;  %v326_v26 = vld [vmem:[%s1228_s10 + $0x270] sm:$0xff] }
  0x28   : > { %323 = vst [vmem:[%s1233_s11 + $0xc0] sm:$0xff] %v322_v24  ;;  %325 = vst [vmem:[%s1233_s11 + $0xc8] sm:$0xff] %v324_v25  ;;  %v328_v27 = vld [vmem:[%s1228_s10 + $0x288] sm:$0xff]  ;;  %v330_v28 = vld [vmem:[%s1228_s10 + $0x2a0] sm:$0xff] }
  0x29   : > { %327 = vst [vmem:[%s1233_s11 + $0xd0] sm:$0xff] %v326_v26  ;;  %v332_v29 = vld [vmem:[%s1228_s10 + $0x2b8] sm:$0xff]  ;;  %329 = vst [vmem:[%s1233_s11 + $0xd8] sm:$0xff] %v328_v27  ;;  %v334_v30 = vld [vmem:[%s1228_s10 + $0x2d0] sm:$0xff] }
  0x2a   : > { %331 = vst [vmem:[%s1233_s11 + $0xe0] sm:$0xff] %v330_v28  ;;  %333 = vst [vmem:[%s1233_s11 + $0xe8] sm:$0xff] %v332_v29  ;;  %v336_v31 = vld [vmem:[%s1228_s10 + $0x2e8] sm:$0xff] }
  0x2b   : > { %335 = vst [vmem:[%s1233_s11 + $0xf0] sm:$0xff] %v334_v30  ;;  %337 = vst [vmem:[%s1233_s11 + $0xf8] sm:$0xff] %v336_v31 }
  0x2c PF: > { %p878_p11 = scmp.ge.s32.totalorder %s1126_s20, 1  ;;  %p350_p12 = scmp.lt.s32.totalorder %s1126_s20, 7 }
  0x2e   : > { %p351_p13 = pnand %p878_p11, %p350_p12 }
  0x2f   : > { %s357_s21 = sand.u32 (!%p351_p13), 1, %s1102_s14   ;;  %s881_s14 = sshll.u32 (!%p351_p13), %s1114_s17, 1  ;;  %v690_v2 = vlaneseq (!%p351_p13) }
  0x30   : > { %354 = sbr.rel (%p351_p13) target bundleno = 343 (0x157), region = 66  ;;  %s879_s24 = sshll.u32 (!%p351_p13), %s357_s21, 8 }
  0x31   : > { %s1299_s25 = scalar_lea.vmem (!%p351_p13), [#allocation3], %s879_s24  ;;  %p395_p0 = scmp.lt.s32.totalorder (!%p351_p13), %s881_s14, 3  ;;  %v691_v3 = vshrl.u32 (!%p351_p13), %v690_v2, 7 }
  0x32   : > { %v1005_v32 = vld [vmem:[%s1299_s25 + $0x4] ss:$8 sps:$4 sm:$0xff] (!%p351_p13)   ;;  %v1007_v33 = vld [vmem:[%s1299_s25] ss:$8 sps:$4 sm:$0xff] (!%p351_p13)   ;;  %v1008_v34 = vld [vmem:[%s1299_s25 + $0x14] ss:$8 sps:$4 sm:$0xff] (!%p351_p13)  }
  0x33   : > { %630 = vmatprep.subr.bf16.mxu0 (!%p351_p13), %v1005_v32  ;;  %v1010_v35 = vld [vmem:[%s1299_s25 + $0x10] ss:$8 sps:$4 sm:$0xff] (!%p351_p13)   ;;  %v1011_v36 = vld [vmem:[%s1299_s25 + $0x24] ss:$8 sps:$4 sm:$0xff] (!%p351_p13)   ;;  %v1013_v37 = vld [vmem:[%s1299_s25 + $0x20] ss:$8 sps:$4 sm:$0xff] (!%p351_p13)  }
  0x34   : > { %631 = vmatpush1.bf16.msra.mxu0 (!%p351_p13), %v1007_v33  ;;  %v1014_v38 = vld [vmem:[%s1299_s25 + $0x34] ss:$8 sps:$4 sm:$0xff] (!%p351_p13)   ;;  %v1016_v39 = vld [vmem:[%s1299_s25 + $0x30] ss:$8 sps:$4 sm:$0xff] (!%p351_p13)   ;;  %v1017_v40 = vld [vmem:[%s1299_s25 + $0x44] ss:$8 sps:$4 sm:$0xff] (!%p351_p13)  }
  0x35   : > { %632 = vmatprep.subr.bf16.mxu0 (!%p351_p13), %v1008_v34  ;;  %v1019_v41 = vld [vmem:[%s1299_s25 + $0x40] ss:$8 sps:$4 sm:$0xff] (!%p351_p13)   ;;  %v1020_v42 = vld [vmem:[%s1299_s25 + $0x54] ss:$8 sps:$4 sm:$0xff] (!%p351_p13)   ;;  %v1022_v43 = vld [vmem:[%s1299_s25 + $0x50] ss:$8 sps:$4 sm:$0xff] (!%p351_p13)  }
  0x36   : > { %v1023_v44 = vld [vmem:[%s1299_s25 + $0x64] ss:$8 sps:$4 sm:$0xff] (!%p351_p13)   ;;  %v1025_v46 = vld [vmem:[%s1299_s25 + $0x60] ss:$8 sps:$4 sm:$0xff] (!%p351_p13)   ;;  %v1026_v47 = vld [vmem:[%s1299_s25 + $0x74] ss:$8 sps:$4 sm:$0xff] (!%p351_p13)  }
  0x37   : > { %s1399_s14 = smov (!%p395_p0, %s881_s14), 3  ;;  %v1028_v48 = vld [vmem:[%s1299_s25 + $0x70] ss:$8 sps:$4 sm:$0xff]   ;;  %v1029_v49 = vld [vmem:[%s1299_s25 + $0x84] ss:$8 sps:$4 sm:$0xff]   ;;  %s884_s6 = sshll.u32 %s1110_s16, 1 }
  0x38   : > { %633 = vmatpush1.bf16.msra.mxu0 %v1010_v35  ;;  %s929_s26 = sshll.u32 %s1399_s14, 3  ;;  %v1031_v50 = vld [vmem:[%s1299_s25 + $0x80] ss:$8 sps:$4 sm:$0xff]   ;;  %v1032_v51 = vld [vmem:[%s1299_s25 + $0x94] ss:$8 sps:$4 sm:$0xff]   ;;  %p408_p1 = scmp.lt.s32.totalorder %s884_s6, 5 }
  0x39   : > { %634 = vmatprep.subr.bf16.mxu0 %v1011_v36  ;;  %s1317_s5 = scalar_lea.vmem %s1379_s0, %s929_s26  ;;  %v1034_v52 = vld [vmem:[%s1299_s25 + $0x90] ss:$8 sps:$4 sm:$0xff]   ;;  %v1035_v53 = vld [vmem:[%s1299_s25 + $0xa4] ss:$8 sps:$4 sm:$0xff]   ;;  %v1037_v54 = vld [vmem:[%s1299_s25 + $0xa0] ss:$8 sps:$4 sm:$0xff]  }
  0x3a   : > { %v1055_v45 = vld [vmem:[%s1317_s5 + $0x4] ss:$8 sps:$4 sm:$0xff]   ;;  %v1038_v55 = vld [vmem:[%s1299_s25 + $0xb4] ss:$8 sps:$4 sm:$0xff]   ;;  %v1040_v56 = vld [vmem:[%s1299_s25 + $0xb0] ss:$8 sps:$4 sm:$0xff]  }
  0x3b   : > { %662 = vmatprep.mubr.bf16.mxu0 %v1055_v45  ;;  %v1041_v57 = vld [vmem:[%s1299_s25 + $0xc4] ss:$8 sps:$4 sm:$0xff]   ;;  %v1043_v58 = vld [vmem:[%s1299_s25 + $0xc0] ss:$8 sps:$4 sm:$0xff]   ;;  %v1044_v59 = vld [vmem:[%s1299_s25 + $0xd4] ss:$8 sps:$4 sm:$0xff]  }
  0x3c   : > { %635 = vmatpush1.bf16.msra.mxu0 %v1013_v37  ;;  %v1046_v60 = vld [vmem:[%s1299_s25 + $0xd0] ss:$8 sps:$4 sm:$0xff]   ;;  %v1047_v61 = vld [vmem:[%s1299_s25 + $0xe4] ss:$8 sps:$4 sm:$0xff]   ;;  %v1049_v62 = vld [vmem:[%s1299_s25 + $0xe0] ss:$8 sps:$4 sm:$0xff]  }
  0x3d   : > { %636 = vmatprep.subr.bf16.mxu0 %v1014_v38  ;;  %v1050_v63 = vld [vmem:[%s1299_s25 + $0xf4] ss:$8 sps:$4 sm:$0xff]   ;;  %v1052_v0 = vld [vmem:[%s1299_s25 + $0xf0] ss:$8 sps:$4 sm:$0xff]   ;;  %v1053_v1 = vld [vmem:[%s1317_s5] ss:$8 sps:$4 sm:$0xff]  }
  0x3e   : > { %s409_s7 = scalar_select %p408_p1, %s884_s6, 5  ;;  %v692_v4 = vsub.s32 0, %v691_v3  ;;  %v696_v6 = vsub.s32 1, %v691_v3 }
  0x3f   : > { %s390_s11 = sand.u32 1, %s1094_s12   ;;  %s932_s12 = smul.u32 (%p1215_p9), 12, %s1114_s17 }
  0x40   : > { %637 = vmatpush1.bf16.msra.mxu0 %v1016_v39  ;;  %s410_s10 = scalar_lea.vmem %s1381_s2, %s409_s7  ;;  %s880_s21 = sshll.u32 %s390_s11, 4 }
  0x41   : > { %638 = vmatprep.subr.bf16.mxu0 %v1017_v40  ;;  %v688_v5 = vld [vmem:[%s410_s10] sm:$0x3]  ;;  %s392_s16 = scalar_lea.vmem [#allocation4], %s880_s21  ;;  %s728_s24 = sadd.s32 (%p1215_p9), %s932_s12, %s884_s6 }
  0x42   : > { %v693_v7 = vrot.slane %v688_v5, %v692_v4  ;;  %v697_v8 = vrot.slane %v688_v5, %v696_v6  ;;  %s925_s25 = sshll.u32 (%p1215_p9), %s728_s24, 2 }
  0x43   : > { %s730_s28 = scalar_lea.vmem (%p1215_p9), %s1382_s3, %s925_s25 }
  0x44   : > { %639 = vmatpush1.bf16.msra.mxu0 %v1019_v41 }
  0x45   : > { %640 = vmatprep.subr.bf16.mxu0 %v1020_v42 }
  0x48   : > { %641 = vmatpush1.bf16.msra.mxu0 %v1022_v43 }
  0x49   : > { %642 = vmatprep.subr.bf16.mxu0 %v1023_v44 }
  0x4c   : > { %643 = vmatpush1.bf16.msra.mxu0 %v1025_v46 }
  0x4d   : > { %644 = vmatprep.subr.bf16.mxu0 %v1026_v47 }
  0x50   : > { %645 = vmatpush1.bf16.msra.mxu0 %v1028_v48 }
  0x51   : > { %646 = vmatprep.subr.bf16.mxu0 %v1029_v49 }
  0x54   : > { %647 = vmatpush1.bf16.msra.mxu0 %v1031_v50 }
  0x55   : > { %648 = vmatprep.subr.bf16.mxu0 %v1032_v51 }
  0x58   : > { %649 = vmatpush1.bf16.msra.mxu0 %v1034_v52 }
  0x59   : > { %650 = vmatprep.subr.bf16.mxu0 %v1035_v53 }
  0x5c   : > { %651 = vmatpush1.bf16.msra.mxu0 %v1037_v54 }
  0x5d   : > { %652 = vmatprep.subr.bf16.mxu0 %v1038_v55 }
  0x60   : > { %653 = vmatpush1.bf16.msra.mxu0 %v1040_v56 }
  0x61   : > { %654 = vmatprep.subr.bf16.mxu0 %v1041_v57 }
  0x64   : > { %655 = vmatpush1.bf16.msra.mxu0 %v1043_v58 }
  0x65   : > { %656 = vmatprep.subr.bf16.mxu0 %v1044_v59 }
  0x68   : > { %657 = vmatpush1.bf16.msra.mxu0 %v1046_v60 }
  0x69   : > { %658 = vmatprep.subr.bf16.mxu0 %v1047_v61 }
  0x6c   : > { %659 = vmatpush1.bf16.msra.mxu0 %v1049_v62 }
  0x6d   : > { %660 = vmatprep.subr.bf16.mxu0 %v1050_v63 }
  0x70   : > { %661 = vmatpush1.bf16.msra.mxu0 %v1052_v0 }
  0x73   : > { %663 = vmatmul.mubr.bf16.vlgmr.msra.gmra.mrb[0].mxu0 %v1053_v1 }
 0x146   : > { %v664_v9 = vpop.f32.mrb[0].mxu0 }
 0x147   : > { %v700_v10 = vadd.f32 %v693_v7, %v664_v9  ;;  %v666_v11 = vpop.f32.mrb[1].mxu0 }
 0x148   : > { %v701_v12 = vadd.f32 %v697_v8, %v666_v11  ;;  %v668_v13 = vpop.f32.mrb[2].mxu0  ;;  %724 = sbr.rel (!%p1215_p9) target bundleno = 343 (0x157), region = 82 }
 0x149   : > { %v702_v14 = vadd.f32 %v693_v7, %v668_v13  ;;  %v670_v15 = vpop.f32.mrb[3].mxu0 }
 0x14a   : > { %v930_v16 = vpack.c.bf16 %v701_v12, %v700_v10  ;;  %v703_v17 = vadd.f32 %v697_v8, %v670_v15 }
 0x14c   : > { %716 = vst [vmem:[%s392_s16] sm:$0xff] %v930_v16  ;;  %v931_v18 = vpack.c.bf16 %v703_v17, %v702_v14 }
 0x14e   : > { %717 = vst [vmem:[%s392_s16 + $0x8] sm:$0xff] %v931_v18 }
 0x153   : > { %v760_v19 = vld [vmem:[%s392_s16] sm:$0xff] }
 0x154   : > { %761 = vst [vmem:[%s730_s28] sm:$0xff] %v760_v19 }
 0x155   : > { %v762_v20 = vld [vmem:[%s392_s16 + $0x8] sm:$0xff] }
 0x156   : > { %763 = vst [vmem:[%s730_s28 + $0x18] sm:$0xff] %v762_v20 }
 0x157 PF: > { %s13_s20 = sadd.s32 1, %s1126_s20   ;;  %s1384_s12 = smov %s1098_s13 }
 0x158   : > { %p10_p2 = scmp.ge.s32.totalorder %s13_s20, 8   ;;  %s1385_s13 = smov %s1220_s4 }
 0x159   : > { %s1386_s14 = smov %s1106_s15  ;;  %s1387_s15 = smov %s1209_s27 }
 0x15a   : > { %s1388_s16 = smov %s1118_s18  ;;  %s1389_s17 = smov %s1122_s19 }
 0x15b   : > { %s1390_s18 = smov %s1393_s22  ;;  %s1391_s19 = smov %s1397_s23 }
 0x15c   :  { %12 = sbr.rel (!%p10_p2) target bundleno = 5 (0x5), region = 157 }

// kernel: bert_base_uncased_forward.16
= control target key start
LH: loop header
LB: loop body
LE: loop exit
PB: predicated region body
PF: predicated region fallthrough
CT: control target
= control target key end

     0   :  { %s1577_s12 = smov 0   ;;  %s1579_s13 = smov 0   ;;  %s1965_s0 = inlined_call_operand.vmem [shape: bf16[32,256], index: 0, kind: input, shape index: {}]   ;;  %s1966_s1 = inlined_call_operand.vmem [shape: bf16[256,1024], index: 1, kind: input, shape index: {}]   ;;  %s1967_s2 = inlined_call_operand.vmem [shape: f32[1,1024], index: 2, kind: input, shape index: {}]   ;;  %s1968_s3 = inlined_call_operand.vmem [shape: bf16[32,1024], index: 3, kind: output, shape index: {}]  }
   0x1   :  { %s1581_s14 = smov 0   ;;  %s1583_s15 = smov 0  }
   0x2   :  { %s1585_s16 = smov 0   ;;  %s1587_s17 = smov 0  }
   0x3   :  { %s1589_s18 = smov 0   ;;  %s1591_s19 = smov 0  }
   0x4   :  { %s1593_s20 = smov 0  }
   0x5 LB: > { %s1200_s21 = sadd.s32 4294967295, %s1555_s20   ;;  %s28_s22 = sadd.s32 1, %s1547_s18  ;;  %s1555_s20 = sphi %s1593_s20, %s13_s20   ;;  %s1551_s19 = sphi %s1591_s19, %s1977_s19   ;;  %s1547_s18 = sphi %s1589_s18, %s1976_s18   ;;  %s1543_s17 = sphi %s1587_s17, %s1975_s17   ;;  %s1539_s16 = sphi %s1585_s16, %s1974_s16   ;;  %s1535_s15 = sphi %s1583_s15, %s1973_s15   ;;  %s1531_s14 = sphi %s1581_s14, %s1972_s14   ;;  %s1527_s13 = sphi %s1579_s13, %s1971_s13   ;;  %s1523_s12 = sphi %s1577_s12, %s1970_s12  }
   0x6   : > { %p30_p0 = scmp.ge.s32.totalorder %s28_s22, 2  ;;  %s32_s23 = sadd.s32 1, %s1551_s19 }
   0x7   : > { %s69_s24 = sadd.s32 1, %s1535_s15  ;;  %p76_p1 = scmp.ne.s32.totalorder %s1535_s15, %s1531_s14 }
   0x8   : > { %s1979_s22 = smov (%p30_p0, %s28_s22), 0  ;;  %s1981_s23 = smov (!%p30_p0, %s32_s23), %s1551_s19 }
   0x9   : > { %s65_s25 = ssub.s32 %s1547_s18, %s1979_s22  ;;  %p77_p2 = scmp.eq.s32.totalorder %s1555_s20, 0 }
   0xa   : > { %p34_p3 = scmp.ge.s32.totalorder %s1981_s23, 2  ;;  %p67_p4 = scmp.eq.s32.totalorder %s65_s25, 0 }
   0xb   : > { %p78_p5 = por %p77_p2, %p76_p1  ;;  %s123_s26 = sadd.s32 1, %s1527_s13 }
   0xc   : > { %s1983_s23 = smov (%p34_p3, %s1981_s23), 0  ;;  %p133_p6 = scmp.ne.s32.totalorder %s1527_s13, %s1523_s12 }
   0xd   : > { %s1638_s27 = scalar_select %p67_p4, %s1535_s15, %s69_s24  }
   0xe   : > { %s118_s28 = ssub.s32 %s1551_s19, %s1983_s23  ;;  %p134_p7 = scmp.eq.s32.totalorder %s1200_s21, 3 }
   0xf   : > { %s120_s29 = sor.u32 %s118_s28, %s65_s25  ;;  %p1203_p10 = scmp.ge.s32.totalorder %s1555_s20, 4 }
  0x10   : > { %p121_p8 = scmp.eq.s32.totalorder %s120_s29, 0  ;;  %p1644_p9 = por %p134_p7, %p133_p6 }
  0x11   : > { %156 = sbr.rel (%p1203_p10) target bundleno = 60 (0x3c), region = 16 }
  0x12   : > { %s1649_s4 = scalar_select %p121_p8, %s1527_s13, %s123_s26  }
  0x18   : > { %174 = sbr.rel (!%p78_p5) target bundleno = 60 (0x3c), region = 24  ;;  %s176_s5 = sand.u32 (%p78_p5), 1, %s1535_s15  }
  0x19   : > { %s1291_s6 = sshll.u32 (%p78_p5), %s1547_s18, 4  ;;  %s1204_s7 = sshll.u32 (%p78_p5), %s176_s5, 9 }
  0x1a   : > { %s1657_s10 = scalar_lea.vmem (%p78_p5), %s1966_s1, %s1291_s6  ;;  %s1662_s11 = scalar_lea.vmem (%p78_p5), [#allocation3], %s1204_s7 }
  0x1b   : > { %v197_v0 = vld [vmem:[%s1657_s10] sm:$0xff] (%p78_p5)  ;;  %v199_v1 = vld [vmem:[%s1657_s10 + $0x8] sm:$0xff] (%p78_p5) }
  0x1c   : > { %v201_v2 = vld [vmem:[%s1657_s10 + $0x20] sm:$0xff] (%p78_p5)  ;;  %198 = vst [vmem:[%s1662_s11] sm:$0xff] (%p78_p5), %v197_v0  ;;  %200 = vst [vmem:[%s1662_s11 + $0x8] sm:$0xff] (%p78_p5), %v199_v1  ;;  %v203_v3 = vld [vmem:[%s1657_s10 + $0x28] sm:$0xff] (%p78_p5) }
  0x1d   : > { %202 = vst [vmem:[%s1662_s11 + $0x10] sm:$0xff] (%p78_p5), %v201_v2  ;;  %v205_v4 = vld [vmem:[%s1657_s10 + $0x40] sm:$0xff] (%p78_p5)  ;;  %v207_v5 = vld [vmem:[%s1657_s10 + $0x48] sm:$0xff] (%p78_p5)  ;;  %204 = vst [vmem:[%s1662_s11 + $0x18] sm:$0xff] (%p78_p5), %v203_v3 }
  0x1e   : > { %206 = vst [vmem:[%s1662_s11 + $0x20] sm:$0xff] (%p78_p5), %v205_v4  ;;  %208 = vst [vmem:[%s1662_s11 + $0x28] sm:$0xff] (%p78_p5), %v207_v5  ;;  %v209_v6 = vld [vmem:[%s1657_s10 + $0x60] sm:$0xff] (%p78_p5)  ;;  %v211_v7 = vld [vmem:[%s1657_s10 + $0x68] sm:$0xff] (%p78_p5) }
  0x1f   : > { %v213_v8 = vld [vmem:[%s1657_s10 + $0x80] sm:$0xff]  ;;  %210 = vst [vmem:[%s1662_s11 + $0x30] sm:$0xff] %v209_v6  ;;  %212 = vst [vmem:[%s1662_s11 + $0x38] sm:$0xff] %v211_v7  ;;  %v215_v9 = vld [vmem:[%s1657_s10 + $0x88] sm:$0xff] }
  0x20   : > { %214 = vst [vmem:[%s1662_s11 + $0x40] sm:$0xff] %v213_v8  ;;  %v217_v10 = vld [vmem:[%s1657_s10 + $0xa0] sm:$0xff]  ;;  %v219_v11 = vld [vmem:[%s1657_s10 + $0xa8] sm:$0xff]  ;;  %216 = vst [vmem:[%s1662_s11 + $0x48] sm:$0xff] %v215_v9 }
  0x21   : > { %218 = vst [vmem:[%s1662_s11 + $0x50] sm:$0xff] %v217_v10  ;;  %220 = vst [vmem:[%s1662_s11 + $0x58] sm:$0xff] %v219_v11  ;;  %v221_v12 = vld [vmem:[%s1657_s10 + $0xc0] sm:$0xff]  ;;  %v223_v13 = vld [vmem:[%s1657_s10 + $0xc8] sm:$0xff] }
  0x22   : > { %v225_v14 = vld [vmem:[%s1657_s10 + $0xe0] sm:$0xff]  ;;  %222 = vst [vmem:[%s1662_s11 + $0x60] sm:$0xff] %v221_v12  ;;  %224 = vst [vmem:[%s1662_s11 + $0x68] sm:$0xff] %v223_v13  ;;  %v227_v15 = vld [vmem:[%s1657_s10 + $0xe8] sm:$0xff] }
  0x23   : > { %226 = vst [vmem:[%s1662_s11 + $0x70] sm:$0xff] %v225_v14  ;;  %v229_v16 = vld [vmem:[%s1657_s10 + $0x100] sm:$0xff]  ;;  %v231_v17 = vld [vmem:[%s1657_s10 + $0x108] sm:$0xff]  ;;  %228 = vst [vmem:[%s1662_s11 + $0x78] sm:$0xff] %v227_v15 }
  0x24   : > { %230 = vst [vmem:[%s1662_s11 + $0x80] sm:$0xff] %v229_v16  ;;  %232 = vst [vmem:[%s1662_s11 + $0x88] sm:$0xff] %v231_v17  ;;  %v233_v18 = vld [vmem:[%s1657_s10 + $0x120] sm:$0xff]  ;;  %v235_v19 = vld [vmem:[%s1657_s10 + $0x128] sm:$0xff] }
  0x25   : > { %v237_v20 = vld [vmem:[%s1657_s10 + $0x140] sm:$0xff]  ;;  %234 = vst [vmem:[%s1662_s11 + $0x90] sm:$0xff] %v233_v18  ;;  %236 = vst [vmem:[%s1662_s11 + $0x98] sm:$0xff] %v235_v19  ;;  %v239_v21 = vld [vmem:[%s1657_s10 + $0x148] sm:$0xff] }
  0x26   : > { %238 = vst [vmem:[%s1662_s11 + $0xa0] sm:$0xff] %v237_v20  ;;  %v241_v22 = vld [vmem:[%s1657_s10 + $0x160] sm:$0xff]  ;;  %v243_v23 = vld [vmem:[%s1657_s10 + $0x168] sm:$0xff]  ;;  %240 = vst [vmem:[%s1662_s11 + $0xa8] sm:$0xff] %v239_v21 }
  0x27   : > { %242 = vst [vmem:[%s1662_s11 + $0xb0] sm:$0xff] %v241_v22  ;;  %244 = vst [vmem:[%s1662_s11 + $0xb8] sm:$0xff] %v243_v23  ;;  %v245_v24 = vld [vmem:[%s1657_s10 + $0x180] sm:$0xff]  ;;  %v247_v25 = vld [vmem:[%s1657_s10 + $0x188] sm:$0xff] }
  0x28   : > { %v249_v26 = vld [vmem:[%s1657_s10 + $0x1a0] sm:$0xff]  ;;  %246 = vst [vmem:[%s1662_s11 + $0xc0] sm:$0xff] %v245_v24  ;;  %248 = vst [vmem:[%s1662_s11 + $0xc8] sm:$0xff] %v247_v25  ;;  %v251_v27 = vld [vmem:[%s1657_s10 + $0x1a8] sm:$0xff] }
  0x29   : > { %250 = vst [vmem:[%s1662_s11 + $0xd0] sm:$0xff] %v249_v26  ;;  %v253_v28 = vld [vmem:[%s1657_s10 + $0x1c0] sm:$0xff]  ;;  %v255_v29 = vld [vmem:[%s1657_s10 + $0x1c8] sm:$0xff]  ;;  %252 = vst [vmem:[%s1662_s11 + $0xd8] sm:$0xff] %v251_v27 }
  0x2a   : > { %254 = vst [vmem:[%s1662_s11 + $0xe0] sm:$0xff] %v253_v28  ;;  %256 = vst [vmem:[%s1662_s11 + $0xe8] sm:$0xff] %v255_v29  ;;  %v257_v30 = vld [vmem:[%s1657_s10 + $0x1e0] sm:$0xff]  ;;  %v259_v31 = vld [vmem:[%s1657_s10 + $0x1e8] sm:$0xff] }
  0x2b   : > { %v261_v32 = vld [vmem:[%s1657_s10 + $0x200] sm:$0xff]  ;;  %258 = vst [vmem:[%s1662_s11 + $0xf0] sm:$0xff] %v257_v30  ;;  %260 = vst [vmem:[%s1662_s11 + $0xf8] sm:$0xff] %v259_v31  ;;  %v263_v33 = vld [vmem:[%s1657_s10 + $0x208] sm:$0xff] }
  0x2c   : > { %262 = vst [vmem:[%s1662_s11 + $0x100] sm:$0xff] %v261_v32  ;;  %v265_v34 = vld [vmem:[%s1657_s10 + $0x220] sm:$0xff]  ;;  %v267_v35 = vld [vmem:[%s1657_s10 + $0x228] sm:$0xff]  ;;  %264 = vst [vmem:[%s1662_s11 + $0x108] sm:$0xff] %v263_v33 }
  0x2d   : > { %266 = vst [vmem:[%s1662_s11 + $0x110] sm:$0xff] %v265_v34  ;;  %268 = vst [vmem:[%s1662_s11 + $0x118] sm:$0xff] %v267_v35  ;;  %v269_v36 = vld [vmem:[%s1657_s10 + $0x240] sm:$0xff]  ;;  %v271_v37 = vld [vmem:[%s1657_s10 + $0x248] sm:$0xff] }
  0x2e   : > { %v273_v38 = vld [vmem:[%s1657_s10 + $0x260] sm:$0xff]  ;;  %270 = vst [vmem:[%s1662_s11 + $0x120] sm:$0xff] %v269_v36  ;;  %272 = vst [vmem:[%s1662_s11 + $0x128] sm:$0xff] %v271_v37  ;;  %v275_v39 = vld [vmem:[%s1657_s10 + $0x268] sm:$0xff] }
  0x2f   : > { %274 = vst [vmem:[%s1662_s11 + $0x130] sm:$0xff] %v273_v38  ;;  %v277_v40 = vld [vmem:[%s1657_s10 + $0x280] sm:$0xff]  ;;  %v279_v41 = vld [vmem:[%s1657_s10 + $0x288] sm:$0xff]  ;;  %276 = vst [vmem:[%s1662_s11 + $0x138] sm:$0xff] %v275_v39 }
  0x30   : > { %278 = vst [vmem:[%s1662_s11 + $0x140] sm:$0xff] %v277_v40  ;;  %280 = vst [vmem:[%s1662_s11 + $0x148] sm:$0xff] %v279_v41  ;;  %v281_v42 = vld [vmem:[%s1657_s10 + $0x2a0] sm:$0xff]  ;;  %v283_v43 = vld [vmem:[%s1657_s10 + $0x2a8] sm:$0xff] }
  0x31   : > { %v285_v44 = vld [vmem:[%s1657_s10 + $0x2c0] sm:$0xff]  ;;  %282 = vst [vmem:[%s1662_s11 + $0x150] sm:$0xff] %v281_v42  ;;  %284 = vst [vmem:[%s1662_s11 + $0x158] sm:$0xff] %v283_v43  ;;  %v287_v45 = vld [vmem:[%s1657_s10 + $0x2c8] sm:$0xff] }
  0x32   : > { %286 = vst [vmem:[%s1662_s11 + $0x160] sm:$0xff] %v285_v44  ;;  %v289_v46 = vld [vmem:[%s1657_s10 + $0x2e0] sm:$0xff]  ;;  %v291_v47 = vld [vmem:[%s1657_s10 + $0x2e8] sm:$0xff]  ;;  %288 = vst [vmem:[%s1662_s11 + $0x168] sm:$0xff] %v287_v45 }
  0x33   : > { %290 = vst [vmem:[%s1662_s11 + $0x170] sm:$0xff] %v289_v46  ;;  %292 = vst [vmem:[%s1662_s11 + $0x178] sm:$0xff] %v291_v47  ;;  %v293_v48 = vld [vmem:[%s1657_s10 + $0x300] sm:$0xff]  ;;  %v295_v49 = vld [vmem:[%s1657_s10 + $0x308] sm:$0xff] }
  0x34   : > { %v297_v50 = vld [vmem:[%s1657_s10 + $0x320] sm:$0xff]  ;;  %294 = vst [vmem:[%s1662_s11 + $0x180] sm:$0xff] %v293_v48  ;;  %296 = vst [vmem:[%s1662_s11 + $0x188] sm:$0xff] %v295_v49  ;;  %v299_v51 = vld [vmem:[%s1657_s10 + $0x328] sm:$0xff] }
  0x35   : > { %298 = vst [vmem:[%s1662_s11 + $0x190] sm:$0xff] %v297_v50  ;;  %v301_v52 = vld [vmem:[%s1657_s10 + $0x340] sm:$0xff]  ;;  %v303_v53 = vld [vmem:[%s1657_s10 + $0x348] sm:$0xff]  ;;  %300 = vst [vmem:[%s1662_s11 + $0x198] sm:$0xff] %v299_v51 }
  0x36   : > { %302 = vst [vmem:[%s1662_s11 + $0x1a0] sm:$0xff] %v301_v52  ;;  %304 = vst [vmem:[%s1662_s11 + $0x1a8] sm:$0xff] %v303_v53  ;;  %v305_v54 = vld [vmem:[%s1657_s10 + $0x360] sm:$0xff]  ;;  %v307_v55 = vld [vmem:[%s1657_s10 + $0x368] sm:$0xff] }
  0x37   : > { %v309_v56 = vld [vmem:[%s1657_s10 + $0x380] sm:$0xff]  ;;  %306 = vst [vmem:[%s1662_s11 + $0x1b0] sm:$0xff] %v305_v54  ;;  %308 = vst [vmem:[%s1662_s11 + $0x1b8] sm:$0xff] %v307_v55  ;;  %v311_v57 = vld [vmem:[%s1657_s10 + $0x388] sm:$0xff] }
  0x38   : > { %310 = vst [vmem:[%s1662_s11 + $0x1c0] sm:$0xff] %v309_v56  ;;  %v313_v58 = vld [vmem:[%s1657_s10 + $0x3a0] sm:$0xff]  ;;  %v315_v59 = vld [vmem:[%s1657_s10 + $0x3a8] sm:$0xff]  ;;  %312 = vst [vmem:[%s1662_s11 + $0x1c8] sm:$0xff] %v311_v57 }
  0x39   : > { %314 = vst [vmem:[%s1662_s11 + $0x1d0] sm:$0xff] %v313_v58  ;;  %316 = vst [vmem:[%s1662_s11 + $0x1d8] sm:$0xff] %v315_v59  ;;  %v317_v60 = vld [vmem:[%s1657_s10 + $0x3c0] sm:$0xff]  ;;  %v319_v61 = vld [vmem:[%s1657_s10 + $0x3c8] sm:$0xff] }
  0x3a   : > { %v321_v62 = vld [vmem:[%s1657_s10 + $0x3e0] sm:$0xff]  ;;  %318 = vst [vmem:[%s1662_s11 + $0x1e0] sm:$0xff] %v317_v60  ;;  %320 = vst [vmem:[%s1662_s11 + $0x1e8] sm:$0xff] %v319_v61  ;;  %v323_v63 = vld [vmem:[%s1657_s10 + $0x3e8] sm:$0xff] }
  0x3b   : > { %322 = vst [vmem:[%s1662_s11 + $0x1f0] sm:$0xff] %v321_v62  ;;  %324 = vst [vmem:[%s1662_s11 + $0x1f8] sm:$0xff] %v323_v63 }
  0x3c PF: > { %p1207_p11 = scmp.ge.s32.totalorder %s1555_s20, 1  ;;  %p337_p12 = scmp.lt.s32.totalorder %s1555_s20, 5 }
  0x3e   : > { %p338_p13 = pnand %p1207_p11, %p337_p12 }
  0x3f   : > { %s344_s21 = sand.u32 (!%p338_p13), 1, %s1531_s14   ;;  %s1210_s14 = sshll.u32 (!%p338_p13), %s1543_s17, 1 }
  0x40   : > { %341 = sbr.rel (%p338_p13) target bundleno = 388 (0x184), region = 51  ;;  %s1208_s24 = sshll.u32 (!%p338_p13), %s344_s21, 9 }
  0x41   : > { %s1792_s25 = scalar_lea.vmem (!%p338_p13), [#allocation3], %s1208_s24  ;;  %p382_p0 = scmp.lt.s32.totalorder (!%p338_p13), %s1210_s14, 3 }
  0x42   : > { %v1370_v0 = vld [vmem:[%s1792_s25 + $0x4] ss:$16 sps:$4 sm:$0xff] (!%p338_p13)   ;;  %v1372_v1 = vld [vmem:[%s1792_s25 + $0xc] ss:$16 sps:$4 sm:$0xff] (!%p338_p13)   ;;  %v1374_v2 = vld [vmem:[%s1792_s25] ss:$16 sps:$4 sm:$0xff] (!%p338_p13)  }
  0x43   : > { %817 = vmatprep.subr.bf16.mxu0 (!%p338_p13), %v1370_v0  ;;  %v1375_v3 = vld [vmem:[%s1792_s25 + $0x8] ss:$16 sps:$4 sm:$0xff] (!%p338_p13)   ;;  %860 = vmatprep.subr.bf16.mxu1 (!%p338_p13), %v1372_v1  ;;  %v1376_v4 = vld [vmem:[%s1792_s25 + $0x24] ss:$16 sps:$4 sm:$0xff] (!%p338_p13)   ;;  %v1378_v5 = vld [vmem:[%s1792_s25 + $0x2c] ss:$16 sps:$4 sm:$0xff] (!%p338_p13)  }
  0x44   : > { %818 = vmatpush1.bf16.msra.mxu0 (!%p338_p13), %v1374_v2  ;;  %861 = vmatpush1.bf16.msra.mxu1 (!%p338_p13), %v1375_v3  ;;  %v1380_v6 = vld [vmem:[%s1792_s25 + $0x20] ss:$16 sps:$4 sm:$0xff] (!%p338_p13)   ;;  %v1381_v7 = vld [vmem:[%s1792_s25 + $0x28] ss:$16 sps:$4 sm:$0xff] (!%p338_p13)   ;;  %v1382_v8 = vld [vmem:[%s1792_s25 + $0x44] ss:$16 sps:$4 sm:$0xff] (!%p338_p13)   ;;  %v932_v2 = vlaneseq (!%p338_p13) }
  0x45   : > { %819 = vmatprep.subr.bf16.mxu0 (!%p338_p13), %v1376_v4  ;;  %862 = vmatprep.subr.bf16.mxu1 (!%p338_p13), %v1378_v5  ;;  %v1384_v9 = vld [vmem:[%s1792_s25 + $0x4c] ss:$16 sps:$4 sm:$0xff] (!%p338_p13)   ;;  %v1386_v10 = vld [vmem:[%s1792_s25 + $0x40] ss:$16 sps:$4 sm:$0xff] (!%p338_p13)   ;;  %v1387_v11 = vld [vmem:[%s1792_s25 + $0x48] ss:$16 sps:$4 sm:$0xff] (!%p338_p13)  }
  0x46   : > { %v1388_v12 = vld [vmem:[%s1792_s25 + $0x64] ss:$16 sps:$4 sm:$0xff] (!%p338_p13)   ;;  %v1390_v13 = vld [vmem:[%s1792_s25 + $0x6c] ss:$16 sps:$4 sm:$0xff] (!%p338_p13)   ;;  %v1392_v14 = vld [vmem:[%s1792_s25 + $0x60] ss:$16 sps:$4 sm:$0xff] (!%p338_p13)  }
  0x47   : > { %v1393_v15 = vld [vmem:[%s1792_s25 + $0x68] ss:$16 sps:$4 sm:$0xff]   ;;  %v1394_v16 = vld [vmem:[%s1792_s25 + $0x84] ss:$16 sps:$4 sm:$0xff]   ;;  %v1396_v17 = vld [vmem:[%s1792_s25 + $0x8c] ss:$16 sps:$4 sm:$0xff]  }
  0x48   : > { %820 = vmatpush1.bf16.msra.mxu0 %v1380_v6  ;;  %863 = vmatpush1.bf16.msra.mxu1 %v1381_v7  ;;  %v1398_v18 = vld [vmem:[%s1792_s25 + $0x80] ss:$16 sps:$4 sm:$0xff]   ;;  %v1399_v19 = vld [vmem:[%s1792_s25 + $0x88] ss:$16 sps:$4 sm:$0xff]   ;;  %v1400_v20 = vld [vmem:[%s1792_s25 + $0xa4] ss:$16 sps:$4 sm:$0xff]  }
  0x49   : > { %821 = vmatprep.subr.bf16.mxu0 %v1382_v8  ;;  %864 = vmatprep.subr.bf16.mxu1 %v1384_v9  ;;  %v1402_v21 = vld [vmem:[%s1792_s25 + $0xac] ss:$16 sps:$4 sm:$0xff]   ;;  %v1404_v22 = vld [vmem:[%s1792_s25 + $0xa0] ss:$16 sps:$4 sm:$0xff]   ;;  %v1405_v23 = vld [vmem:[%s1792_s25 + $0xa8] ss:$16 sps:$4 sm:$0xff]  }
  0x4a   : > { %v1406_v24 = vld [vmem:[%s1792_s25 + $0xc4] ss:$16 sps:$4 sm:$0xff]   ;;  %v1408_v25 = vld [vmem:[%s1792_s25 + $0xcc] ss:$16 sps:$4 sm:$0xff]   ;;  %v1410_v26 = vld [vmem:[%s1792_s25 + $0xc0] ss:$16 sps:$4 sm:$0xff]  }
  0x4b   : > { %v1411_v27 = vld [vmem:[%s1792_s25 + $0xc8] ss:$16 sps:$4 sm:$0xff]   ;;  %v1412_v28 = vld [vmem:[%s1792_s25 + $0xe4] ss:$16 sps:$4 sm:$0xff]   ;;  %v1414_v29 = vld [vmem:[%s1792_s25 + $0xec] ss:$16 sps:$4 sm:$0xff]  }
  0x4c   : > { %822 = vmatpush1.bf16.msra.mxu0 %v1386_v10  ;;  %865 = vmatpush1.bf16.msra.mxu1 %v1387_v11  ;;  %v1416_v30 = vld [vmem:[%s1792_s25 + $0xe0] ss:$16 sps:$4 sm:$0xff]   ;;  %v1417_v31 = vld [vmem:[%s1792_s25 + $0xe8] ss:$16 sps:$4 sm:$0xff]   ;;  %v1418_v32 = vld [vmem:[%s1792_s25 + $0x104] ss:$16 sps:$4 sm:$0xff]  }
  0x4d   : > { %823 = vmatprep.subr.bf16.mxu0 %v1388_v12  ;;  %866 = vmatprep.subr.bf16.mxu1 %v1390_v13  ;;  %v1420_v33 = vld [vmem:[%s1792_s25 + $0x10c] ss:$16 sps:$4 sm:$0xff]   ;;  %v1422_v34 = vld [vmem:[%s1792_s25 + $0x100] ss:$16 sps:$4 sm:$0xff]   ;;  %v1423_v35 = vld [vmem:[%s1792_s25 + $0x108] ss:$16 sps:$4 sm:$0xff]  }
  0x4e   : > { %v1424_v36 = vld [vmem:[%s1792_s25 + $0x124] ss:$16 sps:$4 sm:$0xff]   ;;  %v1426_v37 = vld [vmem:[%s1792_s25 + $0x12c] ss:$16 sps:$4 sm:$0xff]   ;;  %s1985_s14 = smov (!%p382_p0, %s1210_s14), 3  ;;  %s1867_s6 = sshll.u32 %s1539_s16, 2 }
  0x4f   : > { %v1428_v38 = vld [vmem:[%s1792_s25 + $0x120] ss:$16 sps:$4 sm:$0xff]   ;;  %v1429_v39 = vld [vmem:[%s1792_s25 + $0x128] ss:$16 sps:$4 sm:$0xff]   ;;  %v1430_v40 = vld [vmem:[%s1792_s25 + $0x144] ss:$16 sps:$4 sm:$0xff]  }
  0x50   : > { %824 = vmatpush1.bf16.msra.mxu0 %v1392_v14  ;;  %867 = vmatpush1.bf16.msra.mxu1 %v1393_v15  ;;  %v1432_v41 = vld [vmem:[%s1792_s25 + $0x14c] ss:$16 sps:$4 sm:$0xff]   ;;  %s1292_s26 = sshll.u32 %s1985_s14, 3  ;;  %v1434_v42 = vld [vmem:[%s1792_s25 + $0x140] ss:$16 sps:$4 sm:$0xff]   ;;  %p395_p1 = scmp.lt.s32.totalorder %s1867_s6, 7 }
  0x51   : > { %825 = vmatprep.subr.bf16.mxu0 %v1394_v16  ;;  %868 = vmatprep.subr.bf16.mxu1 %v1396_v17  ;;  %v1435_v43 = vld [vmem:[%s1792_s25 + $0x148] ss:$16 sps:$4 sm:$0xff]   ;;  %v1436_v44 = vld [vmem:[%s1792_s25 + $0x164] ss:$16 sps:$4 sm:$0xff]   ;;  %s1843_s5 = scalar_lea.vmem %s1965_s0, %s1292_s26  ;;  %v1438_v45 = vld [vmem:[%s1792_s25 + $0x16c] ss:$16 sps:$4 sm:$0xff]  }
  0x52   : > { %v1468_v46 = vld [vmem:[%s1843_s5 + $0x4] ss:$8 sps:$4 sm:$0xff]   ;;  %v1440_v47 = vld [vmem:[%s1792_s25 + $0x160] ss:$16 sps:$4 sm:$0xff]   ;;  %v1441_v48 = vld [vmem:[%s1792_s25 + $0x168] ss:$16 sps:$4 sm:$0xff]  }
  0x53   : > { %v1442_v49 = vld [vmem:[%s1792_s25 + $0x184] ss:$16 sps:$4 sm:$0xff]   ;;  %v1444_v50 = vld [vmem:[%s1792_s25 + $0x18c] ss:$16 sps:$4 sm:$0xff]   ;;  %849 = vmatprep.mubr.bf16.mxu0 %v1468_v46  ;;  %892 = vmatprep.mubr.bf16.mxu1 %v1468_v46  ;;  %v1446_v51 = vld [vmem:[%s1792_s25 + $0x180] ss:$16 sps:$4 sm:$0xff]  }
  0x54   : > { %826 = vmatpush1.bf16.msra.mxu0 %v1398_v18  ;;  %869 = vmatpush1.bf16.msra.mxu1 %v1399_v19  ;;  %v1447_v52 = vld [vmem:[%s1792_s25 + $0x188] ss:$16 sps:$4 sm:$0xff]   ;;  %v1448_v53 = vld [vmem:[%s1792_s25 + $0x1a4] ss:$16 sps:$4 sm:$0xff]   ;;  %v1450_v54 = vld [vmem:[%s1792_s25 + $0x1ac] ss:$16 sps:$4 sm:$0xff]  }
  0x55   : > { %827 = vmatprep.subr.bf16.mxu0 %v1400_v20  ;;  %870 = vmatprep.subr.bf16.mxu1 %v1402_v21  ;;  %v1452_v55 = vld [vmem:[%s1792_s25 + $0x1a0] ss:$16 sps:$4 sm:$0xff]   ;;  %v1453_v56 = vld [vmem:[%s1792_s25 + $0x1a8] ss:$16 sps:$4 sm:$0xff]   ;;  %v1454_v57 = vld [vmem:[%s1792_s25 + $0x1c4] ss:$16 sps:$4 sm:$0xff]  }
  0x56   : > { %v1456_v58 = vld [vmem:[%s1792_s25 + $0x1cc] ss:$16 sps:$4 sm:$0xff]   ;;  %v1458_v59 = vld [vmem:[%s1792_s25 + $0x1c0] ss:$16 sps:$4 sm:$0xff]   ;;  %v1459_v60 = vld [vmem:[%s1792_s25 + $0x1c8] ss:$16 sps:$4 sm:$0xff]  }
  0x57   : > { %v1460_v61 = vld [vmem:[%s1792_s25 + $0x1e4] ss:$16 sps:$4 sm:$0xff]   ;;  %v1462_v62 = vld [vmem:[%s1792_s25 + $0x1ec] ss:$16 sps:$4 sm:$0xff]   ;;  %v1464_v63 = vld [vmem:[%s1792_s25 + $0x1e0] ss:$16 sps:$4 sm:$0xff]  }
  0x58   : > { %828 = vmatpush1.bf16.msra.mxu0 %v1404_v22  ;;  %871 = vmatpush1.bf16.msra.mxu1 %v1405_v23  ;;  %v1465_v0 = vld [vmem:[%s1792_s25 + $0x1e8] ss:$16 sps:$4 sm:$0xff]   ;;  %s396_s7 = scalar_select %p395_p1, %s1867_s6, 7  ;;  %v933_v3 = vshrl.u32 %v932_v2, 7 }
  0x59   : > { %829 = vmatprep.subr.bf16.mxu0 %v1406_v24  ;;  %872 = vmatprep.subr.bf16.mxu1 %v1408_v25  ;;  %v1466_v1 = vld [vmem:[%s1843_s5] ss:$8 sps:$4 sm:$0xff]   ;;  %s377_s16 = sand.u32 1, %s1523_s12   ;;  %s1297_s21 = sshll.u32 (%p1644_p9), %s1543_s17, 4 }
  0x5a   : > { %s397_s10 = scalar_lea.vmem %s1967_s2, %s396_s7  ;;  %v934_v4 = vsub.s32 0, %v933_v3  ;;  %v942_v5 = vsub.s32 2, %v933_v3  ;;  %v938_v7 = vsub.s32 1, %v933_v3  ;;  %v946_v8 = vsub.s32 3, %v933_v3  ;;  %s1209_s11 = sshll.u32 %s377_s16, 5 }
  0x5b   : > { %v930_v6 = vld [vmem:[%s397_s10] sm:$0xf]  ;;  %s379_s12 = scalar_lea.vmem [#allocation4], %s1209_s11  ;;  %s1070_s24 = sadd.s32 (%p1644_p9), %s1297_s21, %s1867_s6 }
  0x5c   : > { %830 = vmatpush1.bf16.msra.mxu0 %v1410_v26  ;;  %873 = vmatpush1.bf16.msra.mxu1 %v1411_v27  ;;  %v935_v9 = vrot.slane %v930_v6, %v934_v4  ;;  %v943_v10 = vrot.slane %v930_v6, %v942_v5  ;;  %v939_v11 = vrot.slane %v930_v6, %v938_v7  ;;  %s1288_s25 = sshll.u32 (%p1644_p9), %s1070_s24, 2 }
  0x5d   : > { %831 = vmatprep.subr.bf16.mxu0 %v1412_v28  ;;  %874 = vmatprep.subr.bf16.mxu1 %v1414_v29  ;;  %v947_v12 = vrot.slane %v930_v6, %v946_v8  ;;  %s1072_s28 = scalar_lea.vmem (%p1644_p9), %s1968_s3, %s1288_s25 }
  0x60   : > { %832 = vmatpush1.bf16.msra.mxu0 %v1416_v30  ;;  %875 = vmatpush1.bf16.msra.mxu1 %v1417_v31 }
  0x61   : > { %833 = vmatprep.subr.bf16.mxu0 %v1418_v32  ;;  %876 = vmatprep.subr.bf16.mxu1 %v1420_v33 }
  0x64   : > { %834 = vmatpush1.bf16.msra.mxu0 %v1422_v34  ;;  %877 = vmatpush1.bf16.msra.mxu1 %v1423_v35 }
  0x65   : > { %835 = vmatprep.subr.bf16.mxu0 %v1424_v36  ;;  %878 = vmatprep.subr.bf16.mxu1 %v1426_v37 }
  0x68   : > { %836 = vmatpush1.bf16.msra.mxu0 %v1428_v38  ;;  %879 = vmatpush1.bf16.msra.mxu1 %v1429_v39 }
  0x69   : > { %837 = vmatprep.subr.bf16.mxu0 %v1430_v40  ;;  %880 = vmatprep.subr.bf16.mxu1 %v1432_v41 }
  0x6c   : > { %838 = vmatpush1.bf16.msra.mxu0 %v1434_v42  ;;  %881 = vmatpush1.bf16.msra.mxu1 %v1435_v43 }
  0x6d   : > { %839 = vmatprep.subr.bf16.mxu0 %v1436_v44  ;;  %882 = vmatprep.subr.bf16.mxu1 %v1438_v45 }
  0x70   : > { %840 = vmatpush1.bf16.msra.mxu0 %v1440_v47  ;;  %883 = vmatpush1.bf16.msra.mxu1 %v1441_v48 }
  0x71   : > { %841 = vmatprep.subr.bf16.mxu0 %v1442_v49  ;;  %884 = vmatprep.subr.bf16.mxu1 %v1444_v50 }
  0x74   : > { %842 = vmatpush1.bf16.msra.mxu0 %v1446_v51  ;;  %885 = vmatpush1.bf16.msra.mxu1 %v1447_v52 }
  0x75   : > { %843 = vmatprep.subr.bf16.mxu0 %v1448_v53  ;;  %886 = vmatprep.subr.bf16.mxu1 %v1450_v54 }
  0x78   : > { %844 = vmatpush1.bf16.msra.mxu0 %v1452_v55  ;;  %887 = vmatpush1.bf16.msra.mxu1 %v1453_v56 }
  0x79   : > { %845 = vmatprep.subr.bf16.mxu0 %v1454_v57  ;;  %888 = vmatprep.subr.bf16.mxu1 %v1456_v58 }
  0x7c   : > { %846 = vmatpush1.bf16.msra.mxu0 %v1458_v59  ;;  %889 = vmatpush1.bf16.msra.mxu1 %v1459_v60 }
  0x7d   : > { %847 = vmatprep.subr.bf16.mxu0 %v1460_v61  ;;  %890 = vmatprep.subr.bf16.mxu1 %v1462_v62 }
  0x80   : > { %848 = vmatpush1.bf16.msra.mxu0 %v1464_v63  ;;  %891 = vmatpush1.bf16.msra.mxu1 %v1465_v0 }
  0x83   : > { %850 = vmatmul.mubr.bf16.vlgmr.msra.gmra.mrb[0].mxu0 %v1466_v1  ;;  %893 = vmatmul.mubr.bf16.vlgmr.msra.gmra.mrb[0].mxu1 %v1466_v1 }
 0x156   : > { %v851_v13 = vpop.f32.mrb[0].mxu0  ;;  %v894_v14 = vpop.f32.mrb[0].mxu1 }
 0x157   : > { %v1874_v15 = vadd.f32 %v935_v9, %v851_v13  ;;  %v1876_v16 = vadd.f32 %v943_v10, %v894_v14  ;;  %v853_v17 = vpop.f32.mrb[1].mxu0  ;;  %v896_v18 = vpop.f32.mrb[1].mxu1 }
 0x158   : > { %v1878_v19 = vadd.f32 %v939_v11, %v853_v17  ;;  %v1880_v20 = vadd.f32 %v947_v12, %v896_v18  ;;  %v855_v21 = vpop.f32.mrb[2].mxu0  ;;  %v898_v22 = vpop.f32.mrb[2].mxu1 }
 0x159   : > { %v968_v23 = vmul.f32 0.044715, %v1874_v15  ;;  %v970_v24 = vmul.f32 0.044715, %v1876_v16  ;;  %v1888_v29 = vadd.f32 %v935_v9, %v855_v21  ;;  %v1890_v30 = vadd.f32 %v943_v10, %v898_v22  ;;  %v857_v31 = vpop.f32.mrb[3].mxu0  ;;  %v900_v32 = vpop.f32.mrb[3].mxu1 }
 0x15a   : > { %v969_v25 = vmul.f32 0.044715, %v1878_v19  ;;  %v971_v26 = vmul.f32 0.044715, %v1880_v20  ;;  %v1894_v35 = vadd.f32 %v939_v11, %v857_v31  ;;  %v1905_v45 = vadd.f32 %v947_v12, %v900_v32 }
 0x15b   : > { %v976_v27 = vmul.f32 %v968_v23, %v1874_v15  ;;  %v978_v28 = vmul.f32 %v970_v24, %v1876_v16  ;;  %v972_v38 = vmul.f32 0.044715, %v1888_v29  ;;  %v974_v41 = vmul.f32 0.044715, %v1890_v30 }
 0x15c   : > { %v977_v33 = vmul.f32 %v969_v25, %v1878_v19  ;;  %v979_v34 = vmul.f32 %v971_v26, %v1880_v20  ;;  %v973_v49 = vmul.f32 0.044715, %v1894_v35  ;;  %v975_v58 = vmul.f32 0.044715, %v1905_v45 }
 0x15d   : > { %v984_v36 = vmul.f32 %v976_v27, %v1874_v15  ;;  %v986_v37 = vmul.f32 %v978_v28, %v1876_v16  ;;  %v980_v44 = vmul.f32 %v972_v38, %v1888_v29  ;;  %v982_v48 = vmul.f32 %v974_v41, %v1890_v30 }
 0x15e   : > { %v985_v39 = vmul.f32 %v977_v33, %v1878_v19  ;;  %v987_v40 = vmul.f32 %v979_v34, %v1880_v20  ;;  %v981_v56 = vmul.f32 %v973_v49, %v1894_v35  ;;  %v983_v62 = vmul.f32 %v975_v58, %v1905_v45 }
 0x15f   : > { %v992_v42 = vadd.f32 %v984_v36, %v1874_v15  ;;  %v994_v43 = vadd.f32 %v986_v37, %v1876_v16  ;;  %v988_v52 = vmul.f32 %v980_v44, %v1888_v29  ;;  %v990_v55 = vmul.f32 %v982_v48, %v1890_v30 }
 0x160   : > { %v993_v46 = vadd.f32 %v985_v39, %v1878_v19  ;;  %v995_v47 = vadd.f32 %v987_v40, %v1880_v20  ;;  %v989_v60 = vmul.f32 %v981_v56, %v1894_v35  ;;  %v991_v1 = vmul.f32 %v983_v62, %v1905_v45 }
 0x161   : > { %v1000_v50 = vmul.f32 0.7978846, %v992_v42  ;;  %v1002_v51 = vmul.f32 0.7978846, %v994_v43  ;;  %v996_v57 = vadd.f32 %v988_v52, %v1888_v29  ;;  %v998_v59 = vadd.f32 %v990_v55, %v1890_v30 }
 0x162   : > { %v1001_v53 = vmul.f32 0.7978846, %v993_v46  ;;  %v1003_v54 = vmul.f32 0.7978846, %v995_v47  ;;  %v997_v0 = vadd.f32 %v989_v60, %v1894_v35  ;;  %v999_v3 = vadd.f32 %v991_v1, %v1905_v45 }
 0x163   : > { %1469 = vtanh.f32 %v1000_v50  ;;  %v1004_v61 = vmul.f32 0.7978846, %v996_v57  ;;  %v1006_v63 = vmul.f32 0.7978846, %v998_v59  ;;  %v960_v7 = vmul.f32 0.5, %v1874_v15 }
 0x164   : > { %1471 = vtanh.f32 %v1002_v51  ;;  %v1005_v2 = vmul.f32 0.7978846, %v997_v0  ;;  %v1007_v4 = vmul.f32 0.7978846, %v999_v3  ;;  %v962_v10 = vmul.f32 0.5, %v1876_v16 }
 0x165   : > { %1473 = vtanh.f32 %v1001_v53  ;;  %v961_v14 = vmul.f32 0.5, %v1878_v19  ;;  %v963_v22 = vmul.f32 0.5, %v1880_v20  ;;  %v964_v27 = vmul.f32 0.5, %v1888_v29 }
 0x166   : > { %1475 = vtanh.f32 %v1003_v54  ;;  %v965_v34 = vmul.f32 0.5, %v1894_v35  ;;  %v966_v36 = vmul.f32 0.5, %v1890_v30  ;;  %v967_v39 = vmul.f32 0.5, %v1905_v45 }
 0x167   : > { %1477 = vtanh.f32 %v1004_v61 }
 0x168   : > { %1479 = vtanh.f32 %v1006_v63 }
 0x169   : > { %1481 = vtanh.f32 %v1005_v2 }
 0x16a   : > { %1483 = vtanh.f32 %v1007_v4 }
 0x16d   : > { %v1470_v5 = vpop.eup %1469 }
 0x16e   : > { %v1472_v6 = vpop.eup %1471  ;;  %v1016_v8 = vadd.f32 1.0, %v1470_v5 }
 0x16f   : > { %v1474_v9 = vpop.eup %1473  ;;  %v1018_v11 = vadd.f32 1.0, %v1472_v6 }
 0x170   : > { %v1476_v12 = vpop.eup %1475  ;;  %v1024_v13 = vmul.f32 %v1016_v8, %v960_v7  ;;  %v1017_v17 = vadd.f32 1.0, %v1474_v9 }
 0x171   : > { %v1478_v18 = vpop.eup %1477  ;;  %v1026_v21 = vmul.f32 %v1018_v11, %v962_v10  ;;  %v1019_v23 = vadd.f32 1.0, %v1476_v12 }
 0x172   : > { %v1480_v24 = vpop.eup %1479  ;;  %v1025_v25 = vmul.f32 %v1017_v17, %v961_v14  ;;  %v1020_v26 = vadd.f32 1.0, %v1478_v18 }
 0x173   : > { %v1027_v15 = vmul.f32 %v1019_v23, %v963_v22  ;;  %v1482_v28 = vpop.eup %1481  ;;  %v1022_v31 = vadd.f32 1.0, %v1480_v24 }
 0x174   : > { %v1293_v16 = vpack.c.bf16 %v1025_v25, %v1024_v13  ;;  %v1028_v33 = vmul.f32 %v1020_v26, %v964_v27  ;;  %v1021_v19 = vadd.f32 1.0, %v1482_v28  ;;  %v1484_v20 = vpop.eup %1483 }
 0x175   : > { %v1294_v32 = vpack.c.bf16 %v1027_v15, %v1026_v21  ;;  %v1030_v38 = vmul.f32 %v1022_v31, %v966_v36  ;;  %v1023_v40 = vadd.f32 1.0, %v1484_v20  ;;  %1066 = sbr.rel (!%p1644_p9) target bundleno = 388 (0x184), region = 67 }
 0x176   : > { %1056 = vst [vmem:[%s379_s12] sm:$0xff] %v1293_v16  ;;  %v1029_v37 = vmul.f32 %v1021_v19, %v965_v34 }
 0x177   : > { %1057 = vst [vmem:[%s379_s12 + $0x8] sm:$0xff] %v1294_v32  ;;  %v1031_v41 = vmul.f32 %v1023_v40, %v967_v39 }
 0x178   : > { %v1295_v29 = vpack.c.bf16 %v1029_v37, %v1028_v33 }
 0x179   : > { %v1296_v42 = vpack.c.bf16 %v1031_v41, %v1030_v38 }
 0x17a   : > { %1058 = vst [vmem:[%s379_s12 + $0x10] sm:$0xff] %v1295_v29 }
 0x17b   : > { %1059 = vst [vmem:[%s379_s12 + $0x18] sm:$0xff] %v1296_v42 }
 0x17d   : > { %v1085_v35 = vld [vmem:[%s379_s12] sm:$0xff] }
 0x17e   : > { %v1087_v30 = vld [vmem:[%s379_s12 + $0x8] sm:$0xff]  ;;  %1086 = vst [vmem:[%s1072_s28] sm:$0xff] %v1085_v35 }
 0x17f   : > { %1088 = vst [vmem:[%s1072_s28 + $0x8] sm:$0xff] %v1087_v30 }
 0x181   : > { %v1089_v43 = vld [vmem:[%s379_s12 + $0x10] sm:$0xff] }
 0x182   : > { %v1091_v44 = vld [vmem:[%s379_s12 + $0x18] sm:$0xff]  ;;  %1090 = vst [vmem:[%s1072_s28 + $0x20] sm:$0xff] %v1089_v43 }
 0x183   : > { %1092 = vst [vmem:[%s1072_s28 + $0x28] sm:$0xff] %v1091_v44 }
 0x184 PF: > { %s13_s20 = sadd.s32 1, %s1555_s20   ;;  %s1970_s12 = smov %s1527_s13 }
 0x185   : > { %p10_p2 = scmp.ge.s32.totalorder %s13_s20, 6   ;;  %s1971_s13 = smov %s1649_s4 }
 0x186   : > { %s1972_s14 = smov %s1535_s15  ;;  %s1973_s15 = smov %s1638_s27 }
 0x187   : > { %s1974_s16 = smov %s1547_s18  ;;  %s1975_s17 = smov %s1551_s19 }
 0x188   : > { %s1976_s18 = smov %s1979_s22  ;;  %s1977_s19 = smov %s1983_s23 }
 0x189   :  { %12 = sbr.rel (!%p10_p2) target bundleno = 5 (0x5), region = 127 }

// kernel: bert_base_uncased_forward.17
= control target key start
LH: loop header
LB: loop body
LE: loop exit
PB: predicated region body
PF: predicated region fallthrough
CT: control target
= control target key end

     0   :  { %s2009_s21 = smov 0   ;;  %s2011_s22 = smov 0   ;;  %s2485_s0 = inlined_call_operand.vmem [shape: bf16[32,1024], index: 0, kind: input, shape index: {}]   ;;  %s2486_s1 = inlined_call_operand.vmem [shape: bf16[1024,256], index: 1, kind: input, shape index: {}]   ;;  %s2487_s2 = inlined_call_operand.vmem [shape: f32[1,256], index: 2, kind: input, shape index: {}]   ;;  %s2488_s3 = inlined_call_operand.vmem [shape: bf16[32,256], index: 3, kind: input, shape index: {}]   ;;  %s2489_s4 = inlined_call_operand.vmem [shape: f32[1,256], index: 4, kind: input, shape index: {}]   ;;  %s2490_s5 = inlined_call_operand.vmem [shape: f32[1,256], index: 5, kind: input, shape index: {}]   ;;  %s2491_s6 = inlined_call_operand.vmem [shape: bf16[32,256], index: 6, kind: output, shape index: {}]  }
   0x1   :  { %s2013_s23 = smov 0  }
   0x2 LB: > { %s28_s24 = sadd.s32 1, %s1968_s22  ;;  %p1563_p0 = scmp.ge.s32.totalorder %s1972_s23, 1  ;;  %s1972_s23 = sphi %s2013_s23, %s16_s23   ;;  %s1968_s22 = sphi %s2011_s22, %s2493_s22   ;;  %s1964_s21 = sphi %s2009_s21, %s2492_s21  }
   0x3   : > { %p30_p1 = scmp.ge.s32.totalorder %s28_s24, 2  ;;  %p257_p2 = scmp.lt.s32.totalorder %s1972_s23, 3 }
   0x5   : > { %s2495_s24 = smov (%p30_p1, %s28_s24), 0  ;;  %p258_p3 = pnand %p1563_p0, %p257_p2 }
   0x6   : > { %v1754_v0 = vld [vmem:[%s2486_s1 + $0x4] ss:$8 sps:$4 sm:$0xff] (!%p258_p3)   ;;  %v1758_v2 = vld [vmem:[%s2486_s1] ss:$8 sps:$4 sm:$0xff] (!%p258_p3)   ;;  %v1760_v4 = vld [vmem:[%s2486_s1 + $0x14] ss:$8 sps:$4 sm:$0xff] (!%p258_p3)  }
   0x7   : > { %261 = sbr.rel (%p258_p3) target bundleno = 677 (0x2a5), region = 44  ;;  %v1756_v1 = vld [vmem:[%s2486_s1 + $0x204] ss:$8 sps:$4 sm:$0xff] (!%p258_p3)   ;;  %1166 = vmatprep.subr.bf16.mxu1 (!%p258_p3), %v1754_v0  ;;  %v1759_v3 = vld [vmem:[%s2486_s1 + $0x200] ss:$8 sps:$4 sm:$0xff] (!%p258_p3)   ;;  %s1564_s25 = sshll.u32 (!%p258_p3), %s1964_s21, 1 }
   0x8   : > { %1252 = vmatprep.subr.bf16.mxu0 (!%p258_p3), %v1756_v1  ;;  %1167 = vmatpush1.bf16.msra.mxu1 (!%p258_p3), %v1758_v2  ;;  %v1762_v5 = vld [vmem:[%s2486_s1 + $0x214] ss:$8 sps:$4 sm:$0xff] (!%p258_p3)   ;;  %v1764_v6 = vld [vmem:[%s2486_s1 + $0x10] ss:$8 sps:$4 sm:$0xff] (!%p258_p3)   ;;  %v1766_v8 = vld [vmem:[%s2486_s1 + $0x24] ss:$8 sps:$4 sm:$0xff] (!%p258_p3)  }
   0x9   : > { %1253 = vmatpush1.bf16.msra.mxu0 (!%p258_p3), %v1759_v3  ;;  %1168 = vmatprep.subr.bf16.mxu1 (!%p258_p3), %v1760_v4  ;;  %v1765_v7 = vld [vmem:[%s2486_s1 + $0x210] ss:$8 sps:$4 sm:$0xff] (!%p258_p3)   ;;  %v1768_v9 = vld [vmem:[%s2486_s1 + $0x224] ss:$8 sps:$4 sm:$0xff] (!%p258_p3)   ;;  %v1770_v10 = vld [vmem:[%s2486_s1 + $0x20] ss:$8 sps:$4 sm:$0xff] (!%p258_p3)  }
   0xa   : > { %1254 = vmatprep.subr.bf16.mxu0 (!%p258_p3), %v1762_v5  ;;  %v1771_v11 = vld [vmem:[%s2486_s1 + $0x220] ss:$8 sps:$4 sm:$0xff] (!%p258_p3)   ;;  %v1772_v12 = vld [vmem:[%s2486_s1 + $0x34] ss:$8 sps:$4 sm:$0xff] (!%p258_p3)   ;;  %v1776_v14 = vld [vmem:[%s2486_s1 + $0x30] ss:$8 sps:$4 sm:$0xff] (!%p258_p3)  }
   0xb   : > { %v1774_v13 = vld [vmem:[%s2486_s1 + $0x234] ss:$8 sps:$4 sm:$0xff] (!%p258_p3)   ;;  %v1777_v15 = vld [vmem:[%s2486_s1 + $0x230] ss:$8 sps:$4 sm:$0xff] (!%p258_p3)   ;;  %v1778_v16 = vld [vmem:[%s2486_s1 + $0x44] ss:$8 sps:$4 sm:$0xff] (!%p258_p3)  }
   0xc   : > { %1169 = vmatpush1.bf16.msra.mxu1 (!%p258_p3), %v1764_v6  ;;  %v1780_v17 = vld [vmem:[%s2486_s1 + $0x244] ss:$8 sps:$4 sm:$0xff] (!%p258_p3)   ;;  %v1782_v18 = vld [vmem:[%s2486_s1 + $0x40] ss:$8 sps:$4 sm:$0xff] (!%p258_p3)   ;;  %v1784_v20 = vld [vmem:[%s2486_s1 + $0x54] ss:$8 sps:$4 sm:$0xff] (!%p258_p3)  }
   0xd   : > { %1255 = vmatpush1.bf16.msra.mxu0 (!%p258_p3), %v1765_v7  ;;  %1170 = vmatprep.subr.bf16.mxu1 (!%p258_p3), %v1766_v8  ;;  %v1783_v19 = vld [vmem:[%s2486_s1 + $0x240] ss:$8 sps:$4 sm:$0xff] (!%p258_p3)   ;;  %v1786_v21 = vld [vmem:[%s2486_s1 + $0x254] ss:$8 sps:$4 sm:$0xff] (!%p258_p3)   ;;  %v1788_v22 = vld [vmem:[%s2486_s1 + $0x50] ss:$8 sps:$4 sm:$0xff] (!%p258_p3)  }
   0xe   : > { %1256 = vmatprep.subr.bf16.mxu0 %v1768_v9  ;;  %v1789_v23 = vld [vmem:[%s2486_s1 + $0x250] ss:$8 sps:$4 sm:$0xff]   ;;  %v1790_v24 = vld [vmem:[%s2486_s1 + $0x64] ss:$8 sps:$4 sm:$0xff]   ;;  %v1794_v26 = vld [vmem:[%s2486_s1 + $0x60] ss:$8 sps:$4 sm:$0xff]  }
   0xf   : > { %v1792_v25 = vld [vmem:[%s2486_s1 + $0x264] ss:$8 sps:$4 sm:$0xff]   ;;  %v1795_v27 = vld [vmem:[%s2486_s1 + $0x260] ss:$8 sps:$4 sm:$0xff]   ;;  %v1796_v28 = vld [vmem:[%s2486_s1 + $0x74] ss:$8 sps:$4 sm:$0xff]  }
  0x10   : > { %1171 = vmatpush1.bf16.msra.mxu1 %v1770_v10  ;;  %v1798_v29 = vld [vmem:[%s2486_s1 + $0x274] ss:$8 sps:$4 sm:$0xff]   ;;  %v1800_v30 = vld [vmem:[%s2486_s1 + $0x70] ss:$8 sps:$4 sm:$0xff]   ;;  %v1802_v32 = vld [vmem:[%s2486_s1 + $0x84] ss:$8 sps:$4 sm:$0xff]  }
  0x11   : > { %1257 = vmatpush1.bf16.msra.mxu0 %v1771_v11  ;;  %1172 = vmatprep.subr.bf16.mxu1 %v1772_v12  ;;  %v1801_v31 = vld [vmem:[%s2486_s1 + $0x270] ss:$8 sps:$4 sm:$0xff]   ;;  %p307_p4 = scmp.lt.s32.totalorder %s1564_s25, 3  ;;  %v1804_v33 = vld [vmem:[%s2486_s1 + $0x284] ss:$8 sps:$4 sm:$0xff]  }
  0x12   : > { %1258 = vmatprep.subr.bf16.mxu0 %v1774_v13  ;;  %v1806_v34 = vld [vmem:[%s2486_s1 + $0x80] ss:$8 sps:$4 sm:$0xff]   ;;  %v1808_v36 = vld [vmem:[%s2486_s1 + $0x94] ss:$8 sps:$4 sm:$0xff]   ;;  %v1812_v38 = vld [vmem:[%s2486_s1 + $0x90] ss:$8 sps:$4 sm:$0xff]  }
  0x13   : > { %v1807_v35 = vld [vmem:[%s2486_s1 + $0x280] ss:$8 sps:$4 sm:$0xff]   ;;  %s2497_s25 = smov (!%p307_p4, %s1564_s25), 3  ;;  %v1810_v37 = vld [vmem:[%s2486_s1 + $0x294] ss:$8 sps:$4 sm:$0xff]  }
  0x14   : > { %1173 = vmatpush1.bf16.msra.mxu1 %v1776_v14  ;;  %v1813_v39 = vld [vmem:[%s2486_s1 + $0x290] ss:$8 sps:$4 sm:$0xff]   ;;  %v1814_v40 = vld [vmem:[%s2486_s1 + $0xa4] ss:$8 sps:$4 sm:$0xff]   ;;  %s1713_s28 = sshll.u32 %s2497_s25, 5  ;;  %s1714_s30 = sshll.u32 %s2497_s25, 3 }
  0x15   : > { %1259 = vmatpush1.bf16.msra.mxu0 %v1777_v15  ;;  %1174 = vmatprep.subr.bf16.mxu1 %v1778_v16  ;;  %v1816_v41 = vld [vmem:[%s2486_s1 + $0x2a4] ss:$8 sps:$4 sm:$0xff]   ;;  %v1818_v42 = vld [vmem:[%s2486_s1 + $0xa0] ss:$8 sps:$4 sm:$0xff]   ;;  %s2168_s12 = scalar_lea.vmem %s2485_s0, %s1713_s28  ;;  %v1820_v44 = vld [vmem:[%s2486_s1 + $0xb4] ss:$8 sps:$4 sm:$0xff]   ;;  %s329_s9 = scalar_lea.vmem %s2488_s3, %s1714_s30 }
  0x16   : > { %1260 = vmatprep.subr.bf16.mxu0 %v1780_v17  ;;  %v1819_v43 = vld [vmem:[%s2486_s1 + $0x2a0] ss:$8 sps:$4 sm:$0xff]   ;;  %v1822_v45 = vld [vmem:[%s2486_s1 + $0x2b4] ss:$8 sps:$4 sm:$0xff]   ;;  %v1824_v46 = vld [vmem:[%s2486_s1 + $0xb0] ss:$8 sps:$4 sm:$0xff]   ;;  %s336_s17 = scalar_lea.vmem %s2491_s6, %s1714_s30 }
  0x17   : > { %v1825_v47 = vld [vmem:[%s2486_s1 + $0x2b0] ss:$8 sps:$4 sm:$0xff]   ;;  %v350_v48 = vld [vmem:[%s2168_s12] sm:$0xff]  ;;  %v1832_v58 = vld [vmem:[%s2486_s1 + $0xd4] ss:$8 sps:$4 sm:$0xff]  }
  0x18   : > { %1175 = vmatpush1.bf16.msra.mxu1 %v1782_v18  ;;  %v354_v49 = vld [vmem:[%s2168_s12 + $0x20] sm:$0xff]  ;;  %v352_v53 = vld [vmem:[%s2168_s12 + $0x10] sm:$0xff] }
  0x19   : > { %1261 = vmatpush1.bf16.msra.mxu0 %v1783_v19  ;;  %1176 = vmatprep.subr.bf16.mxu1 %v1784_v20  ;;  %v1826_v50 = vld [vmem:[%s2486_s1 + $0xc4] ss:$8 sps:$4 sm:$0xff]   ;;  %v1574_v52 = vcombine.high %v350_v48, %v354_v49  ;;  %v356_v54 = vld [vmem:[%s2168_s12 + $0x30] sm:$0xff]  ;;  %v1830_v56 = vld [vmem:[%s2486_s1 + $0xc0] ss:$8 sps:$4 sm:$0xff]   ;;  %v1573_v8 = vcombine.low %v350_v48, %v354_v49 }
  0x1a   : > { %1262 = vmatprep.subr.bf16.mxu0 %v1786_v21  ;;  %v1828_v51 = vld [vmem:[%s2486_s1 + $0x2c4] ss:$8 sps:$4 sm:$0xff]   ;;  %v1578_v55 = vcombine.high %v352_v53, %v356_v54  ;;  %v1831_v57 = vld [vmem:[%s2486_s1 + $0x2c0] ss:$8 sps:$4 sm:$0xff]   ;;  %v1834_v59 = vld [vmem:[%s2486_s1 + $0x2d4] ss:$8 sps:$4 sm:$0xff]   ;;  %v1577_v10 = vcombine.low %v352_v53, %v356_v54 }
  0x1b   : > { %1198 = vmatprep.mubr.bf16.mxu1 %v1574_v52  ;;  %v1836_v60 = vld [vmem:[%s2486_s1 + $0xd0] ss:$8 sps:$4 sm:$0xff]   ;;  %v1838_v62 = vld [vmem:[%s2486_s1 + $0xe4] ss:$8 sps:$4 sm:$0xff]   ;;  %v1842_v0 = vld [vmem:[%s2486_s1 + $0xe0] ss:$8 sps:$4 sm:$0xff]  }
  0x1c   : > { %1177 = vmatpush1.bf16.msra.mxu1 %v1788_v22  ;;  %1284 = vmatprep.mubr.bf16.mxu0 %v1578_v55  ;;  %v1837_v61 = vld [vmem:[%s2486_s1 + $0x2d0] ss:$8 sps:$4 sm:$0xff]   ;;  %v1840_v63 = vld [vmem:[%s2486_s1 + $0x2e4] ss:$8 sps:$4 sm:$0xff]   ;;  %v1843_v1 = vld [vmem:[%s2486_s1 + $0x2e0] ss:$8 sps:$4 sm:$0xff]  }
  0x1d   : > { %1263 = vmatpush1.bf16.msra.mxu0 %v1789_v23  ;;  %1178 = vmatprep.subr.bf16.mxu1 %v1790_v24  ;;  %v1844_v2 = vld [vmem:[%s2486_s1 + $0xf4] ss:$8 sps:$4 sm:$0xff]   ;;  %v1848_v4 = vld [vmem:[%s2486_s1 + $0xf0] ss:$8 sps:$4 sm:$0xff]   ;;  %v1852_v6 = vld [vmem:[%s2486_s1 + $0x104] ss:$8 sps:$4 sm:$0xff]  }
  0x1e   : > { %1264 = vmatprep.subr.bf16.mxu0 %v1792_v25  ;;  %v1846_v3 = vld [vmem:[%s2486_s1 + $0x2f4] ss:$8 sps:$4 sm:$0xff]   ;;  %v1849_v5 = vld [vmem:[%s2486_s1 + $0x2f0] ss:$8 sps:$4 sm:$0xff]   ;;  %v1855_v7 = vld [vmem:[%s2486_s1 + $0x304] ss:$8 sps:$4 sm:$0xff]  }
  0x1f   : > { %v1850_v9 = vld [vmem:[%s2486_s1 + $0x100] ss:$8 sps:$4 sm:$0xff]   ;;  %v1858_v12 = vld [vmem:[%s2486_s1 + $0x114] ss:$8 sps:$4 sm:$0xff]   ;;  %v1856_v14 = vld [vmem:[%s2486_s1 + $0x110] ss:$8 sps:$4 sm:$0xff]  }
  0x20   : > { %1179 = vmatpush1.bf16.msra.mxu1 %v1794_v26  ;;  %v1853_v11 = vld [vmem:[%s2486_s1 + $0x300] ss:$8 sps:$4 sm:$0xff]   ;;  %v1861_v13 = vld [vmem:[%s2486_s1 + $0x314] ss:$8 sps:$4 sm:$0xff]   ;;  %v1859_v15 = vld [vmem:[%s2486_s1 + $0x310] ss:$8 sps:$4 sm:$0xff]  }
  0x21   : > { %1265 = vmatpush1.bf16.msra.mxu0 %v1795_v27  ;;  %1180 = vmatprep.subr.bf16.mxu1 %v1796_v28  ;;  %v1864_v16 = vld [vmem:[%s2486_s1 + $0x124] ss:$8 sps:$4 sm:$0xff]   ;;  %v1862_v18 = vld [vmem:[%s2486_s1 + $0x120] ss:$8 sps:$4 sm:$0xff]   ;;  %v1870_v20 = vld [vmem:[%s2486_s1 + $0x134] ss:$8 sps:$4 sm:$0xff]  }
  0x22   : > { %1266 = vmatprep.subr.bf16.mxu0 %v1798_v29  ;;  %v1867_v17 = vld [vmem:[%s2486_s1 + $0x324] ss:$8 sps:$4 sm:$0xff]   ;;  %v1865_v19 = vld [vmem:[%s2486_s1 + $0x320] ss:$8 sps:$4 sm:$0xff]   ;;  %v1873_v21 = vld [vmem:[%s2486_s1 + $0x334] ss:$8 sps:$4 sm:$0xff]  }
  0x23   : > { %v1868_v22 = vld [vmem:[%s2486_s1 + $0x130] ss:$8 sps:$4 sm:$0xff]   ;;  %v1876_v24 = vld [vmem:[%s2486_s1 + $0x144] ss:$8 sps:$4 sm:$0xff]   ;;  %v1874_v26 = vld [vmem:[%s2486_s1 + $0x140] ss:$8 sps:$4 sm:$0xff]  }
  0x24   : > { %1181 = vmatpush1.bf16.msra.mxu1 %v1800_v30  ;;  %v1871_v23 = vld [vmem:[%s2486_s1 + $0x330] ss:$8 sps:$4 sm:$0xff]   ;;  %v1879_v25 = vld [vmem:[%s2486_s1 + $0x344] ss:$8 sps:$4 sm:$0xff]   ;;  %v1877_v27 = vld [vmem:[%s2486_s1 + $0x340] ss:$8 sps:$4 sm:$0xff]  }
  0x25   : > { %1267 = vmatpush1.bf16.msra.mxu0 %v1801_v31  ;;  %1182 = vmatprep.subr.bf16.mxu1 %v1802_v32  ;;  %v1882_v28 = vld [vmem:[%s2486_s1 + $0x154] ss:$8 sps:$4 sm:$0xff]   ;;  %v1880_v30 = vld [vmem:[%s2486_s1 + $0x150] ss:$8 sps:$4 sm:$0xff]   ;;  %v1888_v32 = vld [vmem:[%s2486_s1 + $0x164] ss:$8 sps:$4 sm:$0xff]  }
  0x26   : > { %1268 = vmatprep.subr.bf16.mxu0 %v1804_v33  ;;  %v1885_v29 = vld [vmem:[%s2486_s1 + $0x354] ss:$8 sps:$4 sm:$0xff]   ;;  %v1883_v31 = vld [vmem:[%s2486_s1 + $0x350] ss:$8 sps:$4 sm:$0xff]   ;;  %v1891_v33 = vld [vmem:[%s2486_s1 + $0x364] ss:$8 sps:$4 sm:$0xff]  }
  0x27   : > { %v1898_v48 = vld [vmem:[%s2486_s1 + $0x180] ss:$8 sps:$4 sm:$0xff]   ;;  %v1904_v52 = vld [vmem:[%s2486_s1 + $0x190] ss:$8 sps:$4 sm:$0xff]   ;;  %v1912_v54 = vld [vmem:[%s2486_s1 + $0x1a4] ss:$8 sps:$4 sm:$0xff]  }
  0x28   : > { %1183 = vmatpush1.bf16.msra.mxu1 %v1806_v34  ;;  %v2313_v34 = vld [vmem:[%s2168_s12 + $0x8] sm:$0xff]  ;;  %v1907_v53 = vld [vmem:[%s2486_s1 + $0x390] ss:$8 sps:$4 sm:$0xff]  }
  0x29   : > { %1269 = vmatpush1.bf16.msra.mxu0 %v1807_v35  ;;  %1184 = vmatprep.subr.bf16.mxu1 %v1808_v36  ;;  %v2316_v35 = vld [vmem:[%s2168_s12 + $0x28] sm:$0xff]  ;;  %v2319_v36 = vld [vmem:[%s2168_s12 + $0x18] sm:$0xff] }
  0x2a   : > { %1270 = vmatprep.subr.bf16.mxu0 %v1810_v37  ;;  %v2322_v37 = vld [vmem:[%s2168_s12 + $0x38] sm:$0xff]  ;;  %v1901_v49 = vld [vmem:[%s2486_s1 + $0x380] ss:$8 sps:$4 sm:$0xff]   ;;  %v1915_v55 = vld [vmem:[%s2486_s1 + $0x3a4] ss:$8 sps:$4 sm:$0xff]  }
  0x2c   : > { %1185 = vmatpush1.bf16.msra.mxu1 %v1812_v38  ;;  %v1886_v38 = vld [vmem:[%s2486_s1 + $0x160] ss:$8 sps:$4 sm:$0xff]  }
  0x2d   : > { %1271 = vmatpush1.bf16.msra.mxu0 %v1813_v39  ;;  %1186 = vmatprep.subr.bf16.mxu1 %v1814_v40  ;;  %v1889_v39 = vld [vmem:[%s2486_s1 + $0x360] ss:$8 sps:$4 sm:$0xff]   ;;  %v1576_v40 = vcombine.high %v2313_v34, %v2316_v35 }
  0x2e   : > { %1272 = vmatprep.subr.bf16.mxu0 %v1816_v41  ;;  %v1894_v41 = vld [vmem:[%s2486_s1 + $0x174] ss:$8 sps:$4 sm:$0xff]  }
  0x30   : > { %1187 = vmatpush1.bf16.msra.mxu1 %v1818_v42  ;;  %v1897_v42 = vld [vmem:[%s2486_s1 + $0x374] ss:$8 sps:$4 sm:$0xff]  }
  0x31   : > { %1273 = vmatpush1.bf16.msra.mxu0 %v1819_v43  ;;  %1188 = vmatprep.subr.bf16.mxu1 %v1820_v44  ;;  %v1580_v43 = vcombine.high %v2319_v36, %v2322_v37  ;;  %v1892_v44 = vld [vmem:[%s2486_s1 + $0x170] ss:$8 sps:$4 sm:$0xff]  }
  0x32   : > { %1274 = vmatprep.subr.bf16.mxu0 %v1822_v45  ;;  %v1895_v45 = vld [vmem:[%s2486_s1 + $0x370] ss:$8 sps:$4 sm:$0xff]  }
  0x34   : > { %1189 = vmatpush1.bf16.msra.mxu1 %v1824_v46  ;;  %v1900_v46 = vld [vmem:[%s2486_s1 + $0x184] ss:$8 sps:$4 sm:$0xff]  }
  0x35   : > { %1275 = vmatpush1.bf16.msra.mxu0 %v1825_v47  ;;  %1190 = vmatprep.subr.bf16.mxu1 %v1826_v50  ;;  %v1903_v47 = vld [vmem:[%s2486_s1 + $0x384] ss:$8 sps:$4 sm:$0xff]   ;;  %v1906_v50 = vld [vmem:[%s2486_s1 + $0x194] ss:$8 sps:$4 sm:$0xff]  }
  0x36   : > { %1276 = vmatprep.subr.bf16.mxu0 %v1828_v51  ;;  %v1909_v51 = vld [vmem:[%s2486_s1 + $0x394] ss:$8 sps:$4 sm:$0xff]  }
  0x38   : > { %1191 = vmatpush1.bf16.msra.mxu1 %v1830_v56  ;;  %v1910_v56 = vld [vmem:[%s2486_s1 + $0x1a0] ss:$8 sps:$4 sm:$0xff]  }
  0x39   : > { %1277 = vmatpush1.bf16.msra.mxu0 %v1831_v57  ;;  %1192 = vmatprep.subr.bf16.mxu1 %v1832_v58  ;;  %v1913_v57 = vld [vmem:[%s2486_s1 + $0x3a0] ss:$8 sps:$4 sm:$0xff]   ;;  %v1918_v58 = vld [vmem:[%s2486_s1 + $0x1b4] ss:$8 sps:$4 sm:$0xff]  }
  0x3a   : > { %1278 = vmatprep.subr.bf16.mxu0 %v1834_v59  ;;  %v1921_v59 = vld [vmem:[%s2486_s1 + $0x3b4] ss:$8 sps:$4 sm:$0xff]  }
  0x3c   : > { %1193 = vmatpush1.bf16.msra.mxu1 %v1836_v60  ;;  %v1916_v60 = vld [vmem:[%s2486_s1 + $0x1b0] ss:$8 sps:$4 sm:$0xff]  }
  0x3d   : > { %1279 = vmatpush1.bf16.msra.mxu0 %v1837_v61  ;;  %1194 = vmatprep.subr.bf16.mxu1 %v1838_v62  ;;  %v1919_v61 = vld [vmem:[%s2486_s1 + $0x3b0] ss:$8 sps:$4 sm:$0xff]   ;;  %v1924_v62 = vld [vmem:[%s2486_s1 + $0x1c4] ss:$8 sps:$4 sm:$0xff]  }
  0x3e   : > { %1280 = vmatprep.subr.bf16.mxu0 %v1840_v63  ;;  %v1927_v63 = vld [vmem:[%s2486_s1 + $0x3c4] ss:$8 sps:$4 sm:$0xff]  }
  0x40   : > { %1195 = vmatpush1.bf16.msra.mxu1 %v1842_v0  ;;  %v1922_v0 = vld [vmem:[%s2486_s1 + $0x1c0] ss:$8 sps:$4 sm:$0xff]  }
  0x41   : > { %1281 = vmatpush1.bf16.msra.mxu0 %v1843_v1  ;;  %1196 = vmatprep.subr.bf16.mxu1 %v1844_v2  ;;  %v1925_v1 = vld [vmem:[%s2486_s1 + $0x3c0] ss:$8 sps:$4 sm:$0xff]   ;;  %v1930_v2 = vld [vmem:[%s2486_s1 + $0x1d4] ss:$8 sps:$4 sm:$0xff]  }
  0x42   : > { %1282 = vmatprep.subr.bf16.mxu0 %v1846_v3  ;;  %v1933_v3 = vld [vmem:[%s2486_s1 + $0x3d4] ss:$8 sps:$4 sm:$0xff]  }
  0x44   : > { %1197 = vmatpush1.bf16.msra.mxu1 %v1848_v4  ;;  %v1928_v4 = vld [vmem:[%s2486_s1 + $0x1d0] ss:$8 sps:$4 sm:$0xff]  }
  0x45   : > { %1283 = vmatpush1.bf16.msra.mxu0 %v1849_v5  ;;  %1209 = vmatprep.subr.bf16.mxu1 %v1852_v6  ;;  %v1931_v5 = vld [vmem:[%s2486_s1 + $0x3d0] ss:$8 sps:$4 sm:$0xff]   ;;  %v1936_v6 = vld [vmem:[%s2486_s1 + $0x1e4] ss:$8 sps:$4 sm:$0xff]  }
  0x46   : > { %1295 = vmatprep.subr.bf16.mxu0 %v1855_v7  ;;  %v1939_v7 = vld [vmem:[%s2486_s1 + $0x3e4] ss:$8 sps:$4 sm:$0xff]  }
  0x47   : > { %1199 = vmatmul.mubr.bf16.vlgmr.msra.gmra.mrb[0].mxu1 %v1573_v8  ;;  %v1934_v8 = vld [vmem:[%s2486_s1 + $0x1e0] ss:$8 sps:$4 sm:$0xff]  }
  0x48   : > { %1285 = vmatmul.mubr.bf16.vlgmr.msra.gmra.mrb[0].mxu0 %v1577_v10  ;;  %1210 = vmatpush1.bf16.msra.mxu1 %v1850_v9  ;;  %v1937_v9 = vld [vmem:[%s2486_s1 + $0x3e0] ss:$8 sps:$4 sm:$0xff]   ;;  %v1942_v10 = vld [vmem:[%s2486_s1 + $0x1f4] ss:$8 sps:$4 sm:$0xff]  }
  0x49   : > { %1296 = vmatpush1.bf16.msra.mxu0 %v1853_v11  ;;  %1211 = vmatprep.subr.bf16.mxu1 %v1858_v12  ;;  %v1945_v11 = vld [vmem:[%s2486_s1 + $0x3f4] ss:$8 sps:$4 sm:$0xff]   ;;  %v1940_v12 = vld [vmem:[%s2486_s1 + $0x1f0] ss:$8 sps:$4 sm:$0xff]  }
  0x4a   : > { %1297 = vmatprep.subr.bf16.mxu0 %v1861_v13  ;;  %1241 = vmatprep.mubr.bf16.mxu1 %v1576_v40  ;;  %v1943_v13 = vld [vmem:[%s2486_s1 + $0x3f0] ss:$8 sps:$4 sm:$0xff]  }
  0x4b   : > { %1327 = vmatprep.mubr.bf16.mxu0 %v1580_v43 }
  0x4c   : > { %1212 = vmatpush1.bf16.msra.mxu1 %v1856_v14  ;;  %v1575_v14 = vcombine.low %v2313_v34, %v2316_v35 }
  0x4d   : > { %1298 = vmatpush1.bf16.msra.mxu0 %v1859_v15  ;;  %1213 = vmatprep.subr.bf16.mxu1 %v1864_v16  ;;  %v1579_v15 = vcombine.low %v2319_v36, %v2322_v37  ;;  %v1355_v16 = vlaneseq }
  0x4e   : > { %1299 = vmatprep.subr.bf16.mxu0 %v1867_v17 }
  0x4f   : > { %v1356_v17 = vshrl.u32 %v1355_v16, 7 }
  0x50   : > { %1214 = vmatpush1.bf16.msra.mxu1 %v1862_v18 }
  0x51   : > { %1300 = vmatpush1.bf16.msra.mxu0 %v1865_v19  ;;  %1215 = vmatprep.subr.bf16.mxu1 %v1870_v20  ;;  %v2447_v18 = vsub.s32 0, %v1356_v17  ;;  %v1353_v19 = vld [vmem:[%s2487_s2] sm:$0x3]  ;;  %v2457_v20 = vsub.s32 1, %v1356_v17 }
  0x52   : > { %1301 = vmatprep.subr.bf16.mxu0 %v1873_v21  ;;  %v1369_v21 = vld [vmem:[%s329_s9] sm:$0xff] }
  0x53   : > { %v1372_v34 = vunpack.c.h.bf16 %v1369_v21 }
  0x54   : > { %1216 = vmatpush1.bf16.msra.mxu1 %v1868_v22  ;;  %v1358_v22 = vrot.slane %v1353_v19, %v2447_v18 }
  0x55   : > { %1302 = vmatpush1.bf16.msra.mxu0 %v1871_v23  ;;  %1217 = vmatprep.subr.bf16.mxu1 %v1876_v24 }
  0x56   : > { %1303 = vmatprep.subr.bf16.mxu0 %v1879_v25  ;;  %v1362_v25 = vrot.slane %v1353_v19, %v2457_v20 }
  0x58   : > { %1218 = vmatpush1.bf16.msra.mxu1 %v1874_v26 }
  0x59   : > { %1304 = vmatpush1.bf16.msra.mxu0 %v1877_v27  ;;  %1219 = vmatprep.subr.bf16.mxu1 %v1882_v28 }
  0x5a   : > { %1305 = vmatprep.subr.bf16.mxu0 %v1885_v29  ;;  %v1371_v29 = vunpack.c.l.bf16 %v1369_v21 }
  0x5c   : > { %1220 = vmatpush1.bf16.msra.mxu1 %v1880_v30  ;;  %v1370_v30 = vld [vmem:[%s329_s9 + $0x8] sm:$0xff] }
  0x5d   : > { %1306 = vmatpush1.bf16.msra.mxu0 %v1883_v31  ;;  %1221 = vmatprep.subr.bf16.mxu1 %v1888_v32 }
  0x5e   : > { %1307 = vmatprep.subr.bf16.mxu0 %v1891_v33 }
  0x60   : > { %1222 = vmatpush1.bf16.msra.mxu1 %v1886_v38 }
  0x61   : > { %1308 = vmatpush1.bf16.msra.mxu0 %v1889_v39  ;;  %1223 = vmatprep.subr.bf16.mxu1 %v1894_v41  ;;  %v1373_v41 = vunpack.c.l.bf16 %v1370_v30 }
  0x62   : > { %1309 = vmatprep.subr.bf16.mxu0 %v1897_v42  ;;  %v1374_v42 = vunpack.c.h.bf16 %v1370_v30 }
  0x64   : > { %1224 = vmatpush1.bf16.msra.mxu1 %v1892_v44 }
  0x65   : > { %1310 = vmatpush1.bf16.msra.mxu0 %v1895_v45  ;;  %1225 = vmatprep.subr.bf16.mxu1 %v1900_v46 }
  0x66   : > { %1311 = vmatprep.subr.bf16.mxu0 %v1903_v47 }
  0x68   : > { %1226 = vmatpush1.bf16.msra.mxu1 %v1898_v48 }
  0x69   : > { %1312 = vmatpush1.bf16.msra.mxu0 %v1901_v49  ;;  %1227 = vmatprep.subr.bf16.mxu1 %v1906_v50 }
  0x6a   : > { %1313 = vmatprep.subr.bf16.mxu0 %v1909_v51 }
  0x6c   : > { %1228 = vmatpush1.bf16.msra.mxu1 %v1904_v52 }
  0x6d   : > { %1314 = vmatpush1.bf16.msra.mxu0 %v1907_v53  ;;  %1229 = vmatprep.subr.bf16.mxu1 %v1912_v54 }
  0x6e   : > { %1315 = vmatprep.subr.bf16.mxu0 %v1915_v55 }
  0x70   : > { %1230 = vmatpush1.bf16.msra.mxu1 %v1910_v56 }
  0x71   : > { %1316 = vmatpush1.bf16.msra.mxu0 %v1913_v57  ;;  %1231 = vmatprep.subr.bf16.mxu1 %v1918_v58 }
  0x72   : > { %1317 = vmatprep.subr.bf16.mxu0 %v1921_v59 }
  0x74   : > { %1232 = vmatpush1.bf16.msra.mxu1 %v1916_v60 }
  0x75   : > { %1318 = vmatpush1.bf16.msra.mxu0 %v1919_v61  ;;  %1233 = vmatprep.subr.bf16.mxu1 %v1924_v62 }
  0x76   : > { %1319 = vmatprep.subr.bf16.mxu0 %v1927_v63 }
  0x78   : > { %1234 = vmatpush1.bf16.msra.mxu1 %v1922_v0 }
  0x79   : > { %1320 = vmatpush1.bf16.msra.mxu0 %v1925_v1  ;;  %1235 = vmatprep.subr.bf16.mxu1 %v1930_v2 }
  0x7a   : > { %1321 = vmatprep.subr.bf16.mxu0 %v1933_v3 }
  0x7c   : > { %1236 = vmatpush1.bf16.msra.mxu1 %v1928_v4 }
  0x7d   : > { %1322 = vmatpush1.bf16.msra.mxu0 %v1931_v5  ;;  %1237 = vmatprep.subr.bf16.mxu1 %v1936_v6 }
  0x7e   : > { %1323 = vmatprep.subr.bf16.mxu0 %v1939_v7  ;;  %v1412_v7 = vld [vmem:[%s2489_s4] sm:$0x3] }
  0x80   : > { %1238 = vmatpush1.bf16.msra.mxu1 %v1934_v8  ;;  %v1428_v8 = vld [vmem:[%s2490_s5] sm:$0x3] }
  0x81   : > { %1324 = vmatpush1.bf16.msra.mxu0 %v1937_v9  ;;  %1239 = vmatprep.subr.bf16.mxu1 %v1942_v10  ;;  %v1417_v9 = vrot.slane %v1412_v7, %v2447_v18  ;;  %v1421_v10 = vrot.slane %v1412_v7, %v2457_v20 }
  0x82   : > { %1325 = vmatprep.subr.bf16.mxu0 %v1945_v11 }
  0x84   : > { %1240 = vmatpush1.bf16.msra.mxu1 %v1940_v12  ;;  %v1433_v12 = vrot.slane %v1428_v8, %v2447_v18 }
  0x85   : > { %1326 = vmatpush1.bf16.msra.mxu0 %v1943_v13  ;;  %v1437_v13 = vrot.slane %v1428_v8, %v2457_v20 }
  0x87   : > { %1242 = vmatmul.mubr.bf16.vlgmr.msra.gmra.mrb[0].mxu1 %v1575_v14 }
  0x88   : > { %1328 = vmatmul.mubr.bf16.vlgmr.msra.gmra.mrb[0].mxu0 %v1579_v15 }
 0x15a   : > { %v1243_v23 = vpop.f32.mrb[0].mxu1 }
 0x15b   : > { %v1329_v24 = vpop.f32.mrb[0].mxu0  ;;  %v1245_v27 = vpop.f32.mrb[1].mxu1 }
 0x15c   : > { %v1718_v26 = vadd.f32 %v1329_v24, %v1243_v23  ;;  %v1331_v28 = vpop.f32.mrb[1].mxu0  ;;  %v1247_v32 = vpop.f32.mrb[2].mxu1 }
 0x15d   : > { %v1719_v31 = vadd.f32 %v1331_v28, %v1245_v27  ;;  %v1333_v33 = vpop.f32.mrb[2].mxu0  ;;  %v1249_v37 = vpop.f32.mrb[3].mxu1 }
 0x15e   : > { %v1365_v35 = vadd.f32 %v1718_v26, %v1358_v22  ;;  %v1720_v36 = vadd.f32 %v1333_v33, %v1247_v32  ;;  %v1335_v38 = vpop.f32.mrb[3].mxu0 }
 0x15f   : > { %v1366_v39 = vadd.f32 %v1719_v31, %v1362_v25  ;;  %v1721_v40 = vadd.f32 %v1335_v38, %v1249_v37 }
 0x160   : > { %v1367_v43 = vadd.f32 %v1720_v36, %v1358_v22  ;;  %v1375_v44 = vadd.f32 %v1371_v29, %v1365_v35 }
 0x161   : > { %v1368_v45 = vadd.f32 %v1721_v40, %v1362_v25  ;;  %v1376_v46 = vadd.f32 %v1372_v34, %v1366_v39 }
 0x162   : > { %v1377_v48 = vadd.f32 %v1373_v41, %v1367_v43 }
 0x163   : > { %v1379_v47 = vadd.f32 %v1376_v46, %v1375_v44  ;;  %v1378_v49 = vadd.f32 %v1374_v42, %v1368_v45 }
 0x165   : > { %1380 = vadd.xlane.f32.xlu0 %v1379_v47  ;;  %v1382_v50 = vadd.f32 %v1378_v49, %v1377_v48 }
 0x169   : > { %1383 = vadd.xlane.f32.xlu0 %v1382_v50 }
 0x1f2   : > { %v1381_v51 = vpop.xlane.xlu0 %1380 }
 0x1f3   : > { %v1386_v52 = vmul.f32 0.00390625, %v1381_v51 }
 0x1f5   : > { %v1388_v53 = vsub.f32 %v1375_v44, %v1386_v52  ;;  %v1389_v54 = vsub.f32 %v1376_v46, %v1386_v52 }
 0x1f6   : > { %v1384_v55 = vpop.xlane.xlu0 %1383 }
 0x1f7   : > { %v1387_v56 = vmul.f32 0.00390625, %v1384_v55  ;;  %v1392_v57 = vmul.f32 %v1388_v53, %v1388_v53  ;;  %v1393_v58 = vmul.f32 %v1389_v54, %v1389_v54 }
 0x1f9   : > { %v1390_v59 = vsub.f32 %v1377_v48, %v1387_v56  ;;  %v1391_v60 = vsub.f32 %v1378_v49, %v1387_v56  ;;  %v1396_v61 = vadd.f32 %v1393_v58, %v1392_v57 }
 0x1fb   : > { %1397 = vadd.xlane.f32.xlu1 %v1396_v61  ;;  %v1394_v62 = vmul.f32 %v1390_v59, %v1390_v59  ;;  %v1395_v63 = vmul.f32 %v1391_v60, %v1391_v60 }
 0x1fd   : > { %v1399_v0 = vadd.f32 %v1395_v63, %v1394_v62 }
 0x1ff   : > { %1400 = vadd.xlane.f32.xlu1 %v1399_v0 }
 0x288   : > { %v1398_v1 = vpop.xlane.xlu1 %1397 }
 0x289   : > { %v1402_v2 = vmul.f32 0.00390625, %v1398_v1 }
 0x28b   : > { %v1404_v3 = vadd.f32 1e-12, %v1402_v2 }
 0x28c   : > { %v1401_v4 = vpop.xlane.xlu1 %1400 }
 0x28d   : > { %1946 = vrsqrt.f32 %v1404_v3  ;;  %v1403_v5 = vmul.f32 0.00390625, %v1401_v4 }
 0x28f   : > { %v1405_v6 = vadd.f32 1e-12, %v1403_v5 }
 0x291   : > { %1948 = vrsqrt.f32 %v1405_v6 }
 0x297   : > { %v1947_v11 = vpop.eup %1946 }
 0x298   : > { %v1408_v14 = vmul.f32 %v1947_v11, %v1388_v53  ;;  %v1409_v15 = vmul.f32 %v1947_v11, %v1389_v54 }
 0x29a   : > { %v1424_v16 = vmul.f32 %v1417_v9, %v1408_v14  ;;  %v1425_v17 = vmul.f32 %v1421_v10, %v1409_v15 }
 0x29b   : > { %v1949_v19 = vpop.eup %1948 }
 0x29c   : > { %v1440_v21 = vadd.f32 %v1433_v12, %v1424_v16  ;;  %v1441_v22 = vadd.f32 %v1437_v13, %v1425_v17  ;;  %v1410_v23 = vmul.f32 %v1949_v19, %v1390_v59  ;;  %v1411_v24 = vmul.f32 %v1949_v19, %v1391_v60 }
 0x29e   : > { %v1716_v25 = vpack.c.bf16 %v1441_v22, %v1440_v21  ;;  %v1426_v26 = vmul.f32 %v1417_v9, %v1410_v23  ;;  %v1427_v27 = vmul.f32 %v1421_v10, %v1411_v24 }
 0x2a0   : > { %1456 = vst [vmem:[%s336_s17] sm:$0xff] %v1716_v25  ;;  %v1442_v18 = vadd.f32 %v1433_v12, %v1426_v26  ;;  %v1443_v20 = vadd.f32 %v1437_v13, %v1427_v27 }
 0x2a2   : > { %v1717_v28 = vpack.c.bf16 %v1443_v20, %v1442_v18 }
 0x2a4   : > { %1457 = vst [vmem:[%s336_s17 + $0x8] sm:$0xff] %v1717_v28 }
 0x2a5 PF: > { %s16_s23 = sadd.s32 1, %s1972_s23   ;;  %s2492_s21 = smov %s1968_s22 }
 0x2a6   : > { %p13_p5 = scmp.ge.s32.totalorder %s16_s23, 4   ;;  %s2493_s22 = smov %s2495_s24 }
 0x2a8   :  { %15 = sbr.rel (!%p13_p5) target bundleno = 2 (0x2), region = 88 }

// kernel: bert_base_uncased_forward.23
= control target key start
LH: loop header
LB: loop body
LE: loop exit
PB: predicated region body
PF: predicated region fallthrough
CT: control target
= control target key end

     0   :  { %v58_v9 = vlaneseq  ;;  %v620_v10 = vmov 1966171168   ;;  %vm473_vm0 = vcmask 1024   ;;  %s812_s1 = inlined_call_operand.vmem [shape: bf16[256,256], index: 1, kind: input, shape index: {}]   ;;  %s813_s0 = inlined_call_operand.vmem [shape: bf16[2,256], index: 0, kind: input, shape index: {}]   ;;  %s814_s3 = inlined_call_operand.vmem [shape: bf16[256,1], index: 3, kind: input, shape index: {}]   ;;  %s815_s2 = inlined_call_operand.vmem [shape: f32[1,256], index: 2, kind: input, shape index: {}]   ;;  %s816_s4 = inlined_call_operand.<no memory space> [shape: f32[1,1], index: 4, kind: input, shape index: {}]   ;;  %s817_s5 = inlined_call_operand.vmem [shape: f32[2,1], index: 5, kind: output, shape index: {}]  }
   0x1   :  { %v552_v0 = vld [vmem:[%s812_s1 + $0x4] ss:$8 sps:$4 sm:$0xff]   ;;  %v554_v1 = vld [vmem:[%s812_s1] ss:$8 sps:$4 sm:$0xff]   ;;  %v555_v2 = vld [vmem:[%s812_s1 + $0x14] ss:$8 sps:$4 sm:$0xff]   ;;  %v78_v11 = vunpack.c.l.s4 %v620_v10 }
   0x2   :  { %253 = vmatprep.subr.bf16.mxu0 %v552_v0  ;;  %v557_v3 = vld [vmem:[%s812_s1 + $0x10] ss:$8 sps:$4 sm:$0xff]   ;;  %v558_v4 = vld [vmem:[%s812_s1 + $0x24] ss:$8 sps:$4 sm:$0xff]   ;;  %v560_v5 = vld [vmem:[%s812_s1 + $0x20] ss:$8 sps:$4 sm:$0xff]  }
   0x3   :  { %254 = vmatpush1.bf16.msra.mxu0 %v554_v1  ;;  %v561_v6 = vld [vmem:[%s812_s1 + $0x34] ss:$8 sps:$4 sm:$0xff]   ;;  %v563_v7 = vld [vmem:[%s812_s1 + $0x30] ss:$8 sps:$4 sm:$0xff]   ;;  %v564_v8 = vld [vmem:[%s812_s1 + $0x44] ss:$8 sps:$4 sm:$0xff]   ;;  %v79_v15 = vunpack.c.0.s8 %v78_v11 }
   0x4   :  { %255 = vmatprep.subr.bf16.mxu0 %v555_v2  ;;  %v566_v12 = vld [vmem:[%s812_s1 + $0x40] ss:$8 sps:$4 sm:$0xff]   ;;  %v567_v13 = vld [vmem:[%s812_s1 + $0x54] ss:$8 sps:$4 sm:$0xff]   ;;  %v684_v14 = vshrl.u32 %v58_v9, 7  ;;  %v10_v9 = vstv %s816_s4 }
   0x5   :  { %v569_v16 = vld [vmem:[%s812_s1 + $0x50] ss:$8 sps:$4 sm:$0xff]   ;;  %v570_v17 = vld [vmem:[%s812_s1 + $0x64] ss:$8 sps:$4 sm:$0xff]   ;;  %v572_v19 = vld [vmem:[%s812_s1 + $0x60] ss:$8 sps:$4 sm:$0xff]  }
   0x6   :  { %v82_v18 = vsub.s32 %v79_v15, %v684_v14  ;;  %v479_v20 = vld.sshfl [vmem:[%s813_s0] sm:$0x11 pattern:$0x75316420]  ;;  %v573_v21 = vld [vmem:[%s812_s1 + $0x74] ss:$8 sps:$4 sm:$0xff]  }
   0x7   :  { %256 = vmatpush1.bf16.msra.mxu0 %v557_v3  ;;  %v76_v22 = vcombine.high %v479_v20, %v479_v20  ;;  %v600_v23 = vld [vmem:[%s814_s3 + $0x40] sm:$0xff]   ;;  %v602_v26 = vld [vmem:[%s814_s3 + $0x48] sm:$0xff]   ;;  %v604_v28 = vld [vmem:[%s814_s3 + $0x50] sm:$0xff]   ;;  %v60_v58 = vsub.s32 0, %v684_v14  ;;  %v64_v60 = vsub.s32 1, %v684_v14 }
   0x8   :  { %257 = vmatprep.subr.bf16.mxu0 %v558_v4  ;;  %v601_v24 = vld [vmem:[%s814_s3] sm:$0xff]   ;;  %529 = vmatprep.subr.bf16.mxu1 %v600_v23  ;;  %v603_v27 = vld [vmem:[%s814_s3 + $0x8] sm:$0xff]   ;;  %v575_v29 = vld [vmem:[%s812_s1 + $0x70] ss:$8 sps:$4 sm:$0xff]   ;;  %v83_v49 = vrot.slane %v479_v20, %v82_v18  ;;  %11 = vst [vmem:[#allocation2] sm:$0x1] %v10_v9 }
   0x9   :  { %v90_v25 = vrot.slane %v76_v22, %v82_v18  ;;  %530 = vmatpush3.bf16.msra.mxu1 %v601_v24  ;;  %v576_v30 = vld [vmem:[%s812_s1 + $0x84] ss:$8 sps:$4 sm:$0xff]   ;;  %v578_v31 = vld [vmem:[%s812_s1 + $0x80] ss:$8 sps:$4 sm:$0xff]   ;;  %v605_v32 = vld [vmem:[%s814_s3 + $0x10] sm:$0xff]  }
   0xa   :  { %531 = vmatprep.subr.bf16.mxu1 %v602_v26  ;;  %v579_v33 = vld [vmem:[%s812_s1 + $0x94] ss:$8 sps:$4 sm:$0xff]   ;;  %v581_v36 = vld [vmem:[%s812_s1 + $0x90] ss:$8 sps:$4 sm:$0xff]   ;;  %v582_v37 = vld [vmem:[%s812_s1 + $0xa4] ss:$8 sps:$4 sm:$0xff]  }
   0xb   :  { %258 = vmatpush1.bf16.msra.mxu0 %v560_v5  ;;  %285 = vmatprep.mubr.bf16.mxu0 %v90_v25  ;;  %v606_v34 = vld [vmem:[%s814_s3 + $0x58] sm:$0xff]   ;;  %v584_v38 = vld [vmem:[%s812_s1 + $0xa0] ss:$8 sps:$4 sm:$0xff]   ;;  %v588_v41 = vld [vmem:[%s812_s1 + $0xc4] ss:$8 sps:$4 sm:$0xff]  }
   0xc   :  { %259 = vmatprep.subr.bf16.mxu0 %v561_v6  ;;  %v607_v35 = vld [vmem:[%s814_s3 + $0x18] sm:$0xff]   ;;  %v590_v42 = vld [vmem:[%s812_s1 + $0xc0] ss:$8 sps:$4 sm:$0xff]   ;;  %v594_v45 = vld [vmem:[%s812_s1 + $0xe4] ss:$8 sps:$4 sm:$0xff]  }
   0xd   :  { %532 = vmatpush3.bf16.msra.mxu1 %v603_v27  ;;  %v585_v39 = vld [vmem:[%s812_s1 + $0xb4] ss:$8 sps:$4 sm:$0xff]   ;;  %v587_v40 = vld [vmem:[%s812_s1 + $0xb0] ss:$8 sps:$4 sm:$0xff]   ;;  %v596_v46 = vld [vmem:[%s812_s1 + $0xe0] ss:$8 sps:$4 sm:$0xff]  }
   0xe   :  { %533 = vmatprep.subr.bf16.mxu1 %v604_v28  ;;  %v591_v43 = vld [vmem:[%s812_s1 + $0xd4] ss:$8 sps:$4 sm:$0xff]   ;;  %v593_v44 = vld [vmem:[%s812_s1 + $0xd0] ss:$8 sps:$4 sm:$0xff]   ;;  %v608_v50 = vld [vmem:[%s814_s3 + $0x60] sm:$0xff]  }
   0xf   :  { %260 = vmatpush1.bf16.msra.mxu0 %v563_v7  ;;  %v597_v47 = vld [vmem:[%s812_s1 + $0xf4] ss:$8 sps:$4 sm:$0xff]   ;;  %v599_v48 = vld [vmem:[%s812_s1 + $0xf0] ss:$8 sps:$4 sm:$0xff]   ;;  %v609_v51 = vld [vmem:[%s814_s3 + $0x20] sm:$0xff]  }
  0x10   :  { %261 = vmatprep.subr.bf16.mxu0 %v564_v8  ;;  %v610_v52 = vld [vmem:[%s814_s3 + $0x68] sm:$0xff]   ;;  %v612_v54 = vld [vmem:[%s814_s3 + $0x70] sm:$0xff]   ;;  %v614_v56 = vld [vmem:[%s814_s3 + $0x78] sm:$0xff]  }
  0x11   :  { %534 = vmatpush3.bf16.msra.mxu1 %v605_v32  ;;  %v611_v53 = vld [vmem:[%s814_s3 + $0x28] sm:$0xff]   ;;  %v613_v55 = vld [vmem:[%s814_s3 + $0x30] sm:$0xff]   ;;  %v615_v57 = vld [vmem:[%s814_s3 + $0x38] sm:$0xff]  }
  0x12   :  { %535 = vmatprep.subr.bf16.mxu1 %v606_v34  ;;  %v56_v59 = vld [vmem:[%s815_s2] sm:$0x3] }
  0x13   :  { %262 = vmatpush1.bf16.msra.mxu0 %v566_v12  ;;  %v61_v61 = vrot.slane %v56_v59, %v60_v58  ;;  %v65_v62 = vrot.slane %v56_v59, %v64_v60  ;;  %v512_v11 = vld [vmem:[#allocation2] ss:$0 sm:$0xff] }
  0x14   :  { %263 = vmatprep.subr.bf16.mxu0 %v567_v13 }
  0x15   :  { %536 = vmatpush3.bf16.msra.mxu1 %v607_v35 }
  0x16   :  { %537 = vmatprep.subr.bf16.mxu1 %v608_v50 }
  0x17   :  { %264 = vmatpush1.bf16.msra.mxu0 %v569_v16 }
  0x18   :  { %265 = vmatprep.subr.bf16.mxu0 %v570_v17 }
  0x19   :  { %538 = vmatpush3.bf16.msra.mxu1 %v609_v51 }
  0x1a   :  { %539 = vmatprep.subr.bf16.mxu1 %v610_v52 }
  0x1b   :  { %266 = vmatpush1.bf16.msra.mxu0 %v572_v19 }
  0x1c   :  { %267 = vmatprep.subr.bf16.mxu0 %v573_v21 }
  0x1d   :  { %540 = vmatpush3.bf16.msra.mxu1 %v611_v53 }
  0x1e   :  { %541 = vmatprep.subr.bf16.mxu1 %v612_v54 }
  0x1f   :  { %268 = vmatpush1.bf16.msra.mxu0 %v575_v29 }
  0x20   :  { %269 = vmatprep.subr.bf16.mxu0 %v576_v30 }
  0x21   :  { %542 = vmatpush3.bf16.msra.mxu1 %v613_v55 }
  0x22   :  { %543 = vmatprep.subr.bf16.mxu1 %v614_v56 }
  0x23   :  { %270 = vmatpush1.bf16.msra.mxu0 %v578_v31 }
  0x24   :  { %271 = vmatprep.subr.bf16.mxu0 %v579_v33 }
  0x25   :  { %544 = vmatpush3.bf16.msra.mxu1 %v615_v57 }
  0x27   :  { %272 = vmatpush1.bf16.msra.mxu0 %v581_v36 }
  0x28   :  { %273 = vmatprep.subr.bf16.mxu0 %v582_v37 }
  0x2b   :  { %274 = vmatpush1.bf16.msra.mxu0 %v584_v38 }
  0x2c   :  { %275 = vmatprep.subr.bf16.mxu0 %v585_v39 }
  0x2f   :  { %276 = vmatpush1.bf16.msra.mxu0 %v587_v40 }
  0x30   :  { %277 = vmatprep.subr.bf16.mxu0 %v588_v41 }
  0x33   :  { %278 = vmatpush1.bf16.msra.mxu0 %v590_v42 }
  0x34   :  { %279 = vmatprep.subr.bf16.mxu0 %v591_v43 }
  0x37   :  { %280 = vmatpush1.bf16.msra.mxu0 %v593_v44 }
  0x38   :  { %281 = vmatprep.subr.bf16.mxu0 %v594_v45 }
  0x3b   :  { %282 = vmatpush1.bf16.msra.mxu0 %v596_v46 }
  0x3c   :  { %283 = vmatprep.subr.bf16.mxu0 %v597_v47 }
  0x3f   :  { %284 = vmatpush1.bf16.msra.mxu0 %v599_v48 }
  0x42   :  { %286 = vmatmul.mubr.bf16.vlgmr.msra.gmra.mrb[0].mxu0 %v83_v49 }
 0x115   :  { %v287_v63 = vpop.f32.mrb[0].mxu0 }
 0x116   :  { %v288_v0 = vadd.f32 %v287_v63, %v61_v61  ;;  %v289_v1 = vpop.f32.mrb[1].mxu0 }
 0x117   :  { %v290_v2 = vadd.f32 %v289_v1, %v65_v62  ;;  %v291_v3 = vpop.f32.mrb[2].mxu0 }
 0x118   :  { %616 = vtanh.f32 %v288_v0  ;;  %v292_v4 = vpop.f32.mrb[3].mxu0 }
 0x119   :  { %618 = vtanh.f32 %v290_v2 }
 0x122   :  { %v617_v5 = vpop.eup %616 }
 0x123   :  { %v619_v6 = vpop.eup %618  ;;  %v296_v8 = vpack.c.bf16 %v617_v5, %v617_v5 }
 0x124   :  { %v297_v7 = vpack.c.bf16 %v619_v6, %v619_v6 }
 0x126   :  { %465 = vmatprep.mubr.bf16.mxu1 %v297_v7 }
 0x127   :  { %466 = vmatmul.mubr.bf16.vlgmr.msra.gmra.mrb[0].mxu1 %v296_v8 }
 0x1fa   :  { %v545_v10 = vpop.f32.mrb[0].mxu1 }
 0x1fb   :  { %v546_v12 = vpop.f32.mrb[1].mxu1 }
 0x1fc   :  { %v547_v13 = vadd.f32 %v546_v12, %v545_v10  ;;  %v548_v14 = vpop.f32.mrb[2].mxu1 }
 0x1fd   :  { %v549_v15 = vpop.f32.mrb[3].mxu1 }
 0x1fe   :  { %v468_v16 = vadd.f32 %v547_v13, %v512_v11 }
 0x200   :  { %474 = vst.msk [vmem:[%s817_s5] sm:$0x3] %vm473_vm0, %v468_v16 }

</bundles_post_ra>
